<compile_context>
chip_gen: v7x
topology: tpu7x:2x2x1
jax: 0.10.0
libtpu: 0.0.40
codegen_flags: <defaults>
</compile_context>

<pallas_src>
import functools
import math

import jax
import jax.numpy as jnp
from jax.experimental import pallas as pl
from jax.experimental.pallas import tpu as pltpu

BN_EPS = 1e-5
CPAD = 128              # output-channel lane padding -> lane-dense (unmasked) vst
NUM_CLASSES = 10
TILE_M_MAX = 512        # im2col rows per grid step
VMEM_LIMIT_BYTES = 32 * 1024 * 1024
# Per-step VMEM at tm=512, K<=640, bf16, double-buffered:
#   2*(512*640 + 512*128)*2B (patches+ds/res) + 640*128*2*2B (weights)
#   + 2*512*128*2B (out)  ~= 2.4 MiB  -> fits v5e/v6e and v7x's 64 MiB easily.


def _round_up(x, m):
    return (x + m - 1) // m * m


# ----------------------------- Pallas kernel --------------------------------
def _conv_kernel(*refs, relu, has_res, has_ds, has_head,
                 n_img=0, rows_per_img=1, tm=0):
    """One grid step of conv-as-matmul with a fused epilogue.

    acc = patches @ W + bias (+ residual) (+ ds_patches @ W_ds + ds_bias)
    out = relu(acc)  -> stored as an activation tile, or (head variant)
    accumulated into a per-image pooled sum; the pooled mean goes through the
    classifier Linear on the last grid step.  Epilogue math stays in f32."""
    it = iter(refs)
    p_ref, w_ref, b_ref = next(it), next(it), next(it)
    r_ref = next(it) if has_res else None
    if has_ds:
        dp_ref, dw_ref, db_ref = next(it), next(it), next(it)
    if has_head:
        cw_ref, cb_ref = next(it), next(it)
    o_ref = next(it)

    acc = jnp.dot(p_ref[...], w_ref[...], preferred_element_type=jnp.float32)
    acc = acc + b_ref[...]
    if has_res:
        acc = acc + r_ref[...].astype(jnp.float32)
    if has_ds:
        acc = acc + jnp.dot(dp_ref[...], dw_ref[...],
                            preferred_element_type=jnp.float32) + db_ref[...]
    if relu:
        acc = jnp.maximum(acc, 0.0)

    if not has_head:
        o_ref[...] = acc.astype(o_ref.dtype)
        return

    # Fused global-average-pool + Linear head (no separate head call, no HBM
    # round trip of the final activation).
    i = pl.program_id(0)

    @pl.when(i == 0)
    def _():
        o_ref[...] = jnp.zeros_like(o_ref)

    # Per-image one-hot row selector for this tile (no integer division).
    row = i * tm + jax.lax.broadcasted_iota(jnp.int32, (n_img, tm), 1)
    img_lo = jax.lax.broadcasted_iota(jnp.int32, (n_img, tm), 0) * rows_per_img
    sel = ((row >= img_lo) & (row < img_lo + rows_per_img)).astype(jnp.float32)
    o_ref[...] += jnp.dot(sel, acc, preferred_element_type=jnp.float32)

    @pl.when(i == pl.num_programs(0) - 1)
    def _():
        feat = o_ref[...] * (1.0 / rows_per_img)               # (n_img, 128) f32
        o_ref[...] = jnp.dot(feat, cw_ref[...],
                             preferred_element_type=jnp.float32) + cb_ref[...]


def conv_pallas(patches, w2d, bias, *, residual=None,
                ds_patches=None, ds_w=None, ds_b=None,
                head_w=None, head_b=None, n_img=None, rows_per_img=None,
                relu=True, tile_m_max=TILE_M_MAX):
    """Tiled, pipelined conv-as-matmul with fused BN-bias / residual /
    downsample-conv / ReLU (and optionally avg-pool + Linear head)."""
    M, K = patches.shape
    assert w2d.shape[0] == K

    M8 = _round_up(M, 8)
    tm = min(tile_m_max, M8)
    grid_m = pl.cdiv(M8, tm)
    Mp = grid_m * tm
    if Mp != M:   # rare fallback (never triggers at the shapes used here)
        pad = Mp - M
        patches = jnp.pad(patches, ((0, pad), (0, 0)))
        if residual is not None:
            residual = jnp.pad(residual, ((0, pad), (0, 0)))
        if ds_patches is not None:
            ds_patches = jnp.pad(ds_patches, ((0, pad), (0, 0)))

    has_res = residual is not None
    has_ds = ds_patches is not None
    has_head = head_w is not None

    in_specs = [
        pl.BlockSpec((tm, K), lambda i: (i, 0)),      # patches tile (streaming)
        pl.BlockSpec((K, CPAD), lambda i: (0, 0)),    # folded conv weights
        pl.BlockSpec((1, CPAD), lambda i: (0, 0)),    # folded BN bias
    ]
    args = [patches, w2d, bias]
    if has_res:
        in_specs.append(pl.BlockSpec((tm, CPAD), lambda i: (i, 0)))
        args.append(residual)
    if has_ds:
        Kd = ds_patches.shape[1]
        in_specs += [pl.BlockSpec((tm, Kd), lambda i: (i, 0)),
                     pl.BlockSpec((Kd, CPAD), lambda i: (0, 0)),
                     pl.BlockSpec((1, CPAD), lambda i: (0, 0))]
        args += [ds_patches, ds_w, ds_b]
    if has_head:
        in_specs += [pl.BlockSpec((CPAD, CPAD), lambda i: (0, 0)),
                     pl.BlockSpec((1, CPAD), lambda i: (0, 0))]
        args += [head_w, head_b]
        out_shape = jax.ShapeDtypeStruct((n_img, CPAD), jnp.float32)
        out_spec = pl.BlockSpec((n_img, CPAD), lambda i: (0, 0))
        sem = ("arbitrary",)          # logits output is a reduction over M tiles
    else:
        out_shape = jax.ShapeDtypeStruct((Mp, CPAD), jnp.bfloat16)
        out_spec = pl.BlockSpec((tm, CPAD), lambda i: (i, 0))
        sem = ("parallel",)

    kern = functools.partial(
        _conv_kernel, relu=relu, has_res=has_res, has_ds=has_ds,
        has_head=has_head, n_img=(n_img or 0),
        rows_per_img=(rows_per_img or 1), tm=tm)

    out = pl.pallas_call(
        kern,
        out_shape=out_shape,
        grid=(grid_m,),
        in_specs=in_specs,
        out_specs=out_spec,
        compiler_params=pltpu.CompilerParams(
            dimension_semantics=sem, vmem_limit_bytes=VMEM_LIMIT_BYTES),
    )(*args)
    if has_head:
        return out
    return out[:M] if Mp != M else out


# ------------------------------- JAX glue -----------------------------------
def extract_patches(x, cin, ksize, stride, padding):
    """im2col on NHWC.  Only the real channels [:cin] are packed; the flattened
    K = ksize*ksize*cin is zero-padded to the next multiple of 128 (appended as
    a zeros block inside the same concatenate, no extra pass)."""
    N, H, W, _ = x.shape
    xc = x[..., :cin]
    if padding:
        xc = jnp.pad(xc, ((0, 0), (padding, padding), (padding, padding), (0, 0)))
    Ho = (H + 2 * padding - ksize) // stride + 1
    Wo = (W + 2 * padding - ksize) // stride + 1
    cols = []
    for i in range(ksize):
        for j in range(ksize):
            cols.append(xc[:, i: i + (Ho - 1) * stride + 1: stride,
                           j: j + (Wo - 1) * stride + 1: stride, :])
    kreal = ksize * ksize * cin
    kpad = _round_up(kreal, 128)
    if kpad != kreal:
        cols.append(jnp.zeros((N, Ho, Wo, kpad - kreal), x.dtype))
    patches = jnp.concatenate(cols, axis=-1) if len(cols) > 1 else cols[0]
    return patches.reshape(N * Ho * Wo, kpad), (N, Ho, Wo)


def basic_block(x, p, stride, cin, cout, head=None):
    n, h, w, _ = x.shape
    # conv1 + bn1 + relu
    p1, (n, ho, wo) = extract_patches(x, cin=cin, ksize=3, stride=stride, padding=1)
    out1 = conv_pallas(p1, p["c1_w"], p["c1_b"]).reshape(n, ho, wo, CPAD)
    # conv2 + bn2 + identity/downsample + relu, fully fused in one kernel
    p2, _ = extract_patches(out1, cin=cout, ksize=3, stride=1, padding=1)
    kwargs = {}
    if "d_w" in p:   # downsample conv fused into the conv2 kernel
        dp, _ = extract_patches(x, cin=cin, ksize=1, stride=stride, padding=0)
        kwargs.update(ds_patches=dp, ds_w=p["d_w"], ds_b=p["d_b"])
    else:            # identity residual (same shape, stride 1)
        kwargs.update(residual=x.reshape(n * h * w, CPAD))
    if head is not None:   # fuse avg-pool + classifier into the last conv
        kwargs.update(head_w=head[0], head_b=head[1],
                      n_img=n, rows_per_img=ho * wo)
        return conv_pallas(p2, p["c2_w"], p["c2_b"], **kwargs)   # (n, CPAD) logits
    out = conv_pallas(p2, p["c2_w"], p["c2_b"], **kwargs)
    return out.reshape(n, ho, wo, CPAD)


def resnet_forward(x_nchw, params):
    x = jnp.transpose(x_nchw, (0, 2, 3, 1)).astype(jnp.bfloat16)   # NCHW -> NHWC
    # stem: conv3x3(3,16) + bn + relu
    p, (n, h, w) = extract_patches(x, cin=3, ksize=3, stride=1, padding=1)
    x = conv_pallas(p, params["stem_w"], params["stem_b"]).reshape(n, h, w, CPAD)
    x = basic_block(x, params["layer1"], stride=1, cin=16, cout=16)
    x = basic_block(x, params["layer2"], stride=2, cin=16, cout=32)
    logits = basic_block(x, params["layer3"], stride=2, cin=32, cout=64,
                         head=(params["clf_w"], params["clf_b"]))
    return logits[:, :NUM_CLASSES]


# --------------------------- parameter creation -----------------------------
def _kaiming_conv(key, kh, kw, cin, cout):
    # kaiming_normal_(mode='fan_out', nonlinearity='relu'): std = sqrt(2/fan_out)
    fan_out = cout * kh * kw
    std = math.sqrt(2.0 / fan_out)
    return jax.random.normal(key, (kh, kw, cin, cout), jnp.float32) * std


def _fold_and_pack(w):
    """Fold eval-mode BatchNorm (gamma=1, beta=0, mean=0, var=1) into the conv
    weights; pack to (Kpad, CPAD) bf16 with K = kh*kw*cin (tap-major over the
    REAL cin) padded to a multiple of 128, plus a (1, CPAD) f32 bias."""
    kh, kw, cin, cout = w.shape
    scale = 1.0 / math.sqrt(1.0 + BN_EPS)             # gamma / sqrt(var + eps)
    kreal = kh * kw * cin
    kpad = _round_up(kreal, 128)
    wf = (w * scale).reshape(kreal, cout)
    wp = jnp.zeros((kpad, CPAD), jnp.float32).at[:kreal, :cout].set(wf)
    bp = jnp.zeros((1, CPAD), jnp.float32)            # beta - mean*scale = 0
    return wp.astype(jnp.bfloat16), bp


def make_params(key, num_classes=NUM_CLASSES):
    keys = iter(jax.random.split(key, 16))
    params = {}
    params["stem_w"], params["stem_b"] = _fold_and_pack(
        _kaiming_conv(next(keys), 3, 3, 3, 16))

    def make_block(cin, cout, downsample):
        p = {}
        p["c1_w"], p["c1_b"] = _fold_and_pack(_kaiming_conv(next(keys), 3, 3, cin, cout))
        p["c2_w"], p["c2_b"] = _fold_and_pack(_kaiming_conv(next(keys), 3, 3, cout, cout))
        if downsample:
            p["d_w"], p["d_b"] = _fold_and_pack(_kaiming_conv(next(keys), 1, 1, cin, cout))
        return p

    params["layer1"] = make_block(16, 16, downsample=False)
    params["layer2"] = make_block(16, 32, downsample=True)
    params["layer3"] = make_block(32, 64, downsample=True)

    # Linear(64, num_classes): PyTorch default uniform(-1/sqrt(in), 1/sqrt(in)),
    # padded to (CPAD, CPAD) so the fused head's store is lane-dense; kept f32.
    bound = 1.0 / math.sqrt(64.0)
    kw_, kb_ = jax.random.split(next(keys))
    w = jax.random.uniform(kw_, (64, num_classes), jnp.float32, -bound, bound)
    b = jax.random.uniform(kb_, (num_classes,), jnp.float32, -bound, bound)
    params["clf_w"] = jnp.zeros((CPAD, CPAD), jnp.float32).at[:64, :num_classes].set(w)
    params["clf_b"] = jnp.zeros((1, CPAD), jnp.float32).at[0, :num_classes].set(b)
    return params


# ---------------------------------- main ------------------------------------
if __name__ == "__main__":
    key = jax.random.PRNGKey(0)
    pkey, xkey = jax.random.split(key)
    params = make_params(pkey, num_classes=NUM_CLASSES)
    # small CIFAR-like input: batch=2, channels=3, spatial=16x16 (NCHW)
    x = jax.random.normal(xkey, (2, 3, 16, 16), jnp.float32)

    logits = jax.jit(resnet_forward)(x, params)
    jax.block_until_ready(logits)
    assert logits.shape == (2, NUM_CLASSES) and logits.dtype == jnp.float32
    print("KERNEL_OK")
</pallas_src>

<mosaic_0001>
module attributes {stable_mosaic.version = 11 : i64} {
  func.func @_conv_kernel(%arg0: i32, %arg1: memref<512x128xbf16, #tpu.memory_space<vmem>>, %arg2: memref<128x128xbf16, #tpu.memory_space<vmem>>, %arg3: memref<1x128xf32, #tpu.memory_space<vmem>>, %arg4: memref<512x128xbf16, #tpu.memory_space<vmem>>) attributes {dimension_semantics = [#tpu.dimension_semantics<parallel>], iteration_bounds = array<i64: 1>, scalar_prefetch = 0 : i64, scratch_operands = 0 : i64, tpu.core_type = #tpu.core_type<tc>, window_params = [{transform_indices = @transform_0, window_bounds = array<i64: 512, 128>}, {pipeline_mode = #tpu.pipeline_mode<synchronous>, transform_indices = @transform_1, window_bounds = array<i64: 128, 128>}, {pipeline_mode = #tpu.pipeline_mode<synchronous>, transform_indices = @transform_2, window_bounds = array<i64: 1, 128>}, {transform_indices = @transform_3, window_bounds = array<i64: 512, 128>}]} {
    %c0 = arith.constant 0 : index
    %c0_0 = arith.constant 0 : index
    %0 = vector.load %arg1[%c0, %c0_0] : memref<512x128xbf16, #tpu.memory_space<vmem>>, vector<512x128xbf16>
    %c0_1 = arith.constant 0 : index
    %c0_2 = arith.constant 0 : index
    %1 = vector.load %arg2[%c0_1, %c0_2] : memref<128x128xbf16, #tpu.memory_space<vmem>>, vector<128x128xbf16>
    %cst = arith.constant dense<0.000000e+00> : vector<512x128xf32>
    %2 = tpu.matmul %0, %1, %cst {dimension_numbers = #tpu.dot_dimension_numbers<[1], [0], [0], [1], [0, 0, 1, 1], [], []>} : vector<512x128xbf16>, vector<128x128xbf16>, vector<512x128xf32> -> vector<512x128xf32>
    %c0_3 = arith.constant 0 : index
    %c0_4 = arith.constant 0 : index
    %3 = vector.load %arg3[%c0_3, %c0_4] : memref<1x128xf32, #tpu.memory_space<vmem>>, vector<1x128xf32>
    %4 = vector.broadcast %3 : vector<1x128xf32> to vector<512x128xf32>
    %5 = arith.addf %2, %4 : vector<512x128xf32>
    %cst_5 = arith.constant 0.000000e+00 : f32
    %6 = vector.broadcast %cst_5 : f32 to vector<512x128xf32>
    %7 = arith.maximumf %5, %6 : vector<512x128xf32>
    %8 = arith.truncf %7 : vector<512x128xf32> to vector<512x128xbf16>
    %c0_6 = arith.constant 0 : index
    %c0_7 = arith.constant 0 : index
    %9 = vector.load %arg4[%c0_6, %c0_7] : memref<512x128xbf16, #tpu.memory_space<vmem>>, vector<512x128xbf16>
    tpu.vector_store %arg4[%c0_6, %c0_7], %8 {strides = array<i32>} : memref<512x128xbf16, #tpu.memory_space<vmem>>, vector<512x128xbf16>,
    return
  }
  func.func @transform_0(%arg0: i32) -> (i32, i32) {
    %c0_i32 = arith.constant 0 : i32
    %c0_i32_0 = arith.constant 0 : i32
    return %arg0, %c0_i32 : i32, i32
  }
  func.func @transform_1(%arg0: i32) -> (i32, i32) {
    %c0_i32 = arith.constant 0 : i32
    %c0_i32_0 = arith.constant 0 : i32
    %c0_i32_1 = arith.constant 0 : i32
    return %c0_i32, %c0_i32_0 : i32, i32
  }
  func.func @transform_2(%arg0: i32) -> (i32, i32) {
    %c0_i32 = arith.constant 0 : i32
    %c0_i32_0 = arith.constant 0 : i32
    %c0_i32_1 = arith.constant 0 : i32
    return %c0_i32, %c0_i32_0 : i32, i32
  }
  func.func @transform_3(%arg0: i32) -> (i32, i32) {
    %c0_i32 = arith.constant 0 : i32
    %c0_i32_0 = arith.constant 0 : i32
    return %arg0, %c0_i32 : i32, i32
  }
}

module attributes {stable_mosaic.version = 11 : i64} {
  func.func @_conv_kernel(%arg0: i32, %arg1: memref<512x256xbf16, #tpu.memory_space<vmem>>, %arg2: memref<256x128xbf16, #tpu.memory_space<vmem>>, %arg3: memref<1x128xf32, #tpu.memory_space<vmem>>, %arg4: memref<512x128xbf16, #tpu.memory_space<vmem>>) attributes {dimension_semantics = [#tpu.dimension_semantics<parallel>], iteration_bounds = array<i64: 1>, scalar_prefetch = 0 : i64, scratch_operands = 0 : i64, tpu.core_type = #tpu.core_type<tc>, window_params = [{transform_indices = @transform_0, window_bounds = array<i64: 512, 256>}, {pipeline_mode = #tpu.pipeline_mode<synchronous>, transform_indices = @transform_1, window_bounds = array<i64: 256, 128>}, {pipeline_mode = #tpu.pipeline_mode<synchronous>, transform_indices = @transform_2, window_bounds = array<i64: 1, 128>}, {transform_indices = @transform_3, window_bounds = array<i64: 512, 128>}]} {
    %c0 = arith.constant 0 : index
    %c0_0 = arith.constant 0 : index
    %0 = vector.load %arg1[%c0, %c0_0] : memref<512x256xbf16, #tpu.memory_space<vmem>>, vector<512x256xbf16>
    %c0_1 = arith.constant 0 : index
    %c0_2 = arith.constant 0 : index
    %1 = vector.load %arg2[%c0_1, %c0_2] : memref<256x128xbf16, #tpu.memory_space<vmem>>, vector<256x128xbf16>
    %cst = arith.constant dense<0.000000e+00> : vector<512x128xf32>
    %2 = tpu.matmul %0, %1, %cst {dimension_numbers = #tpu.dot_dimension_numbers<[1], [0], [0], [1], [0, 0, 1, 1], [], []>} : vector<512x256xbf16>, vector<256x128xbf16>, vector<512x128xf32> -> vector<512x128xf32>
    %c0_3 = arith.constant 0 : index
    %c0_4 = arith.constant 0 : index
    %3 = vector.load %arg3[%c0_3, %c0_4] : memref<1x128xf32, #tpu.memory_space<vmem>>, vector<1x128xf32>
    %4 = vector.broadcast %3 : vector<1x128xf32> to vector<512x128xf32>
    %5 = arith.addf %2, %4 : vector<512x128xf32>
    %cst_5 = arith.constant 0.000000e+00 : f32
    %6 = vector.broadcast %cst_5 : f32 to vector<512x128xf32>
    %7 = arith.maximumf %5, %6 : vector<512x128xf32>
    %8 = arith.truncf %7 : vector<512x128xf32> to vector<512x128xbf16>
    %c0_6 = arith.constant 0 : index
    %c0_7 = arith.constant 0 : index
    %9 = vector.load %arg4[%c0_6, %c0_7] : memref<512x128xbf16, #tpu.memory_space<vmem>>, vector<512x128xbf16>
    tpu.vector_store %arg4[%c0_6, %c0_7], %8 {strides = array<i32>} : memref<512x128xbf16, #tpu.memory_space<vmem>>, vector<512x128xbf16>,
    return
  }
  func.func @transform_0(%arg0: i32) -> (i32, i32) {
    %c0_i32 = arith.constant 0 : i32
    %c0_i32_0 = arith.constant 0 : i32
    return %arg0, %c0_i32 : i32, i32
  }
  func.func @transform_1(%arg0: i32) -> (i32, i32) {
    %c0_i32 = arith.constant 0 : i32
    %c0_i32_0 = arith.constant 0 : i32
    %c0_i32_1 = arith.constant 0 : i32
    return %c0_i32, %c0_i32_0 : i32, i32
  }
  func.func @transform_2(%arg0: i32) -> (i32, i32) {
    %c0_i32 = arith.constant 0 : i32
    %c0_i32_0 = arith.constant 0 : i32
    %c0_i32_1 = arith.constant 0 : i32
    return %c0_i32, %c0_i32_0 : i32, i32
  }
  func.func @transform_3(%arg0: i32) -> (i32, i32) {
    %c0_i32 = arith.constant 0 : i32
    %c0_i32_0 = arith.constant 0 : i32
    return %arg0, %c0_i32 : i32, i32
  }
}

module attributes {stable_mosaic.version = 11 : i64} {
  func.func @_conv_kernel(%arg0: i32, %arg1: memref<512x256xbf16, #tpu.memory_space<vmem>>, %arg2: memref<256x128xbf16, #tpu.memory_space<vmem>>, %arg3: memref<1x128xf32, #tpu.memory_space<vmem>>, %arg4: memref<512x128xbf16, #tpu.memory_space<vmem>>, %arg5: memref<512x128xbf16, #tpu.memory_space<vmem>>) attributes {dimension_semantics = [#tpu.dimension_semantics<parallel>], iteration_bounds = array<i64: 1>, scalar_prefetch = 0 : i64, scratch_operands = 0 : i64, tpu.core_type = #tpu.core_type<tc>, window_params = [{transform_indices = @transform_0, window_bounds = array<i64: 512, 256>}, {pipeline_mode = #tpu.pipeline_mode<synchronous>, transform_indices = @transform_1, window_bounds = array<i64: 256, 128>}, {pipeline_mode = #tpu.pipeline_mode<synchronous>, transform_indices = @transform_2, window_bounds = array<i64: 1, 128>}, {transform_indices = @transform_3, window_bounds = array<i64: 512, 128>}, {transform_indices = @transform_4, window_bounds = array<i64: 512, 128>}]} {
    %c0 = arith.constant 0 : index
    %c0_0 = arith.constant 0 : index
    %0 = vector.load %arg1[%c0, %c0_0] : memref<512x256xbf16, #tpu.memory_space<vmem>>, vector<512x256xbf16>
    %c0_1 = arith.constant 0 : index
    %c0_2 = arith.constant 0 : index
    %1 = vector.load %arg2[%c0_1, %c0_2] : memref<256x128xbf16, #tpu.memory_space<vmem>>, vector<256x128xbf16>
    %cst = arith.constant dense<0.000000e+00> : vector<512x128xf32>
    %2 = tpu.matmul %0, %1, %cst {dimension_numbers = #tpu.dot_dimension_numbers<[1], [0], [0], [1], [0, 0, 1, 1], [], []>} : vector<512x256xbf16>, vector<256x128xbf16>, vector<512x128xf32> -> vector<512x128xf32>
    %c0_3 = arith.constant 0 : index
    %c0_4 = arith.constant 0 : index
    %3 = vector.load %arg3[%c0_3, %c0_4] : memref<1x128xf32, #tpu.memory_space<vmem>>, vector<1x128xf32>
    %4 = vector.broadcast %3 : vector<1x128xf32> to vector<512x128xf32>
    %5 = arith.addf %2, %4 : vector<512x128xf32>
    %c0_5 = arith.constant 0 : index
    %c0_6 = arith.constant 0 : index
    %6 = vector.load %arg4[%c0_5, %c0_6] : memref<512x128xbf16, #tpu.memory_space<vmem>>, vector<512x128xbf16>
    %7 = arith.extf %6 : vector<512x128xbf16> to vector<512x128xf32>
    %8 = arith.addf %5, %7 : vector<512x128xf32>
    %cst_7 = arith.constant 0.000000e+00 : f32
    %9 = vector.broadcast %cst_7 : f32 to vector<512x128xf32>
    %10 = arith.maximumf %8, %9 : vector<512x128xf32>
    %11 = arith.truncf %10 : vector<512x128xf32> to vector<512x128xbf16>
    %c0_8 = arith.constant 0 : index
    %c0_9 = arith.constant 0 : index
    %12 = vector.load %arg5[%c0_8, %c0_9] : memref<512x128xbf16, #tpu.memory_space<vmem>>, vector<512x128xbf16>
    tpu.vector_store %arg5[%c0_8, %c0_9], %11 {strides = array<i32>} : memref<512x128xbf16, #tpu.memory_space<vmem>>, vector<512x128xbf16>,
    return
  }
  func.func @transform_0(%arg0: i32) -> (i32, i32) {
    %c0_i32 = arith.constant 0 : i32
    %c0_i32_0 = arith.constant 0 : i32
    return %arg0, %c0_i32 : i32, i32
  }
  func.func @transform_1(%arg0: i32) -> (i32, i32) {
    %c0_i32 = arith.constant 0 : i32
    %c0_i32_0 = arith.constant 0 : i32
    %c0_i32_1 = arith.constant 0 : i32
    return %c0_i32, %c0_i32_0 : i32, i32
  }
  func.func @transform_2(%arg0: i32) -> (i32, i32) {
    %c0_i32 = arith.constant 0 : i32
    %c0_i32_0 = arith.constant 0 : i32
    %c0_i32_1 = arith.constant 0 : i32
    return %c0_i32, %c0_i32_0 : i32, i32
  }
  func.func @transform_3(%arg0: i32) -> (i32, i32) {
    %c0_i32 = arith.constant 0 : i32
    %c0_i32_0 = arith.constant 0 : i32
    return %arg0, %c0_i32 : i32, i32
  }
  func.func @transform_4(%arg0: i32) -> (i32, i32) {
    %c0_i32 = arith.constant 0 : i32
    %c0_i32_0 = arith.constant 0 : i32
    return %arg0, %c0_i32 : i32, i32
  }
}

module attributes {stable_mosaic.version = 11 : i64} {
  func.func @_conv_kernel(%arg0: i32, %arg1: memref<128x256xbf16, #tpu.memory_space<vmem>>, %arg2: memref<256x128xbf16, #tpu.memory_space<vmem>>, %arg3: memref<1x128xf32, #tpu.memory_space<vmem>>, %arg4: memref<128x128xbf16, #tpu.memory_space<vmem>>) attributes {dimension_semantics = [#tpu.dimension_semantics<parallel>], iteration_bounds = array<i64: 1>, scalar_prefetch = 0 : i64, scratch_operands = 0 : i64, tpu.core_type = #tpu.core_type<tc>, window_params = [{transform_indices = @transform_0, window_bounds = array<i64: 128, 256>}, {pipeline_mode = #tpu.pipeline_mode<synchronous>, transform_indices = @transform_1, window_bounds = array<i64: 256, 128>}, {pipeline_mode = #tpu.pipeline_mode<synchronous>, transform_indices = @transform_2, window_bounds = array<i64: 1, 128>}, {transform_indices = @transform_3, window_bounds = array<i64: 128, 128>}]} {
    %c0 = arith.constant 0 : index
    %c0_0 = arith.constant 0 : index
    %0 = vector.load %arg1[%c0, %c0_0] : memref<128x256xbf16, #tpu.memory_space<vmem>>, vector<128x256xbf16>
    %c0_1 = arith.constant 0 : index
    %c0_2 = arith.constant 0 : index
    %1 = vector.load %arg2[%c0_1, %c0_2] : memref<256x128xbf16, #tpu.memory_space<vmem>>, vector<256x128xbf16>
    %cst = arith.constant dense<0.000000e+00> : vector<128x128xf32>
    %2 = tpu.matmul %0, %1, %cst {dimension_numbers = #tpu.dot_dimension_numbers<[1], [0], [0], [1], [0, 0, 1, 1], [], []>} : vector<128x256xbf16>, vector<256x128xbf16>, vector<128x128xf32> -> vector<128x128xf32>
    %c0_3 = arith.constant 0 : index
    %c0_4 = arith.constant 0 : index
    %3 = vector.load %arg3[%c0_3, %c0_4] : memref<1x128xf32, #tpu.memory_space<vmem>>, vector<1x128xf32>
    %4 = vector.broadcast %3 : vector<1x128xf32> to vector<128x128xf32>
    %5 = arith.addf %2, %4 : vector<128x128xf32>
    %cst_5 = arith.constant 0.000000e+00 : f32
    %6 = vector.broadcast %cst_5 : f32 to vector<128x128xf32>
    %7 = arith.maximumf %5, %6 : vector<128x128xf32>
    %8 = arith.truncf %7 : vector<128x128xf32> to vector<128x128xbf16>
    %c0_6 = arith.constant 0 : index
    %c0_7 = arith.constant 0 : index
    %9 = vector.load %arg4[%c0_6, %c0_7] : memref<128x128xbf16, #tpu.memory_space<vmem>>, vector<128x128xbf16>
    tpu.vector_store %arg4[%c0_6, %c0_7], %8 {strides = array<i32>} : memref<128x128xbf16, #tpu.memory_space<vmem>>, vector<128x128xbf16>,
    return
  }
  func.func @transform_0(%arg0: i32) -> (i32, i32) {
    %c0_i32 = arith.constant 0 : i32
    %c0_i32_0 = arith.constant 0 : i32
    return %arg0, %c0_i32 : i32, i32
  }
  func.func @transform_1(%arg0: i32) -> (i32, i32) {
    %c0_i32 = arith.constant 0 : i32
    %c0_i32_0 = arith.constant 0 : i32
    %c0_i32_1 = arith.constant 0 : i32
    return %c0_i32, %c0_i32_0 : i32, i32
  }
  func.func @transform_2(%arg0: i32) -> (i32, i32) {
    %c0_i32 = arith.constant 0 : i32
    %c0_i32_0 = arith.constant 0 : i32
    %c0_i32_1 = arith.constant 0 : i32
    return %c0_i32, %c0_i32_0 : i32, i32
  }
  func.func @transform_3(%arg0: i32) -> (i32, i32) {
    %c0_i32 = arith.constant 0 : i32
    %c0_i32_0 = arith.constant 0 : i32
    return %arg0, %c0_i32 : i32, i32
  }
}

module attributes {stable_mosaic.version = 11 : i64} {
  func.func @_conv_kernel(%arg0: i32, %arg1: memref<128x384xbf16, #tpu.memory_space<vmem>>, %arg2: memref<384x128xbf16, #tpu.memory_space<vmem>>, %arg3: memref<1x128xf32, #tpu.memory_space<vmem>>, %arg4: memref<128x128xbf16, #tpu.memory_space<vmem>>, %arg5: memref<128x128xbf16, #tpu.memory_space<vmem>>, %arg6: memref<1x128xf32, #tpu.memory_space<vmem>>, %arg7: memref<128x128xbf16, #tpu.memory_space<vmem>>) attributes {dimension_semantics = [#tpu.dimension_semantics<parallel>], iteration_bounds = array<i64: 1>, scalar_prefetch = 0 : i64, scratch_operands = 0 : i64, tpu.core_type = #tpu.core_type<tc>, window_params = [{transform_indices = @transform_0, window_bounds = array<i64: 128, 384>}, {pipeline_mode = #tpu.pipeline_mode<synchronous>, transform_indices = @transform_1, window_bounds = array<i64: 384, 128>}, {pipeline_mode = #tpu.pipeline_mode<synchronous>, transform_indices = @transform_2, window_bounds = array<i64: 1, 128>}, {transform_indices = @transform_3, window_bounds = array<i64: 128, 128>}, {pipeline_mode = #tpu.pipeline_mode<synchronous>, transform_indices = @transform_4, window_bounds = array<i64: 128, 128>}, {pipeline_mode = #tpu.pipeline_mode<synchronous>, transform_indices = @transform_5, window_bounds = array<i64: 1, 128>}, {transform_indices = @transform_6, window_bounds = array<i64: 128, 128>}]} {
    %c0 = arith.constant 0 : index
    %c0_0 = arith.constant 0 : index
    %0 = vector.load %arg1[%c0, %c0_0] : memref<128x384xbf16, #tpu.memory_space<vmem>>, vector<128x384xbf16>
    %c0_1 = arith.constant 0 : index
    %c0_2 = arith.constant 0 : index
    %1 = vector.load %arg2[%c0_1, %c0_2] : memref<384x128xbf16, #tpu.memory_space<vmem>>, vector<384x128xbf16>
    %cst = arith.constant dense<0.000000e+00> : vector<128x128xf32>
    %2 = tpu.matmul %0, %1, %cst {dimension_numbers = #tpu.dot_dimension_numbers<[1], [0], [0], [1], [0, 0, 1, 1], [], []>} : vector<128x384xbf16>, vector<384x128xbf16>, vector<128x128xf32> -> vector<128x128xf32>
    %c0_3 = arith.constant 0 : index
    %c0_4 = arith.constant 0 : index
    %3 = vector.load %arg3[%c0_3, %c0_4] : memref<1x128xf32, #tpu.memory_space<vmem>>, vector<1x128xf32>
    %4 = vector.broadcast %3 : vector<1x128xf32> to vector<128x128xf32>
    %5 = arith.addf %2, %4 : vector<128x128xf32>
    %c0_5 = arith.constant 0 : index
    %c0_6 = arith.constant 0 : index
    %6 = vector.load %arg4[%c0_5, %c0_6] : memref<128x128xbf16, #tpu.memory_space<vmem>>, vector<128x128xbf16>
    %c0_7 = arith.constant 0 : index
    %c0_8 = arith.constant 0 : index
    %7 = vector.load %arg5[%c0_7, %c0_8] : memref<128x128xbf16, #tpu.memory_space<vmem>>, vector<128x128xbf16>
    %cst_9 = arith.constant dense<0.000000e+00> : vector<128x128xf32>
    %8 = tpu.matmul %6, %7, %cst_9 {dimension_numbers = #tpu.dot_dimension_numbers<[1], [0], [0], [1], [0, 0, 1, 1], [], []>} : vector<128x128xbf16>, vector<128x128xbf16>, vector<128x128xf32> -> vector<128x128xf32>
    %9 = arith.addf %5, %8 : vector<128x128xf32>
    %c0_10 = arith.constant 0 : index
    %c0_11 = arith.constant 0 : index
    %10 = vector.load %arg6[%c0_10, %c0_11] : memref<1x128xf32, #tpu.memory_space<vmem>>, vector<1x128xf32>
    %11 = vector.broadcast %10 : vector<1x128xf32> to vector<128x128xf32>
    %12 = arith.addf %9, %11 : vector<128x128xf32>
    %cst_12 = arith.constant 0.000000e+00 : f32
    %13 = vector.broadcast %cst_12 : f32 to vector<128x128xf32>
    %14 = arith.maximumf %12, %13 : vector<128x128xf32>
    %15 = arith.truncf %14 : vector<128x128xf32> to vector<128x128xbf16>
    %c0_13 = arith.constant 0 : index
    %c0_14 = arith.constant 0 : index
    %16 = vector.load %arg7[%c0_13, %c0_14] : memref<128x128xbf16, #tpu.memory_space<vmem>>, vector<128x128xbf16>
    tpu.vector_store %arg7[%c0_13, %c0_14], %15 {strides = array<i32>} : memref<128x128xbf16, #tpu.memory_space<vmem>>, vector<128x128xbf16>,
    return
  }
  func.func @transform_0(%arg0: i32) -> (i32, i32) {
    %c0_i32 = arith.constant 0 : i32
    %c0_i32_0 = arith.constant 0 : i32
    return %arg0, %c0_i32 : i32, i32
  }
  func.func @transform_1(%arg0: i32) -> (i32, i32) {
    %c0_i32 = arith.constant 0 : i32
    %c0_i32_0 = arith.constant 0 : i32
    %c0_i32_1 = arith.constant 0 : i32
    return %c0_i32, %c0_i32_0 : i32, i32
  }
  func.func @transform_2(%arg0: i32) -> (i32, i32) {
    %c0_i32 = arith.constant 0 : i32
    %c0_i32_0 = arith.constant 0 : i32
    %c0_i32_1 = arith.constant 0 : i32
    return %c0_i32, %c0_i32_0 : i32, i32
  }
  func.func @transform_3(%arg0: i32) -> (i32, i32) {
    %c0_i32 = arith.constant 0 : i32
    %c0_i32_0 = arith.constant 0 : i32
    return %arg0, %c0_i32 : i32, i32
  }
  func.func @transform_4(%arg0: i32) -> (i32, i32) {
    %c0_i32 = arith.constant 0 : i32
    %c0_i32_0 = arith.constant 0 : i32
    %c0_i32_1 = arith.constant 0 : i32
    return %c0_i32, %c0_i32_0 : i32, i32
  }
  func.func @transform_5(%arg0: i32) -> (i32, i32) {
    %c0_i32 = arith.constant 0 : i32
    %c0_i32_0 = arith.constant 0 : i32
    %c0_i32_1 = arith.constant 0 : i32
    return %c0_i32, %c0_i32_0 : i32, i32
  }
  func.func @transform_6(%arg0: i32) -> (i32, i32) {
    %c0_i32 = arith.constant 0 : i32
    %c0_i32_0 = arith.constant 0 : i32
    return %arg0, %c0_i32 : i32, i32
  }
}

module attributes {stable_mosaic.version = 11 : i64} {
  func.func @_conv_kernel(%arg0: i32, %arg1: memref<32x384xbf16, #tpu.memory_space<vmem>>, %arg2: memref<384x128xbf16, #tpu.memory_space<vmem>>, %arg3: memref<1x128xf32, #tpu.memory_space<vmem>>, %arg4: memref<32x128xbf16, #tpu.memory_space<vmem>>) attributes {dimension_semantics = [#tpu.dimension_semantics<parallel>], iteration_bounds = array<i64: 1>, scalar_prefetch = 0 : i64, scratch_operands = 0 : i64, tpu.core_type = #tpu.core_type<tc>, window_params = [{transform_indices = @transform_0, window_bounds = array<i64: 32, 384>}, {pipeline_mode = #tpu.pipeline_mode<synchronous>, transform_indices = @transform_1, window_bounds = array<i64: 384, 128>}, {pipeline_mode = #tpu.pipeline_mode<synchronous>, transform_indices = @transform_2, window_bounds = array<i64: 1, 128>}, {transform_indices = @transform_3, window_bounds = array<i64: 32, 128>}]} {
    %c0 = arith.constant 0 : index
    %c0_0 = arith.constant 0 : index
    %0 = vector.load %arg1[%c0, %c0_0] : memref<32x384xbf16, #tpu.memory_space<vmem>>, vector<32x384xbf16>
    %c0_1 = arith.constant 0 : index
    %c0_2 = arith.constant 0 : index
    %1 = vector.load %arg2[%c0_1, %c0_2] : memref<384x128xbf16, #tpu.memory_space<vmem>>, vector<384x128xbf16>
    %cst = arith.constant dense<0.000000e+00> : vector<32x128xf32>
    %2 = tpu.matmul %0, %1, %cst {dimension_numbers = #tpu.dot_dimension_numbers<[1], [0], [0], [1], [0, 0, 1, 1], [], []>} : vector<32x384xbf16>, vector<384x128xbf16>, vector<32x128xf32> -> vector<32x128xf32>
    %c0_3 = arith.constant 0 : index
    %c0_4 = arith.constant 0 : index
    %3 = vector.load %arg3[%c0_3, %c0_4] : memref<1x128xf32, #tpu.memory_space<vmem>>, vector<1x128xf32>
    %4 = vector.broadcast %3 : vector<1x128xf32> to vector<32x128xf32>
    %5 = arith.addf %2, %4 : vector<32x128xf32>
    %cst_5 = arith.constant 0.000000e+00 : f32
    %6 = vector.broadcast %cst_5 : f32 to vector<32x128xf32>
    %7 = arith.maximumf %5, %6 : vector<32x128xf32>
    %8 = arith.truncf %7 : vector<32x128xf32> to vector<32x128xbf16>
    %c0_6 = arith.constant 0 : index
    %c0_7 = arith.constant 0 : index
    %9 = vector.load %arg4[%c0_6, %c0_7] : memref<32x128xbf16, #tpu.memory_space<vmem>>, vector<32x128xbf16>
    tpu.vector_store %arg4[%c0_6, %c0_7], %8 {strides = array<i32>} : memref<32x128xbf16, #tpu.memory_space<vmem>>, vector<32x128xbf16>,
    return
  }
  func.func @transform_0(%arg0: i32) -> (i32, i32) {
    %c0_i32 = arith.constant 0 : i32
    %c0_i32_0 = arith.constant 0 : i32
    return %arg0, %c0_i32 : i32, i32
  }
  func.func @transform_1(%arg0: i32) -> (i32, i32) {
    %c0_i32 = arith.constant 0 : i32
    %c0_i32_0 = arith.constant 0 : i32
    %c0_i32_1 = arith.constant 0 : i32
    return %c0_i32, %c0_i32_0 : i32, i32
  }
  func.func @transform_2(%arg0: i32) -> (i32, i32) {
    %c0_i32 = arith.constant 0 : i32
    %c0_i32_0 = arith.constant 0 : i32
    %c0_i32_1 = arith.constant 0 : i32
    return %c0_i32, %c0_i32_0 : i32, i32
  }
  func.func @transform_3(%arg0: i32) -> (i32, i32) {
    %c0_i32 = arith.constant 0 : i32
    %c0_i32_0 = arith.constant 0 : i32
    return %arg0, %c0_i32 : i32, i32
  }
}

module attributes {stable_mosaic.version = 11 : i64} {
  func.func @_conv_kernel(%arg0: i32, %arg1: memref<32x640xbf16, #tpu.memory_space<vmem>>, %arg2: memref<640x128xbf16, #tpu.memory_space<vmem>>, %arg3: memref<1x128xf32, #tpu.memory_space<vmem>>, %arg4: memref<32x128xbf16, #tpu.memory_space<vmem>>, %arg5: memref<128x128xbf16, #tpu.memory_space<vmem>>, %arg6: memref<1x128xf32, #tpu.memory_space<vmem>>, %arg7: memref<128x128xf32, #tpu.memory_space<vmem>>, %arg8: memref<1x128xf32, #tpu.memory_space<vmem>>, %arg9: memref<2x128xf32, #tpu.memory_space<vmem>>) attributes {dimension_semantics = [#tpu.dimension_semantics<arbitrary>], iteration_bounds = array<i64: 1>, scalar_prefetch = 0 : i64, scratch_operands = 0 : i64, tpu.core_type = #tpu.core_type<tc>, window_params = [{transform_indices = @transform_0, window_bounds = array<i64: 32, 640>}, {pipeline_mode = #tpu.pipeline_mode<synchronous>, transform_indices = @transform_1, window_bounds = array<i64: 640, 128>}, {pipeline_mode = #tpu.pipeline_mode<synchronous>, transform_indices = @transform_2, window_bounds = array<i64: 1, 128>}, {transform_indices = @transform_3, window_bounds = array<i64: 32, 128>}, {pipeline_mode = #tpu.pipeline_mode<synchronous>, transform_indices = @transform_4, window_bounds = array<i64: 128, 128>}, {pipeline_mode = #tpu.pipeline_mode<synchronous>, transform_indices = @transform_5, window_bounds = array<i64: 1, 128>}, {pipeline_mode = #tpu.pipeline_mode<synchronous>, transform_indices = @transform_6, window_bounds = array<i64: 128, 128>}, {pipeline_mode = #tpu.pipeline_mode<synchronous>, transform_indices = @transform_7, window_bounds = array<i64: 1, 128>}, {pipeline_mode = #tpu.pipeline_mode<synchronous>, transform_indices = @transform_8, window_bounds = array<i64: 2, 128>}]} {
    %c0 = arith.constant 0 : index
    %c0_0 = arith.constant 0 : index
    %0 = vector.load %arg1[%c0, %c0_0] : memref<32x640xbf16, #tpu.memory_space<vmem>>, vector<32x640xbf16>
    %c0_1 = arith.constant 0 : index
    %c0_2 = arith.constant 0 : index
    %1 = vector.load %arg2[%c0_1, %c0_2] : memref<640x128xbf16, #tpu.memory_space<vmem>>, vector<640x128xbf16>
    %cst = arith.constant dense<0.000000e+00> : vector<32x128xf32>
    %2 = tpu.matmul %0, %1, %cst {dimension_numbers = #tpu.dot_dimension_numbers<[1], [0], [0], [1], [0, 0, 1, 1], [], []>} : vector<32x640xbf16>, vector<640x128xbf16>, vector<32x128xf32> -> vector<32x128xf32>
    %c0_3 = arith.constant 0 : index
    %c0_4 = arith.constant 0 : index
    %3 = vector.load %arg3[%c0_3, %c0_4] : memref<1x128xf32, #tpu.memory_space<vmem>>, vector<1x128xf32>
    %4 = vector.broadcast %3 : vector<1x128xf32> to vector<32x128xf32>
    %5 = arith.addf %2, %4 : vector<32x128xf32>
    %c0_5 = arith.constant 0 : index
    %c0_6 = arith.constant 0 : index
    %6 = vector.load %arg4[%c0_5, %c0_6] : memref<32x128xbf16, #tpu.memory_space<vmem>>, vector<32x128xbf16>
    %c0_7 = arith.constant 0 : index
    %c0_8 = arith.constant 0 : index
    %7 = vector.load %arg5[%c0_7, %c0_8] : memref<128x128xbf16, #tpu.memory_space<vmem>>, vector<128x128xbf16>
    %cst_9 = arith.constant dense<0.000000e+00> : vector<32x128xf32>
    %8 = tpu.matmul %6, %7, %cst_9 {dimension_numbers = #tpu.dot_dimension_numbers<[1], [0], [0], [1], [0, 0, 1, 1], [], []>} : vector<32x128xbf16>, vector<128x128xbf16>, vector<32x128xf32> -> vector<32x128xf32>
    %9 = arith.addf %5, %8 : vector<32x128xf32>
    %c0_10 = arith.constant 0 : index
    %c0_11 = arith.constant 0 : index
    %10 = vector.load %arg6[%c0_10, %c0_11] : memref<1x128xf32, #tpu.memory_space<vmem>>, vector<1x128xf32>
    %11 = vector.broadcast %10 : vector<1x128xf32> to vector<32x128xf32>
    %12 = arith.addf %9, %11 : vector<32x128xf32>
    %cst_12 = arith.constant 0.000000e+00 : f32
    %13 = vector.broadcast %cst_12 : f32 to vector<32x128xf32>
    %14 = arith.maximumf %12, %13 : vector<32x128xf32>
    %c0_i32 = arith.constant 0 : i32
    %15 = arith.cmpi eq, %arg0, %c0_i32 : i32
    %16 = arith.extui %15 : i1 to i32
    %c0_i32_13 = arith.constant 0 : i32
    %17 = arith.cmpi ne, %16, %c0_i32_13 : i32
    scf.if %17 {
      %cst_22 = arith.constant 0.000000e+00 : f32
      %39 = vector.broadcast %cst_22 : f32 to vector<2x128xf32>
      %c0_23 = arith.constant 0 : index
      %c0_24 = arith.constant 0 : index
      %40 = vector.load %arg9[%c0_23, %c0_24] : memref<2x128xf32, #tpu.memory_space<vmem>>, vector<2x128xf32>
      tpu.vector_store %arg9[%c0_23, %c0_24], %39 {strides = array<i32>} : memref<2x128xf32, #tpu.memory_space<vmem>>, vector<2x128xf32>,
    } else {
    }
    %c32_i32 = arith.constant 32 : i32
    %18 = arith.muli %arg0, %c32_i32 : i32
    %19 = tpu.iota {dimensions = array<i32: 1>} : vector<2x32xi32>
    %20 = vector.broadcast %18 : i32 to vector<2x32xi32>
    %21 = arith.addi %20, %19 : vector<2x32xi32>
    %22 = tpu.iota {dimensions = array<i32: 0>} : vector<2x32xi32>
    %c16_i32 = arith.constant 16 : i32
    %23 = vector.broadcast %c16_i32 : i32 to vector<2x32xi32>
    %24 = arith.muli %22, %23 : vector<2x32xi32>
    %25 = arith.cmpi sge, %21, %24 : vector<2x32xi32>
    %c16_i32_14 = arith.constant 16 : i32
    %26 = vector.broadcast %c16_i32_14 : i32 to vector<2x32xi32>
    %27 = arith.addi %24, %26 : vector<2x32xi32>
    %28 = arith.cmpi slt, %21, %27 : vector<2x32xi32>
    %29 = arith.andi %25, %28 : vector<2x32xi1>
    %30 = arith.extui %29 : vector<2x32xi1> to vector<2x32xi32>
    %31 = arith.sitofp %30 : vector<2x32xi32> to vector<2x32xf32>
    %c0_15 = arith.constant 0 : index
    %c0_16 = arith.constant 0 : index
    %32 = vector.load %arg9[%c0_15, %c0_16] : memref<2x128xf32, #tpu.memory_space<vmem>>, vector<2x128xf32>
    %cst_17 = arith.constant dense<0.000000e+00> : vector<2x128xf32>
    %33 = tpu.matmul %31, %14, %cst_17 {dimension_numbers = #tpu.dot_dimension_numbers<[1], [0], [0], [1], [0, 0, 1, 1], [], []>} : vector<2x32xf32>, vector<32x128xf32>, vector<2x128xf32> -> vector<2x128xf32>
    %34 = arith.addf %32, %33 : vector<2x128xf32>
    %c0_18 = arith.constant 0 : index
    %c0_19 = arith.constant 0 : index
    %35 = vector.load %arg9[%c0_18, %c0_19] : memref<2x128xf32, #tpu.memory_space<vmem>>, vector<2x128xf32>
    tpu.vector_store %arg9[%c0_18, %c0_19], %34 {strides = array<i32>} : memref<2x128xf32, #tpu.memory_space<vmem>>, vector<2x128xf32>,
    %c0_i32_20 = arith.constant 0 : i32
    %36 = arith.cmpi eq, %arg0, %c0_i32_20 : i32
    %37 = arith.extui %36 : i1 to i32
    %c0_i32_21 = arith.constant 0 : i32
    %38 = arith.cmpi ne, %37, %c0_i32_21 : i32
    scf.if %38 {
      %c0_22 = arith.constant 0 : index
      %c0_23 = arith.constant 0 : index
      %39 = vector.load %arg9[%c0_22, %c0_23] : memref<2x128xf32, #tpu.memory_space<vmem>>, vector<2x128xf32>
      %cst_24 = arith.constant 6.250000e-02 : f32
      %40 = vector.broadcast %cst_24 : f32 to vector<2x128xf32>
      %41 = arith.mulf %39, %40 : vector<2x128xf32>
      %c0_25 = arith.constant 0 : index
      %c0_26 = arith.constant 0 : index
      %42 = vector.load %arg7[%c0_25, %c0_26] : memref<128x128xf32, #tpu.memory_space<vmem>>, vector<128x128xf32>
      %cst_27 = arith.constant dense<0.000000e+00> : vector<2x128xf32>
      %43 = tpu.matmul %41, %42, %cst_27 {dimension_numbers = #tpu.dot_dimension_numbers<[1], [0], [0], [1], [0, 0, 1, 1], [], []>} : vector<2x128xf32>, vector<128x128xf32>, vector<2x128xf32> -> vector<2x128xf32>
      %c0_28 = arith.constant 0 : index
      %c0_29 = arith.constant 0 : index
      %44 = vector.load %arg8[%c0_28, %c0_29] : memref<1x128xf32, #tpu.memory_space<vmem>>, vector<1x128xf32>
      %45 = vector.broadcast %44 : vector<1x128xf32> to vector<2x128xf32>
      %46 = arith.addf %43, %45 : vector<2x128xf32>
      %c0_30 = arith.constant 0 : index
      %c0_31 = arith.constant 0 : index
      %47 = vector.load %arg9[%c0_30, %c0_31] : memref<2x128xf32, #tpu.memory_space<vmem>>, vector<2x128xf32>
      tpu.vector_store %arg9[%c0_30, %c0_31], %46 {strides = array<i32>} : memref<2x128xf32, #tpu.memory_space<vmem>>, vector<2x128xf32>,
    } else {
    }
    return
  }
  func.func @transform_0(%arg0: i32) -> (i32, i32) {
    %c0_i32 = arith.constant 0 : i32
    %c0_i32_0 = arith.constant 0 : i32
    return %arg0, %c0_i32 : i32, i32
  }
  func.func @transform_1(%arg0: i32) -> (i32, i32) {
    %c0_i32 = arith.constant 0 : i32
    %c0_i32_0 = arith.constant 0 : i32
    %c0_i32_1 = arith.constant 0 : i32
    return %c0_i32, %c0_i32_0 : i32, i32
  }
  func.func @transform_2(%arg0: i32) -> (i32, i32) {
    %c0_i32 = arith.constant 0 : i32
    %c0_i32_0 = arith.constant 0 : i32
    %c0_i32_1 = arith.constant 0 : i32
    return %c0_i32, %c0_i32_0 : i32, i32
  }
  func.func @transform_3(%arg0: i32) -> (i32, i32) {
    %c0_i32 = arith.constant 0 : i32
    %c0_i32_0 = arith.constant 0 : i32
    return %arg0, %c0_i32 : i32, i32
  }
  func.func @transform_4(%arg0: i32) -> (i32, i32) {
    %c0_i32 = arith.constant 0 : i32
    %c0_i32_0 = arith.constant 0 : i32
    %c0_i32_1 = arith.constant 0 : i32
    return %c0_i32, %c0_i32_0 : i32, i32
  }
  func.func @transform_5(%arg0: i32) -> (i32, i32) {
    %c0_i32 = arith.constant 0 : i32
    %c0_i32_0 = arith.constant 0 : i32
    %c0_i32_1 = arith.constant 0 : i32
    return %c0_i32, %c0_i32_0 : i32, i32
  }
  func.func @transform_6(%arg0: i32) -> (i32, i32) {
    %c0_i32 = arith.constant 0 : i32
    %c0_i32_0 = arith.constant 0 : i32
    %c0_i32_1 = arith.constant 0 : i32
    return %c0_i32, %c0_i32_0 : i32, i32
  }
  func.func @transform_7(%arg0: i32) -> (i32, i32) {
    %c0_i32 = arith.constant 0 : i32
    %c0_i32_0 = arith.constant 0 : i32
    %c0_i32_1 = arith.constant 0 : i32
    return %c0_i32, %c0_i32_0 : i32, i32
  }
  func.func @transform_8(%arg0: i32) -> (i32, i32) {
    %c0_i32 = arith.constant 0 : i32
    %c0_i32_0 = arith.constant 0 : i32
    %c0_i32_1 = arith.constant 0 : i32
    return %c0_i32, %c0_i32_0 : i32, i32
  }
}

</mosaic_0001>

<bundles_post_ra>
// kernel: resnet_forward.7
= control target key start
LH: loop header
LB: loop body
LE: loop exit
PB: predicated region body
PF: predicated region fallthrough
CT: control target
= control target key end

     0   :  { %s1860_s1 = inlined_call_operand.vmem [shape: bf16[128,128], index: 1, kind: input, shape index: {}]   ;;  %s1861_s0 = inlined_call_operand.vmem [shape: bf16[512,128], index: 0, kind: input, shape index: {}]   ;;  %s1862_s2 = inlined_call_operand.vmem [shape: f32[1,128], index: 2, kind: input, shape index: {}]   ;;  %s1863_s3 = inlined_call_operand.vmem [shape: bf16[512,128], index: 3, kind: output, shape index: {}]  }
   0x1   :  { %v1515_v0 = vld [vmem:[%s1860_s1] sm:$0xff]   ;;  %v1516_v1 = vld [vmem:[%s1860_s1 + $0x8] sm:$0xff]   ;;  %v1517_v2 = vld [vmem:[%s1860_s1 + $0x10] sm:$0xff]  }
   0x2   :  { %1419 = vmatprep.subr.bf16.mxu0 %v1515_v0  ;;  %1499 = vmatprep.subr.bf16.mxu1 %v1515_v0  ;;  %v1518_v3 = vld [vmem:[%s1860_s1 + $0x18] sm:$0xff]   ;;  %v1523_v4 = vld [vmem:[%s1861_s0] sm:$0xff]   ;;  %v1520_v7 = vld [vmem:[%s1860_s1 + $0x28] sm:$0xff]  }
   0x3   :  { %1420 = vmatpush3.bf16.msra.mxu0 %v1515_v0  ;;  %1507 = vmatpush3.bf16.msra.mxu1 %v1515_v0  ;;  %v1524_v5 = vld [vmem:[%s1861_s0 + $0x80] sm:$0xff]   ;;  %v1521_v8 = vld [vmem:[%s1860_s1 + $0x30] sm:$0xff]   ;;  %v1522_v9 = vld [vmem:[%s1860_s1 + $0x38] sm:$0xff]  }
   0x4   :  { %1421 = vmatprep.subr.bf16.mxu0 %v1516_v1  ;;  %1500 = vmatprep.subr.bf16.mxu1 %v1516_v1  ;;  %v1519_v6 = vld [vmem:[%s1860_s1 + $0x20] sm:$0xff]   ;;  %v1525_v10 = vld [vmem:[%s1861_s0 + $0x8] sm:$0xff]   ;;  %v1527_v12 = vld [vmem:[%s1861_s0 + $0x10] sm:$0xff]  }
   0x5   :  { %1435 = vmatprep.mubr.bf16.mxu0 %v1523_v4  ;;  %1467 = vmatprep.mubr.bf16.mxu1 %v1524_v5  ;;  %v1526_v11 = vld [vmem:[%s1861_s0 + $0x88] sm:$0xff]   ;;  %v1528_v13 = vld [vmem:[%s1861_s0 + $0x90] sm:$0xff]   ;;  %v1529_v14 = vld [vmem:[%s1861_s0 + $0x18] sm:$0xff]  }
   0x6   :  { %v1530_v15 = vld [vmem:[%s1861_s0 + $0x98] sm:$0xff]   ;;  %v1531_v16 = vld [vmem:[%s1861_s0 + $0x20] sm:$0xff]   ;;  %v1533_v18 = vld [vmem:[%s1861_s0 + $0x28] sm:$0xff]  }
   0x7   :  { %1422 = vmatpush3.bf16.msra.mxu0 %v1516_v1  ;;  %1508 = vmatpush3.bf16.msra.mxu1 %v1516_v1  ;;  %v1532_v17 = vld [vmem:[%s1861_s0 + $0xa0] sm:$0xff]   ;;  %v1534_v19 = vld [vmem:[%s1861_s0 + $0xa8] sm:$0xff]   ;;  %v1535_v20 = vld [vmem:[%s1861_s0 + $0x30] sm:$0xff]  }
   0x8   :  { %1423 = vmatprep.subr.bf16.mxu0 %v1517_v2  ;;  %1501 = vmatprep.subr.bf16.mxu1 %v1517_v2  ;;  %v1536_v21 = vld [vmem:[%s1861_s0 + $0xb0] sm:$0xff]   ;;  %v1537_v22 = vld [vmem:[%s1861_s0 + $0x38] sm:$0xff]   ;;  %v1539_v24 = vld [vmem:[%s1861_s0 + $0x40] sm:$0xff]  }
   0x9   :  { %v1538_v23 = vld [vmem:[%s1861_s0 + $0xb8] sm:$0xff]   ;;  %v1540_v25 = vld [vmem:[%s1861_s0 + $0xc0] sm:$0xff]   ;;  %v1541_v26 = vld [vmem:[%s1861_s0 + $0x48] sm:$0xff]  }
   0xa   :  { %v1542_v27 = vld [vmem:[%s1861_s0 + $0xc8] sm:$0xff]   ;;  %v1543_v28 = vld [vmem:[%s1861_s0 + $0x50] sm:$0xff]   ;;  %v1545_v30 = vld [vmem:[%s1861_s0 + $0x58] sm:$0xff]  }
   0xb   :  { %1424 = vmatpush3.bf16.msra.mxu0 %v1517_v2  ;;  %1509 = vmatpush3.bf16.msra.mxu1 %v1517_v2  ;;  %v1544_v29 = vld [vmem:[%s1861_s0 + $0xd0] sm:$0xff]   ;;  %v1546_v31 = vld [vmem:[%s1861_s0 + $0xd8] sm:$0xff]   ;;  %v1547_v32 = vld [vmem:[%s1861_s0 + $0x60] sm:$0xff]  }
   0xc   :  { %1425 = vmatprep.subr.bf16.mxu0 %v1518_v3  ;;  %1502 = vmatprep.subr.bf16.mxu1 %v1518_v3  ;;  %v1548_v33 = vld [vmem:[%s1861_s0 + $0xe0] sm:$0xff]   ;;  %v1549_v34 = vld [vmem:[%s1861_s0 + $0x68] sm:$0xff]   ;;  %v1551_v36 = vld [vmem:[%s1861_s0 + $0x70] sm:$0xff]  }
   0xd   :  { %v1550_v35 = vld [vmem:[%s1861_s0 + $0xe8] sm:$0xff]   ;;  %v1552_v37 = vld [vmem:[%s1861_s0 + $0xf0] sm:$0xff]   ;;  %v1553_v38 = vld [vmem:[%s1861_s0 + $0x78] sm:$0xff]  }
   0xe   :  { %v1554_v39 = vld [vmem:[%s1861_s0 + $0xf8] sm:$0xff]   ;;  %v1698_v40 = vld [vmem:[%s1862_s2] ss:$0 sm:$0xff] }
   0xf   :  { %1426 = vmatpush3.bf16.msra.mxu0 %v1518_v3  ;;  %1510 = vmatpush3.bf16.msra.mxu1 %v1518_v3 }
  0x10   :  { %1427 = vmatprep.subr.bf16.mxu0 %v1519_v6  ;;  %1503 = vmatprep.subr.bf16.mxu1 %v1519_v6 }
  0x13   :  { %1428 = vmatpush3.bf16.msra.mxu0 %v1519_v6  ;;  %1511 = vmatpush3.bf16.msra.mxu1 %v1519_v6 }
  0x14   :  { %1429 = vmatprep.subr.bf16.mxu0 %v1520_v7  ;;  %1504 = vmatprep.subr.bf16.mxu1 %v1520_v7 }
  0x17   :  { %1430 = vmatpush3.bf16.msra.mxu0 %v1520_v7  ;;  %1512 = vmatpush3.bf16.msra.mxu1 %v1520_v7 }
  0x18   :  { %1431 = vmatprep.subr.bf16.mxu0 %v1521_v8  ;;  %1505 = vmatprep.subr.bf16.mxu1 %v1521_v8 }
  0x1b   :  { %1432 = vmatpush3.bf16.msra.mxu0 %v1521_v8  ;;  %1513 = vmatpush3.bf16.msra.mxu1 %v1521_v8 }
  0x1c   :  { %1433 = vmatprep.subr.bf16.mxu0 %v1522_v9  ;;  %1506 = vmatprep.subr.bf16.mxu1 %v1522_v9 }
  0x1f   :  { %1434 = vmatpush3.bf16.msra.mxu0 %v1522_v9  ;;  %1514 = vmatpush3.bf16.msra.mxu1 %v1522_v9 }
  0x22   :  { %1436 = vmatmul.mubr.bf16.vlgmr.msra.gmra.mrb[0].mxu0 %v1525_v10  ;;  %1468 = vmatmul.mubr.bf16.vlgmr.msra.gmra.mrb[0].mxu1 %v1526_v11 }
  0x23   :  { %1439 = vmatprep.mubr.bf16.mxu0 %v1527_v12  ;;  %1471 = vmatprep.mubr.bf16.mxu1 %v1528_v13 }
  0x2a   :  { %1440 = vmatmul.mubr.bf16.gmra.mrb[4].mxu0 %v1529_v14  ;;  %1472 = vmatmul.mubr.bf16.gmra.mrb[4].mxu1 %v1530_v15 }
  0x2b   :  { %1443 = vmatprep.mubr.bf16.mxu0 %v1531_v16  ;;  %1475 = vmatprep.mubr.bf16.mxu1 %v1532_v17 }
  0x32   :  { %1444 = vmatmul.mubr.bf16.gmra.mrb[8].mxu0 %v1533_v18  ;;  %1476 = vmatmul.mubr.bf16.gmra.mrb[8].mxu1 %v1534_v19 }
  0x33   :  { %1447 = vmatprep.mubr.bf16.mxu0 %v1535_v20  ;;  %1479 = vmatprep.mubr.bf16.mxu1 %v1536_v21 }
  0x3a   :  { %1448 = vmatmul.mubr.bf16.gmra.mrb[12].mxu0 %v1537_v22  ;;  %1480 = vmatmul.mubr.bf16.gmra.mrb[12].mxu1 %v1538_v23 }
  0x3b   :  { %1451 = vmatprep.mubr.bf16.mxu0 %v1539_v24  ;;  %1483 = vmatprep.mubr.bf16.mxu1 %v1540_v25 }
  0x42   :  { %1452 = vmatmul.mubr.bf16.gmra.mrb[16].mxu0 %v1541_v26  ;;  %1484 = vmatmul.mubr.bf16.gmra.mrb[16].mxu1 %v1542_v27 }
  0x43   :  { %1455 = vmatprep.mubr.bf16.mxu0 %v1543_v28  ;;  %1487 = vmatprep.mubr.bf16.mxu1 %v1544_v29 }
  0x4a   :  { %1456 = vmatmul.mubr.bf16.gmra.mrb[20].mxu0 %v1545_v30  ;;  %1488 = vmatmul.mubr.bf16.gmra.mrb[20].mxu1 %v1546_v31 }
  0x4b   :  { %1459 = vmatprep.mubr.bf16.mxu0 %v1547_v32  ;;  %1491 = vmatprep.mubr.bf16.mxu1 %v1548_v33 }
  0x52   :  { %1460 = vmatmul.mubr.bf16.gmra.mrb[24].mxu0 %v1549_v34  ;;  %1492 = vmatmul.mubr.bf16.gmra.mrb[24].mxu1 %v1550_v35 }
  0x53   :  { %1463 = vmatprep.mubr.bf16.mxu0 %v1551_v36  ;;  %1495 = vmatprep.mubr.bf16.mxu1 %v1552_v37 }
  0x5a   :  { %1464 = vmatmul.mubr.bf16.gmra.mrb[28].mxu0 %v1553_v38  ;;  %1496 = vmatmul.mubr.bf16.gmra.mrb[28].mxu1 %v1554_v39 }
  0xf5   :  { %v1437_v41 = vpop.f32.mrb[0].mxu0  ;;  %v1469_v42 = vpop.f32.mrb[0].mxu1 }
  0xf6   :  { %v385_v43 = vadd.f32 %v1437_v41, %v1698_v40  ;;  %v513_v44 = vadd.f32 %v1469_v42, %v1698_v40  ;;  %v376_v45 = vpop.f32.mrb[1].mxu0  ;;  %v504_v46 = vpop.f32.mrb[1].mxu1 }
  0xf7   :  { %v377_v47 = vadd.f32 %v1698_v40, %v376_v45  ;;  %v505_v48 = vadd.f32 %v1698_v40, %v504_v46  ;;  %v1438_v49 = vpop.f32.mrb[2].mxu0  ;;  %v1470_v50 = vpop.f32.mrb[2].mxu1 }
  0xf8   :  { %v388_v51 = vadd.f32 %v1438_v49, %v1698_v40  ;;  %v516_v52 = vadd.f32 %v1470_v50, %v1698_v40  ;;  %v379_v53 = vpop.f32.mrb[3].mxu0  ;;  %v507_v54 = vpop.f32.mrb[3].mxu1  ;;  %v633_v57 = vmax.f32 %v385_v43, 0.0  ;;  %v665_v58 = vmax.f32 %v513_v44, 0.0 }
  0xf9   :  { %v380_v55 = vadd.f32 %v1698_v40, %v379_v53  ;;  %v508_v56 = vadd.f32 %v1698_v40, %v507_v54  ;;  %v631_v61 = vmax.f32 %v377_v47, 0.0  ;;  %v663_v62 = vmax.f32 %v505_v48, 0.0 }
  0xfa   :  { %v634_v59 = vmax.f32 %v388_v51, 0.0  ;;  %v666_v60 = vmax.f32 %v516_v52, 0.0 }
  0xfb   :  { %v632_v63 = vmax.f32 %v380_v55, 0.0  ;;  %v664_v0 = vmax.f32 %v508_v56, 0.0 }
  0xfc   :  { %v1196_v1 = vpack.c.bf16 %v634_v59, %v633_v57  ;;  %v1276_v2 = vpack.c.bf16 %v666_v60, %v665_v58 }
  0xfd   :  { %v1191_v3 = vpack.c.bf16 %v632_v63, %v631_v61  ;;  %v1271_v4 = vpack.c.bf16 %v664_v0, %v663_v62  ;;  %v1441_v5 = vpop.f32.mrb[4].mxu0  ;;  %v1473_v6 = vpop.f32.mrb[4].mxu1 }
  0xfe   :  { %1348 = vst [vmem:[%s1863_s3 + $0x8] sm:$0xff] %v1196_v1   ;;  %1364 = vst [vmem:[%s1863_s3 + $0x88] sm:$0xff] %v1276_v2   ;;  %v401_v7 = vadd.f32 %v1441_v5, %v1698_v40  ;;  %v529_v8 = vadd.f32 %v1473_v6, %v1698_v40  ;;  %v392_v9 = vpop.f32.mrb[5].mxu0  ;;  %v520_v10 = vpop.f32.mrb[5].mxu1 }
  0xff   :  { %1192 = vst [vmem:[%s1863_s3] sm:$0xff] %v1191_v3   ;;  %1363 = vst [vmem:[%s1863_s3 + $0x80] sm:$0xff] %v1271_v4   ;;  %v393_v11 = vadd.f32 %v1698_v40, %v392_v9  ;;  %v521_v12 = vadd.f32 %v1698_v40, %v520_v10  ;;  %v1442_v13 = vpop.f32.mrb[6].mxu0  ;;  %v1474_v14 = vpop.f32.mrb[6].mxu1 }
 0x100   :  { %v404_v15 = vadd.f32 %v1442_v13, %v1698_v40  ;;  %v532_v16 = vadd.f32 %v1474_v14, %v1698_v40  ;;  %v395_v17 = vpop.f32.mrb[7].mxu0  ;;  %v523_v18 = vpop.f32.mrb[7].mxu1  ;;  %v637_v21 = vmax.f32 %v401_v7, 0.0  ;;  %v669_v22 = vmax.f32 %v529_v8, 0.0 }
 0x101   :  { %v396_v19 = vadd.f32 %v1698_v40, %v395_v17  ;;  %v524_v20 = vadd.f32 %v1698_v40, %v523_v18  ;;  %v635_v25 = vmax.f32 %v393_v11, 0.0  ;;  %v667_v26 = vmax.f32 %v521_v12, 0.0 }
 0x102   :  { %v638_v23 = vmax.f32 %v404_v15, 0.0  ;;  %v670_v24 = vmax.f32 %v532_v16, 0.0 }
 0x103   :  { %v636_v27 = vmax.f32 %v396_v19, 0.0  ;;  %v668_v28 = vmax.f32 %v524_v20, 0.0 }
 0x104   :  { %v1206_v29 = vpack.c.bf16 %v638_v23, %v637_v21  ;;  %v1286_v30 = vpack.c.bf16 %v670_v24, %v669_v22 }
 0x105   :  { %v1201_v31 = vpack.c.bf16 %v636_v27, %v635_v25  ;;  %v1281_v32 = vpack.c.bf16 %v668_v28, %v667_v26  ;;  %v1445_v33 = vpop.f32.mrb[8].mxu0  ;;  %v1477_v34 = vpop.f32.mrb[8].mxu1 }
 0x106   :  { %1350 = vst [vmem:[%s1863_s3 + $0x18] sm:$0xff] %v1206_v29   ;;  %1366 = vst [vmem:[%s1863_s3 + $0x98] sm:$0xff] %v1286_v30   ;;  %v417_v35 = vadd.f32 %v1445_v33, %v1698_v40  ;;  %v545_v36 = vadd.f32 %v1477_v34, %v1698_v40  ;;  %v408_v37 = vpop.f32.mrb[9].mxu0  ;;  %v536_v38 = vpop.f32.mrb[9].mxu1 }
 0x107   :  { %1349 = vst [vmem:[%s1863_s3 + $0x10] sm:$0xff] %v1201_v31   ;;  %1365 = vst [vmem:[%s1863_s3 + $0x90] sm:$0xff] %v1281_v32   ;;  %v409_v39 = vadd.f32 %v1698_v40, %v408_v37  ;;  %v537_v41 = vadd.f32 %v1698_v40, %v536_v38  ;;  %v1446_v42 = vpop.f32.mrb[10].mxu0  ;;  %v1478_v43 = vpop.f32.mrb[10].mxu1 }
 0x108   :  { %v420_v44 = vadd.f32 %v1446_v42, %v1698_v40  ;;  %v548_v45 = vadd.f32 %v1478_v43, %v1698_v40  ;;  %v411_v46 = vpop.f32.mrb[11].mxu0  ;;  %v539_v47 = vpop.f32.mrb[11].mxu1  ;;  %v641_v50 = vmax.f32 %v417_v35, 0.0  ;;  %v673_v51 = vmax.f32 %v545_v36, 0.0 }
 0x109   :  { %v412_v48 = vadd.f32 %v1698_v40, %v411_v46  ;;  %v540_v49 = vadd.f32 %v1698_v40, %v539_v47  ;;  %v639_v54 = vmax.f32 %v409_v39, 0.0  ;;  %v671_v55 = vmax.f32 %v537_v41, 0.0 }
 0x10a   :  { %v642_v52 = vmax.f32 %v420_v44, 0.0  ;;  %v674_v53 = vmax.f32 %v548_v45, 0.0 }
 0x10b   :  { %v640_v56 = vmax.f32 %v412_v48, 0.0  ;;  %v672_v57 = vmax.f32 %v540_v49, 0.0 }
 0x10c   :  { %v1216_v58 = vpack.c.bf16 %v642_v52, %v641_v50  ;;  %v1296_v59 = vpack.c.bf16 %v674_v53, %v673_v51 }
 0x10d   :  { %v1211_v60 = vpack.c.bf16 %v640_v56, %v639_v54  ;;  %v1291_v61 = vpack.c.bf16 %v672_v57, %v671_v55  ;;  %v1449_v62 = vpop.f32.mrb[12].mxu0  ;;  %v1481_v63 = vpop.f32.mrb[12].mxu1 }
 0x10e   :  { %1352 = vst [vmem:[%s1863_s3 + $0x28] sm:$0xff] %v1216_v58   ;;  %1368 = vst [vmem:[%s1863_s3 + $0xa8] sm:$0xff] %v1296_v59   ;;  %v433_v0 = vadd.f32 %v1449_v62, %v1698_v40  ;;  %v561_v1 = vadd.f32 %v1481_v63, %v1698_v40  ;;  %v424_v2 = vpop.f32.mrb[13].mxu0  ;;  %v552_v3 = vpop.f32.mrb[13].mxu1 }
 0x10f   :  { %1351 = vst [vmem:[%s1863_s3 + $0x20] sm:$0xff] %v1211_v60   ;;  %1367 = vst [vmem:[%s1863_s3 + $0xa0] sm:$0xff] %v1291_v61   ;;  %v425_v4 = vadd.f32 %v1698_v40, %v424_v2  ;;  %v553_v5 = vadd.f32 %v1698_v40, %v552_v3  ;;  %v1450_v6 = vpop.f32.mrb[14].mxu0  ;;  %v1482_v7 = vpop.f32.mrb[14].mxu1 }
 0x110   :  { %v436_v8 = vadd.f32 %v1450_v6, %v1698_v40  ;;  %v564_v9 = vadd.f32 %v1482_v7, %v1698_v40  ;;  %v427_v10 = vpop.f32.mrb[15].mxu0  ;;  %v555_v11 = vpop.f32.mrb[15].mxu1  ;;  %v645_v14 = vmax.f32 %v433_v0, 0.0  ;;  %v677_v15 = vmax.f32 %v561_v1, 0.0 }
 0x111   :  { %v428_v12 = vadd.f32 %v1698_v40, %v427_v10  ;;  %v556_v13 = vadd.f32 %v1698_v40, %v555_v11  ;;  %v643_v18 = vmax.f32 %v425_v4, 0.0  ;;  %v675_v19 = vmax.f32 %v553_v5, 0.0 }
 0x112   :  { %v646_v16 = vmax.f32 %v436_v8, 0.0  ;;  %v678_v17 = vmax.f32 %v564_v9, 0.0 }
 0x113   :  { %v644_v20 = vmax.f32 %v428_v12, 0.0  ;;  %v676_v21 = vmax.f32 %v556_v13, 0.0 }
 0x114   :  { %v1226_v22 = vpack.c.bf16 %v646_v16, %v645_v14  ;;  %v1306_v23 = vpack.c.bf16 %v678_v17, %v677_v15 }
 0x115   :  { %v1221_v24 = vpack.c.bf16 %v644_v20, %v643_v18  ;;  %v1301_v25 = vpack.c.bf16 %v676_v21, %v675_v19  ;;  %v1453_v26 = vpop.f32.mrb[16].mxu0  ;;  %v1485_v27 = vpop.f32.mrb[16].mxu1 }
 0x116   :  { %1354 = vst [vmem:[%s1863_s3 + $0x38] sm:$0xff] %v1226_v22   ;;  %1370 = vst [vmem:[%s1863_s3 + $0xb8] sm:$0xff] %v1306_v23   ;;  %v449_v28 = vadd.f32 %v1453_v26, %v1698_v40  ;;  %v577_v29 = vadd.f32 %v1485_v27, %v1698_v40  ;;  %v440_v30 = vpop.f32.mrb[17].mxu0  ;;  %v568_v31 = vpop.f32.mrb[17].mxu1 }
 0x117   :  { %1353 = vst [vmem:[%s1863_s3 + $0x30] sm:$0xff] %v1221_v24   ;;  %1369 = vst [vmem:[%s1863_s3 + $0xb0] sm:$0xff] %v1301_v25   ;;  %v441_v32 = vadd.f32 %v1698_v40, %v440_v30  ;;  %v569_v33 = vadd.f32 %v1698_v40, %v568_v31  ;;  %v1454_v34 = vpop.f32.mrb[18].mxu0  ;;  %v1486_v35 = vpop.f32.mrb[18].mxu1 }
 0x118   :  { %v452_v36 = vadd.f32 %v1454_v34, %v1698_v40  ;;  %v580_v37 = vadd.f32 %v1486_v35, %v1698_v40  ;;  %v443_v38 = vpop.f32.mrb[19].mxu0  ;;  %v571_v39 = vpop.f32.mrb[19].mxu1  ;;  %v649_v43 = vmax.f32 %v449_v28, 0.0  ;;  %v681_v44 = vmax.f32 %v577_v29, 0.0 }
 0x119   :  { %v444_v41 = vadd.f32 %v1698_v40, %v443_v38  ;;  %v572_v42 = vadd.f32 %v1698_v40, %v571_v39  ;;  %v647_v47 = vmax.f32 %v441_v32, 0.0  ;;  %v679_v48 = vmax.f32 %v569_v33, 0.0 }
 0x11a   :  { %v650_v45 = vmax.f32 %v452_v36, 0.0  ;;  %v682_v46 = vmax.f32 %v580_v37, 0.0 }
 0x11b   :  { %v648_v49 = vmax.f32 %v444_v41, 0.0  ;;  %v680_v50 = vmax.f32 %v572_v42, 0.0 }
 0x11c   :  { %v1236_v51 = vpack.c.bf16 %v650_v45, %v649_v43  ;;  %v1316_v52 = vpack.c.bf16 %v682_v46, %v681_v44 }
 0x11d   :  { %v1231_v53 = vpack.c.bf16 %v648_v49, %v647_v47  ;;  %v1311_v54 = vpack.c.bf16 %v680_v50, %v679_v48  ;;  %v1457_v55 = vpop.f32.mrb[20].mxu0  ;;  %v1489_v56 = vpop.f32.mrb[20].mxu1 }
 0x11e   :  { %1356 = vst [vmem:[%s1863_s3 + $0x48] sm:$0xff] %v1236_v51   ;;  %1372 = vst [vmem:[%s1863_s3 + $0xc8] sm:$0xff] %v1316_v52   ;;  %v465_v57 = vadd.f32 %v1457_v55, %v1698_v40  ;;  %v593_v58 = vadd.f32 %v1489_v56, %v1698_v40  ;;  %v456_v59 = vpop.f32.mrb[21].mxu0  ;;  %v584_v60 = vpop.f32.mrb[21].mxu1 }
 0x11f   :  { %1355 = vst [vmem:[%s1863_s3 + $0x40] sm:$0xff] %v1231_v53   ;;  %1371 = vst [vmem:[%s1863_s3 + $0xc0] sm:$0xff] %v1311_v54   ;;  %v457_v61 = vadd.f32 %v1698_v40, %v456_v59  ;;  %v585_v62 = vadd.f32 %v1698_v40, %v584_v60  ;;  %v1458_v63 = vpop.f32.mrb[22].mxu0  ;;  %v1490_v0 = vpop.f32.mrb[22].mxu1 }
 0x120   :  { %v468_v1 = vadd.f32 %v1458_v63, %v1698_v40  ;;  %v596_v2 = vadd.f32 %v1490_v0, %v1698_v40  ;;  %v459_v3 = vpop.f32.mrb[23].mxu0  ;;  %v587_v4 = vpop.f32.mrb[23].mxu1  ;;  %v653_v7 = vmax.f32 %v465_v57, 0.0  ;;  %v685_v8 = vmax.f32 %v593_v58, 0.0 }
 0x121   :  { %v460_v5 = vadd.f32 %v1698_v40, %v459_v3  ;;  %v588_v6 = vadd.f32 %v1698_v40, %v587_v4  ;;  %v651_v11 = vmax.f32 %v457_v61, 0.0  ;;  %v683_v12 = vmax.f32 %v585_v62, 0.0 }
 0x122   :  { %v654_v9 = vmax.f32 %v468_v1, 0.0  ;;  %v686_v10 = vmax.f32 %v596_v2, 0.0 }
 0x123   :  { %v652_v13 = vmax.f32 %v460_v5, 0.0  ;;  %v684_v14 = vmax.f32 %v588_v6, 0.0 }
 0x124   :  { %v1246_v15 = vpack.c.bf16 %v654_v9, %v653_v7  ;;  %v1326_v16 = vpack.c.bf16 %v686_v10, %v685_v8 }
 0x125   :  { %v1241_v17 = vpack.c.bf16 %v652_v13, %v651_v11  ;;  %v1321_v18 = vpack.c.bf16 %v684_v14, %v683_v12  ;;  %v1461_v19 = vpop.f32.mrb[24].mxu0  ;;  %v1493_v20 = vpop.f32.mrb[24].mxu1 }
 0x126   :  { %1358 = vst [vmem:[%s1863_s3 + $0x58] sm:$0xff] %v1246_v15   ;;  %1374 = vst [vmem:[%s1863_s3 + $0xd8] sm:$0xff] %v1326_v16   ;;  %v481_v21 = vadd.f32 %v1461_v19, %v1698_v40  ;;  %v609_v22 = vadd.f32 %v1493_v20, %v1698_v40  ;;  %v472_v23 = vpop.f32.mrb[25].mxu0  ;;  %v600_v24 = vpop.f32.mrb[25].mxu1 }
 0x127   :  { %1357 = vst [vmem:[%s1863_s3 + $0x50] sm:$0xff] %v1241_v17   ;;  %1373 = vst [vmem:[%s1863_s3 + $0xd0] sm:$0xff] %v1321_v18   ;;  %v473_v25 = vadd.f32 %v1698_v40, %v472_v23  ;;  %v601_v26 = vadd.f32 %v1698_v40, %v600_v24  ;;  %v1462_v27 = vpop.f32.mrb[26].mxu0  ;;  %v1494_v28 = vpop.f32.mrb[26].mxu1 }
 0x128   :  { %v484_v29 = vadd.f32 %v1462_v27, %v1698_v40  ;;  %v612_v30 = vadd.f32 %v1494_v28, %v1698_v40  ;;  %v475_v31 = vpop.f32.mrb[27].mxu0  ;;  %v603_v32 = vpop.f32.mrb[27].mxu1  ;;  %v657_v35 = vmax.f32 %v481_v21, 0.0  ;;  %v689_v36 = vmax.f32 %v609_v22, 0.0 }
 0x129   :  { %v476_v33 = vadd.f32 %v1698_v40, %v475_v31  ;;  %v604_v34 = vadd.f32 %v1698_v40, %v603_v32  ;;  %v655_v39 = vmax.f32 %v473_v25, 0.0  ;;  %v687_v41 = vmax.f32 %v601_v26, 0.0 }
 0x12a   :  { %v658_v37 = vmax.f32 %v484_v29, 0.0  ;;  %v690_v38 = vmax.f32 %v612_v30, 0.0 }
 0x12b   :  { %v656_v42 = vmax.f32 %v476_v33, 0.0  ;;  %v688_v43 = vmax.f32 %v604_v34, 0.0 }
 0x12c   :  { %v1256_v44 = vpack.c.bf16 %v658_v37, %v657_v35  ;;  %v1336_v45 = vpack.c.bf16 %v690_v38, %v689_v36 }
 0x12d   :  { %v1251_v46 = vpack.c.bf16 %v656_v42, %v655_v39  ;;  %v1331_v47 = vpack.c.bf16 %v688_v43, %v687_v41  ;;  %v1465_v48 = vpop.f32.mrb[28].mxu0  ;;  %v1497_v49 = vpop.f32.mrb[28].mxu1 }
 0x12e   :  { %1360 = vst [vmem:[%s1863_s3 + $0x68] sm:$0xff] %v1256_v44   ;;  %1376 = vst [vmem:[%s1863_s3 + $0xe8] sm:$0xff] %v1336_v45   ;;  %v497_v50 = vadd.f32 %v1465_v48, %v1698_v40  ;;  %v625_v51 = vadd.f32 %v1497_v49, %v1698_v40  ;;  %v488_v52 = vpop.f32.mrb[29].mxu0  ;;  %v616_v53 = vpop.f32.mrb[29].mxu1 }
 0x12f   :  { %1359 = vst [vmem:[%s1863_s3 + $0x60] sm:$0xff] %v1251_v46   ;;  %1375 = vst [vmem:[%s1863_s3 + $0xe0] sm:$0xff] %v1331_v47   ;;  %v489_v54 = vadd.f32 %v1698_v40, %v488_v52  ;;  %v617_v55 = vadd.f32 %v1698_v40, %v616_v53  ;;  %v1466_v56 = vpop.f32.mrb[30].mxu0  ;;  %v1498_v57 = vpop.f32.mrb[30].mxu1 }
 0x130   :  { %v500_v58 = vadd.f32 %v1466_v56, %v1698_v40  ;;  %v628_v59 = vadd.f32 %v1498_v57, %v1698_v40  ;;  %v491_v60 = vpop.f32.mrb[31].mxu0  ;;  %v619_v61 = vpop.f32.mrb[31].mxu1  ;;  %v661_v0 = vmax.f32 %v497_v50, 0.0  ;;  %v693_v1 = vmax.f32 %v625_v51, 0.0 }
 0x131   :  { %v492_v62 = vadd.f32 %v1698_v40, %v491_v60  ;;  %v620_v63 = vadd.f32 %v1698_v40, %v619_v61  ;;  %v659_v4 = vmax.f32 %v489_v54, 0.0  ;;  %v691_v5 = vmax.f32 %v617_v55, 0.0 }
 0x132   :  { %v662_v2 = vmax.f32 %v500_v58, 0.0  ;;  %v694_v3 = vmax.f32 %v628_v59, 0.0 }
 0x133   :  { %v660_v6 = vmax.f32 %v492_v62, 0.0  ;;  %v692_v7 = vmax.f32 %v620_v63, 0.0 }
 0x134   :  { %v1266_v8 = vpack.c.bf16 %v662_v2, %v661_v0  ;;  %v1346_v9 = vpack.c.bf16 %v694_v3, %v693_v1 }
 0x135   :  { %v1261_v10 = vpack.c.bf16 %v660_v6, %v659_v4  ;;  %v1341_v11 = vpack.c.bf16 %v692_v7, %v691_v5 }
 0x136   :  { %1362 = vst [vmem:[%s1863_s3 + $0x78] sm:$0xff] %v1266_v8   ;;  %1378 = vst [vmem:[%s1863_s3 + $0xf8] sm:$0xff] %v1346_v9  }
 0x137   :  { %1361 = vst [vmem:[%s1863_s3 + $0x70] sm:$0xff] %v1261_v10   ;;  %1377 = vst [vmem:[%s1863_s3 + $0xf0] sm:$0xff] %v1341_v11  }

// kernel: resnet_forward.8
= control target key start
LH: loop header
LB: loop body
LE: loop exit
PB: predicated region body
PF: predicated region fallthrough
CT: control target
= control target key end

     0   :  { %v1756_v0 = vmov 0   ;;  %s2214_s1 = inlined_call_operand.vmem [shape: bf16[256,128], index: 1, kind: input, shape index: {}]   ;;  %s2215_s0 = inlined_call_operand.vmem [shape: bf16[512,256], index: 0, kind: input, shape index: {}]   ;;  %s2216_s2 = inlined_call_operand.vmem [shape: f32[1,128], index: 2, kind: input, shape index: {}]   ;;  %s2217_s3 = inlined_call_operand.vmem [shape: bf16[512,128], index: 3, kind: output, shape index: {}]  }
   0x1   :  { %534 = vmatprep.subr.bf16.mxu0 %v1756_v0  ;;  %1611 = vmatprep.subr.bf16.mxu1 %v1756_v0  ;;  %v1644_v1 = vld [vmem:[%s2214_s1] sm:$0xff]   ;;  %v1645_v2 = vld [vmem:[%s2214_s1 + $0x8] sm:$0xff]   ;;  %v1646_v3 = vld [vmem:[%s2214_s1 + $0x10] sm:$0xff]  }
   0x2   :  { %535 = vmatpush1.bf16.msra.mxu0 %v1644_v1  ;;  %1627 = vmatpush1.bf16.msra.mxu1 %v1644_v1  ;;  %v1647_v4 = vld [vmem:[%s2214_s1 + $0x18] sm:$0xff]   ;;  %v1648_v5 = vld [vmem:[%s2214_s1 + $0x20] sm:$0xff]   ;;  %v1649_v7 = vld [vmem:[%s2214_s1 + $0x28] sm:$0xff]  }
   0x3   :  { %536 = vmatprep.subr.bf16.mxu0 %v1756_v0  ;;  %1612 = vmatprep.subr.bf16.mxu1 %v1756_v0  ;;  %v1662_v6 = vld [vmem:[%s2215_s0 + $0x4] ss:$8 sps:$4 sm:$0xff]   ;;  %v1650_v9 = vld [vmem:[%s2214_s1 + $0x30] sm:$0xff]   ;;  %v1651_v10 = vld [vmem:[%s2214_s1 + $0x38] sm:$0xff]  }
   0x4   :  { %v1665_v8 = vld [vmem:[%s2215_s0 + $0x104] ss:$8 sps:$4 sm:$0xff]   ;;  %566 = vmatprep.mubr.bf16.mxu0 %v1662_v6  ;;  %v1654_v13 = vld [vmem:[%s2214_s1 + $0x50] sm:$0xff]   ;;  %v1655_v14 = vld [vmem:[%s2214_s1 + $0x58] sm:$0xff]  }
   0x5   :  { %694 = vmatprep.mubr.bf16.mxu1 %v1665_v8  ;;  %v1652_v11 = vld [vmem:[%s2214_s1 + $0x40] sm:$0xff]   ;;  %v1653_v12 = vld [vmem:[%s2214_s1 + $0x48] sm:$0xff]   ;;  %v1658_v17 = vld [vmem:[%s2214_s1 + $0x70] sm:$0xff]  }
   0x6   :  { %537 = vmatpush1.bf16.msra.mxu0 %v1645_v2  ;;  %1628 = vmatpush1.bf16.msra.mxu1 %v1645_v2  ;;  %v1656_v15 = vld [vmem:[%s2214_s1 + $0x60] sm:$0xff]   ;;  %v1657_v16 = vld [vmem:[%s2214_s1 + $0x68] sm:$0xff]   ;;  %v1659_v18 = vld [vmem:[%s2214_s1 + $0x78] sm:$0xff]  }
   0x7   :  { %538 = vmatprep.subr.bf16.mxu0 %v1756_v0  ;;  %1613 = vmatprep.subr.bf16.mxu1 %v1756_v0  ;;  %v1660_v19 = vld [vmem:[%s2215_s0] ss:$8 sps:$4 sm:$0xff]   ;;  %v1666_v21 = vld [vmem:[%s2215_s0 + $0x14] ss:$8 sps:$4 sm:$0xff]   ;;  %v1670_v23 = vld [vmem:[%s2215_s0 + $0x10] ss:$8 sps:$4 sm:$0xff]  }
   0x8   :  { %v1663_v20 = vld [vmem:[%s2215_s0 + $0x100] ss:$8 sps:$4 sm:$0xff]   ;;  %v1668_v22 = vld [vmem:[%s2215_s0 + $0x114] ss:$8 sps:$4 sm:$0xff]   ;;  %v1671_v24 = vld [vmem:[%s2215_s0 + $0x110] ss:$8 sps:$4 sm:$0xff]  }
   0x9   :  { %v1672_v25 = vld [vmem:[%s2215_s0 + $0x24] ss:$8 sps:$4 sm:$0xff]   ;;  %v1676_v27 = vld [vmem:[%s2215_s0 + $0x20] ss:$8 sps:$4 sm:$0xff]   ;;  %v1678_v29 = vld [vmem:[%s2215_s0 + $0x34] ss:$8 sps:$4 sm:$0xff]  }
   0xa   :  { %539 = vmatpush1.bf16.msra.mxu0 %v1646_v3  ;;  %1629 = vmatpush1.bf16.msra.mxu1 %v1646_v3  ;;  %v1674_v26 = vld [vmem:[%s2215_s0 + $0x124] ss:$8 sps:$4 sm:$0xff]   ;;  %v1677_v28 = vld [vmem:[%s2215_s0 + $0x120] ss:$8 sps:$4 sm:$0xff]   ;;  %v1680_v30 = vld [vmem:[%s2215_s0 + $0x134] ss:$8 sps:$4 sm:$0xff]  }
   0xb   :  { %540 = vmatprep.subr.bf16.mxu0 %v1756_v0  ;;  %1614 = vmatprep.subr.bf16.mxu1 %v1756_v0  ;;  %v1682_v31 = vld [vmem:[%s2215_s0 + $0x30] ss:$8 sps:$4 sm:$0xff]   ;;  %v1684_v33 = vld [vmem:[%s2215_s0 + $0x44] ss:$8 sps:$4 sm:$0xff]   ;;  %v1688_v35 = vld [vmem:[%s2215_s0 + $0x40] ss:$8 sps:$4 sm:$0xff]  }
   0xc   :  { %v1683_v32 = vld [vmem:[%s2215_s0 + $0x130] ss:$8 sps:$4 sm:$0xff]   ;;  %v1686_v34 = vld [vmem:[%s2215_s0 + $0x144] ss:$8 sps:$4 sm:$0xff]   ;;  %v1689_v36 = vld [vmem:[%s2215_s0 + $0x140] ss:$8 sps:$4 sm:$0xff]  }
   0xd   :  { %v1690_v37 = vld [vmem:[%s2215_s0 + $0x54] ss:$8 sps:$4 sm:$0xff]   ;;  %v1694_v39 = vld [vmem:[%s2215_s0 + $0x50] ss:$8 sps:$4 sm:$0xff]   ;;  %v1696_v41 = vld [vmem:[%s2215_s0 + $0x64] ss:$8 sps:$4 sm:$0xff]  }
   0xe   :  { %541 = vmatpush1.bf16.msra.mxu0 %v1647_v4  ;;  %1630 = vmatpush1.bf16.msra.mxu1 %v1647_v4  ;;  %v1692_v38 = vld [vmem:[%s2215_s0 + $0x154] ss:$8 sps:$4 sm:$0xff]   ;;  %v1695_v40 = vld [vmem:[%s2215_s0 + $0x150] ss:$8 sps:$4 sm:$0xff]   ;;  %v1698_v42 = vld [vmem:[%s2215_s0 + $0x164] ss:$8 sps:$4 sm:$0xff]  }
   0xf   :  { %542 = vmatprep.subr.bf16.mxu0 %v1756_v0  ;;  %1615 = vmatprep.subr.bf16.mxu1 %v1756_v0  ;;  %v1700_v43 = vld [vmem:[%s2215_s0 + $0x60] ss:$8 sps:$4 sm:$0xff]   ;;  %v1702_v45 = vld [vmem:[%s2215_s0 + $0x74] ss:$8 sps:$4 sm:$0xff]   ;;  %v1706_v47 = vld [vmem:[%s2215_s0 + $0x70] ss:$8 sps:$4 sm:$0xff]  }
  0x10   :  { %v1701_v44 = vld [vmem:[%s2215_s0 + $0x160] ss:$8 sps:$4 sm:$0xff]   ;;  %v1704_v46 = vld [vmem:[%s2215_s0 + $0x174] ss:$8 sps:$4 sm:$0xff]   ;;  %v1707_v48 = vld [vmem:[%s2215_s0 + $0x170] ss:$8 sps:$4 sm:$0xff]  }
  0x11   :  { %v1708_v49 = vld [vmem:[%s2215_s0 + $0x84] ss:$8 sps:$4 sm:$0xff]   ;;  %v1712_v51 = vld [vmem:[%s2215_s0 + $0x80] ss:$8 sps:$4 sm:$0xff]   ;;  %v1714_v53 = vld [vmem:[%s2215_s0 + $0x94] ss:$8 sps:$4 sm:$0xff]  }
  0x12   :  { %543 = vmatpush1.bf16.msra.mxu0 %v1648_v5  ;;  %1631 = vmatpush1.bf16.msra.mxu1 %v1648_v5  ;;  %v1710_v50 = vld [vmem:[%s2215_s0 + $0x184] ss:$8 sps:$4 sm:$0xff]   ;;  %v1713_v52 = vld [vmem:[%s2215_s0 + $0x180] ss:$8 sps:$4 sm:$0xff]   ;;  %v1716_v54 = vld [vmem:[%s2215_s0 + $0x194] ss:$8 sps:$4 sm:$0xff]  }
  0x13   :  { %544 = vmatprep.subr.bf16.mxu0 %v1756_v0  ;;  %1616 = vmatprep.subr.bf16.mxu1 %v1756_v0  ;;  %v1718_v55 = vld [vmem:[%s2215_s0 + $0x90] ss:$8 sps:$4 sm:$0xff]   ;;  %v1720_v57 = vld [vmem:[%s2215_s0 + $0xa4] ss:$8 sps:$4 sm:$0xff]   ;;  %v1724_v59 = vld [vmem:[%s2215_s0 + $0xa0] ss:$8 sps:$4 sm:$0xff]  }
  0x14   :  { %v1719_v56 = vld [vmem:[%s2215_s0 + $0x190] ss:$8 sps:$4 sm:$0xff]   ;;  %v1722_v58 = vld [vmem:[%s2215_s0 + $0x1a4] ss:$8 sps:$4 sm:$0xff]   ;;  %v1725_v60 = vld [vmem:[%s2215_s0 + $0x1a0] ss:$8 sps:$4 sm:$0xff]  }
  0x15   :  { %v1726_v61 = vld [vmem:[%s2215_s0 + $0xb4] ss:$8 sps:$4 sm:$0xff]   ;;  %v1730_v63 = vld [vmem:[%s2215_s0 + $0xb0] ss:$8 sps:$4 sm:$0xff]   ;;  %v1732_v1 = vld [vmem:[%s2215_s0 + $0xc4] ss:$8 sps:$4 sm:$0xff]  }
  0x16   :  { %545 = vmatpush1.bf16.msra.mxu0 %v1649_v7  ;;  %1632 = vmatpush1.bf16.msra.mxu1 %v1649_v7  ;;  %v1728_v62 = vld [vmem:[%s2215_s0 + $0x1b4] ss:$8 sps:$4 sm:$0xff]   ;;  %v1734_v2 = vld [vmem:[%s2215_s0 + $0x1c4] ss:$8 sps:$4 sm:$0xff]   ;;  %v1736_v3 = vld [vmem:[%s2215_s0 + $0xc0] ss:$8 sps:$4 sm:$0xff]  }
  0x17   :  { %546 = vmatprep.subr.bf16.mxu0 %v1756_v0  ;;  %1617 = vmatprep.subr.bf16.mxu1 %v1756_v0  ;;  %v1737_v4 = vld [vmem:[%s2215_s0 + $0x1c0] ss:$8 sps:$4 sm:$0xff]   ;;  %v1738_v5 = vld [vmem:[%s2215_s0 + $0xd4] ss:$8 sps:$4 sm:$0xff]   ;;  %v1742_v7 = vld [vmem:[%s2215_s0 + $0xd0] ss:$8 sps:$4 sm:$0xff]  }
  0x18   :  { %v1740_v6 = vld [vmem:[%s2215_s0 + $0x1d4] ss:$8 sps:$4 sm:$0xff]   ;;  %v1743_v8 = vld [vmem:[%s2215_s0 + $0x1d0] ss:$8 sps:$4 sm:$0xff]  }
  0x1a   :  { %547 = vmatpush1.bf16.msra.mxu0 %v1650_v9  ;;  %1633 = vmatpush1.bf16.msra.mxu1 %v1650_v9  ;;  %v1744_v9 = vld [vmem:[%s2215_s0 + $0xe4] ss:$8 sps:$4 sm:$0xff]  }
  0x1b   :  { %548 = vmatprep.subr.bf16.mxu0 %v1756_v0  ;;  %1618 = vmatprep.subr.bf16.mxu1 %v1756_v0 }
  0x1e   :  { %549 = vmatpush1.bf16.msra.mxu0 %v1651_v10  ;;  %1634 = vmatpush1.bf16.msra.mxu1 %v1651_v10  ;;  %v1746_v10 = vld [vmem:[%s2215_s0 + $0x1e4] ss:$8 sps:$4 sm:$0xff]  }
  0x1f   :  { %550 = vmatprep.subr.bf16.mxu0 %v1756_v0  ;;  %1619 = vmatprep.subr.bf16.mxu1 %v1756_v0 }
  0x22   :  { %551 = vmatpush1.bf16.msra.mxu0 %v1652_v11  ;;  %1635 = vmatpush1.bf16.msra.mxu1 %v1652_v11  ;;  %v1748_v11 = vld [vmem:[%s2215_s0 + $0xe0] ss:$8 sps:$4 sm:$0xff]  }
  0x23   :  { %552 = vmatprep.subr.bf16.mxu0 %v1756_v0  ;;  %1620 = vmatprep.subr.bf16.mxu1 %v1756_v0 }
  0x26   :  { %553 = vmatpush1.bf16.msra.mxu0 %v1653_v12  ;;  %1636 = vmatpush1.bf16.msra.mxu1 %v1653_v12  ;;  %v1749_v12 = vld [vmem:[%s2215_s0 + $0x1e0] ss:$8 sps:$4 sm:$0xff]  }
  0x27   :  { %554 = vmatprep.subr.bf16.mxu0 %v1756_v0  ;;  %1621 = vmatprep.subr.bf16.mxu1 %v1756_v0 }
  0x2a   :  { %555 = vmatpush1.bf16.msra.mxu0 %v1654_v13  ;;  %1637 = vmatpush1.bf16.msra.mxu1 %v1654_v13  ;;  %v1750_v13 = vld [vmem:[%s2215_s0 + $0xf4] ss:$8 sps:$4 sm:$0xff]  }
  0x2b   :  { %556 = vmatprep.subr.bf16.mxu0 %v1756_v0  ;;  %1622 = vmatprep.subr.bf16.mxu1 %v1756_v0 }
  0x2e   :  { %557 = vmatpush1.bf16.msra.mxu0 %v1655_v14  ;;  %1638 = vmatpush1.bf16.msra.mxu1 %v1655_v14  ;;  %v1752_v14 = vld [vmem:[%s2215_s0 + $0x1f4] ss:$8 sps:$4 sm:$0xff]  }
  0x2f   :  { %558 = vmatprep.subr.bf16.mxu0 %v1756_v0  ;;  %1623 = vmatprep.subr.bf16.mxu1 %v1756_v0 }
  0x32   :  { %559 = vmatpush1.bf16.msra.mxu0 %v1656_v15  ;;  %1639 = vmatpush1.bf16.msra.mxu1 %v1656_v15  ;;  %v1754_v15 = vld [vmem:[%s2215_s0 + $0xf0] ss:$8 sps:$4 sm:$0xff]  }
  0x33   :  { %560 = vmatprep.subr.bf16.mxu0 %v1756_v0  ;;  %1624 = vmatprep.subr.bf16.mxu1 %v1756_v0 }
  0x36   :  { %561 = vmatpush1.bf16.msra.mxu0 %v1657_v16  ;;  %1640 = vmatpush1.bf16.msra.mxu1 %v1657_v16  ;;  %v1755_v16 = vld [vmem:[%s2215_s0 + $0x1f0] ss:$8 sps:$4 sm:$0xff]  }
  0x37   :  { %562 = vmatprep.subr.bf16.mxu0 %v1756_v0  ;;  %1625 = vmatprep.subr.bf16.mxu1 %v1756_v0 }
  0x3a   :  { %563 = vmatpush1.bf16.msra.mxu0 %v1658_v17  ;;  %1641 = vmatpush1.bf16.msra.mxu1 %v1658_v17  ;;  %v2052_v17 = vld [vmem:[%s2216_s2] ss:$0 sm:$0xff] }
  0x3b   :  { %564 = vmatprep.subr.bf16.mxu0 %v1756_v0  ;;  %1626 = vmatprep.subr.bf16.mxu1 %v1756_v0  ;;  %v1731_v0 = vld [vmem:[%s2215_s0 + $0x1b0] ss:$8 sps:$4 sm:$0xff]  }
  0x3e   :  { %565 = vmatpush1.bf16.msra.mxu0 %v1659_v18  ;;  %1642 = vmatpush1.bf16.msra.mxu1 %v1659_v18 }
  0x41   :  { %567 = vmatmul.mubr.bf16.vlgmr.msra.gmra.mrb[0].mxu0 %v1660_v19  ;;  %695 = vmatmul.mubr.bf16.vlgmr.msra.gmra.mrb[0].mxu1 %v1663_v20 }
  0x42   :  { %574 = vmatprep.mubr.bf16.mxu0 %v1666_v21  ;;  %702 = vmatprep.mubr.bf16.mxu1 %v1668_v22 }
  0x49   :  { %575 = vmatmul.mubr.bf16.gmra.mrb[4].mxu0 %v1670_v23  ;;  %703 = vmatmul.mubr.bf16.gmra.mrb[4].mxu1 %v1671_v24 }
  0x4a   :  { %582 = vmatprep.mubr.bf16.mxu0 %v1672_v25  ;;  %710 = vmatprep.mubr.bf16.mxu1 %v1674_v26 }
  0x51   :  { %583 = vmatmul.mubr.bf16.gmra.mrb[8].mxu0 %v1676_v27  ;;  %711 = vmatmul.mubr.bf16.gmra.mrb[8].mxu1 %v1677_v28 }
  0x52   :  { %590 = vmatprep.mubr.bf16.mxu0 %v1678_v29  ;;  %718 = vmatprep.mubr.bf16.mxu1 %v1680_v30 }
  0x59   :  { %591 = vmatmul.mubr.bf16.gmra.mrb[12].mxu0 %v1682_v31  ;;  %719 = vmatmul.mubr.bf16.gmra.mrb[12].mxu1 %v1683_v32 }
  0x5a   :  { %598 = vmatprep.mubr.bf16.mxu0 %v1684_v33  ;;  %726 = vmatprep.mubr.bf16.mxu1 %v1686_v34 }
  0x61   :  { %599 = vmatmul.mubr.bf16.gmra.mrb[16].mxu0 %v1688_v35  ;;  %727 = vmatmul.mubr.bf16.gmra.mrb[16].mxu1 %v1689_v36 }
  0x62   :  { %606 = vmatprep.mubr.bf16.mxu0 %v1690_v37  ;;  %734 = vmatprep.mubr.bf16.mxu1 %v1692_v38 }
  0x69   :  { %607 = vmatmul.mubr.bf16.gmra.mrb[20].mxu0 %v1694_v39  ;;  %735 = vmatmul.mubr.bf16.gmra.mrb[20].mxu1 %v1695_v40 }
  0x6a   :  { %614 = vmatprep.mubr.bf16.mxu0 %v1696_v41  ;;  %742 = vmatprep.mubr.bf16.mxu1 %v1698_v42 }
  0x71   :  { %615 = vmatmul.mubr.bf16.gmra.mrb[24].mxu0 %v1700_v43  ;;  %743 = vmatmul.mubr.bf16.gmra.mrb[24].mxu1 %v1701_v44 }
  0x72   :  { %622 = vmatprep.mubr.bf16.mxu0 %v1702_v45  ;;  %750 = vmatprep.mubr.bf16.mxu1 %v1704_v46 }
  0x79   :  { %623 = vmatmul.mubr.bf16.gmra.mrb[28].mxu0 %v1706_v47  ;;  %751 = vmatmul.mubr.bf16.gmra.mrb[28].mxu1 %v1707_v48 }
  0x7a   :  { %630 = vmatprep.mubr.bf16.mxu0 %v1708_v49  ;;  %758 = vmatprep.mubr.bf16.mxu1 %v1710_v50 }
  0x81   :  { %631 = vmatmul.mubr.bf16.gmra.mrb[32].mxu0 %v1712_v51  ;;  %759 = vmatmul.mubr.bf16.gmra.mrb[32].mxu1 %v1713_v52 }
  0x82   :  { %638 = vmatprep.mubr.bf16.mxu0 %v1714_v53  ;;  %766 = vmatprep.mubr.bf16.mxu1 %v1716_v54 }
  0x89   :  { %639 = vmatmul.mubr.bf16.gmra.mrb[36].mxu0 %v1718_v55  ;;  %767 = vmatmul.mubr.bf16.gmra.mrb[36].mxu1 %v1719_v56 }
  0x8a   :  { %646 = vmatprep.mubr.bf16.mxu0 %v1720_v57  ;;  %774 = vmatprep.mubr.bf16.mxu1 %v1722_v58 }
  0x91   :  { %647 = vmatmul.mubr.bf16.gmra.mrb[40].mxu0 %v1724_v59  ;;  %775 = vmatmul.mubr.bf16.gmra.mrb[40].mxu1 %v1725_v60 }
  0x92   :  { %654 = vmatprep.mubr.bf16.mxu0 %v1726_v61  ;;  %782 = vmatprep.mubr.bf16.mxu1 %v1728_v62 }
  0x99   :  { %655 = vmatmul.mubr.bf16.gmra.mrb[44].mxu0 %v1730_v63  ;;  %783 = vmatmul.mubr.bf16.gmra.mrb[44].mxu1 %v1731_v0 }
  0x9a   :  { %662 = vmatprep.mubr.bf16.mxu0 %v1732_v1  ;;  %790 = vmatprep.mubr.bf16.mxu1 %v1734_v2 }
  0xa1   :  { %663 = vmatmul.mubr.bf16.gmra.mrb[48].mxu0 %v1736_v3  ;;  %791 = vmatmul.mubr.bf16.gmra.mrb[48].mxu1 %v1737_v4 }
  0xa2   :  { %670 = vmatprep.mubr.bf16.mxu0 %v1738_v5  ;;  %798 = vmatprep.mubr.bf16.mxu1 %v1740_v6 }
  0xa9   :  { %671 = vmatmul.mubr.bf16.gmra.mrb[52].mxu0 %v1742_v7  ;;  %799 = vmatmul.mubr.bf16.gmra.mrb[52].mxu1 %v1743_v8 }
  0xaa   :  { %678 = vmatprep.mubr.bf16.mxu0 %v1744_v9  ;;  %806 = vmatprep.mubr.bf16.mxu1 %v1746_v10 }
  0xb1   :  { %679 = vmatmul.mubr.bf16.gmra.mrb[56].mxu0 %v1748_v11  ;;  %807 = vmatmul.mubr.bf16.gmra.mrb[56].mxu1 %v1749_v12 }
  0xb2   :  { %686 = vmatprep.mubr.bf16.mxu0 %v1750_v13  ;;  %814 = vmatprep.mubr.bf16.mxu1 %v1752_v14 }
  0xb9   :  { %687 = vmatmul.mubr.bf16.gmra.mrb[60].mxu0 %v1754_v15  ;;  %815 = vmatmul.mubr.bf16.gmra.mrb[60].mxu1 %v1755_v16 }
 0x114   :  { %v568_v18 = vpop.f32.mrb[0].mxu0  ;;  %v696_v19 = vpop.f32.mrb[0].mxu1 }
 0x115   :  { %v569_v20 = vadd.f32 %v2052_v17, %v568_v18  ;;  %v697_v21 = vadd.f32 %v2052_v17, %v696_v19  ;;  %v570_v22 = vpop.f32.mrb[1].mxu0  ;;  %v698_v23 = vpop.f32.mrb[1].mxu1 }
 0x116   :  { %v571_v24 = vpop.f32.mrb[2].mxu0  ;;  %v699_v25 = vpop.f32.mrb[2].mxu1 }
 0x117   :  { %v572_v26 = vadd.f32 %v2052_v17, %v571_v24  ;;  %v700_v27 = vadd.f32 %v2052_v17, %v699_v25  ;;  %v573_v28 = vpop.f32.mrb[3].mxu0  ;;  %v701_v29 = vpop.f32.mrb[3].mxu1  ;;  %v823_v30 = vmax.f32 %v569_v20, 0.0  ;;  %v855_v31 = vmax.f32 %v697_v21, 0.0 }
 0x119   :  { %v824_v32 = vmax.f32 %v572_v26, 0.0  ;;  %v856_v33 = vmax.f32 %v700_v27, 0.0 }
 0x11b   :  { %v1423_v34 = vpack.c.bf16 %v824_v32, %v823_v30  ;;  %v1503_v35 = vpack.c.bf16 %v856_v33, %v855_v31 }
 0x11c   :  { %v576_v36 = vpop.f32.mrb[4].mxu0  ;;  %v704_v37 = vpop.f32.mrb[4].mxu1 }
 0x11d   :  { %1424 = vst [vmem:[%s2217_s3] sm:$0xff] %v1423_v34   ;;  %1595 = vst [vmem:[%s2217_s3 + $0x80] sm:$0xff] %v1503_v35   ;;  %v577_v38 = vadd.f32 %v2052_v17, %v576_v36  ;;  %v705_v39 = vadd.f32 %v2052_v17, %v704_v37  ;;  %v578_v40 = vpop.f32.mrb[5].mxu0  ;;  %v706_v41 = vpop.f32.mrb[5].mxu1 }
 0x11e   :  { %v579_v42 = vpop.f32.mrb[6].mxu0  ;;  %v707_v43 = vpop.f32.mrb[6].mxu1 }
 0x11f   :  { %v580_v44 = vadd.f32 %v2052_v17, %v579_v42  ;;  %v708_v45 = vadd.f32 %v2052_v17, %v707_v43  ;;  %v581_v46 = vpop.f32.mrb[7].mxu0  ;;  %v709_v47 = vpop.f32.mrb[7].mxu1  ;;  %v825_v48 = vmax.f32 %v577_v38, 0.0  ;;  %v857_v49 = vmax.f32 %v705_v39, 0.0 }
 0x121   :  { %v826_v50 = vmax.f32 %v580_v44, 0.0  ;;  %v858_v51 = vmax.f32 %v708_v45, 0.0 }
 0x123   :  { %v1428_v52 = vpack.c.bf16 %v826_v50, %v825_v48  ;;  %v1508_v53 = vpack.c.bf16 %v858_v51, %v857_v49 }
 0x124   :  { %v584_v54 = vpop.f32.mrb[8].mxu0  ;;  %v712_v55 = vpop.f32.mrb[8].mxu1 }
 0x125   :  { %1580 = vst [vmem:[%s2217_s3 + $0x8] sm:$0xff] %v1428_v52   ;;  %1596 = vst [vmem:[%s2217_s3 + $0x88] sm:$0xff] %v1508_v53   ;;  %v585_v56 = vadd.f32 %v2052_v17, %v584_v54  ;;  %v713_v57 = vadd.f32 %v2052_v17, %v712_v55  ;;  %v586_v58 = vpop.f32.mrb[9].mxu0  ;;  %v714_v59 = vpop.f32.mrb[9].mxu1 }
 0x126   :  { %v587_v60 = vpop.f32.mrb[10].mxu0  ;;  %v715_v61 = vpop.f32.mrb[10].mxu1 }
 0x127   :  { %v588_v62 = vadd.f32 %v2052_v17, %v587_v60  ;;  %v716_v63 = vadd.f32 %v2052_v17, %v715_v61  ;;  %v589_v0 = vpop.f32.mrb[11].mxu0  ;;  %v717_v1 = vpop.f32.mrb[11].mxu1  ;;  %v827_v2 = vmax.f32 %v585_v56, 0.0  ;;  %v859_v3 = vmax.f32 %v713_v57, 0.0 }
 0x129   :  { %v828_v4 = vmax.f32 %v588_v62, 0.0  ;;  %v860_v5 = vmax.f32 %v716_v63, 0.0 }
 0x12b   :  { %v1433_v6 = vpack.c.bf16 %v828_v4, %v827_v2  ;;  %v1513_v7 = vpack.c.bf16 %v860_v5, %v859_v3 }
 0x12c   :  { %v592_v8 = vpop.f32.mrb[12].mxu0  ;;  %v720_v9 = vpop.f32.mrb[12].mxu1 }
 0x12d   :  { %1581 = vst [vmem:[%s2217_s3 + $0x10] sm:$0xff] %v1433_v6   ;;  %1597 = vst [vmem:[%s2217_s3 + $0x90] sm:$0xff] %v1513_v7   ;;  %v593_v10 = vadd.f32 %v2052_v17, %v592_v8  ;;  %v721_v11 = vadd.f32 %v2052_v17, %v720_v9  ;;  %v594_v12 = vpop.f32.mrb[13].mxu0  ;;  %v722_v13 = vpop.f32.mrb[13].mxu1 }
 0x12e   :  { %v595_v14 = vpop.f32.mrb[14].mxu0  ;;  %v723_v15 = vpop.f32.mrb[14].mxu1 }
 0x12f   :  { %v596_v16 = vadd.f32 %v2052_v17, %v595_v14  ;;  %v724_v18 = vadd.f32 %v2052_v17, %v723_v15  ;;  %v597_v19 = vpop.f32.mrb[15].mxu0  ;;  %v725_v20 = vpop.f32.mrb[15].mxu1  ;;  %v829_v21 = vmax.f32 %v593_v10, 0.0  ;;  %v861_v22 = vmax.f32 %v721_v11, 0.0 }
 0x131   :  { %v830_v23 = vmax.f32 %v596_v16, 0.0  ;;  %v862_v24 = vmax.f32 %v724_v18, 0.0 }
 0x133   :  { %v1438_v25 = vpack.c.bf16 %v830_v23, %v829_v21  ;;  %v1518_v26 = vpack.c.bf16 %v862_v24, %v861_v22 }
 0x134   :  { %v600_v27 = vpop.f32.mrb[16].mxu0  ;;  %v728_v28 = vpop.f32.mrb[16].mxu1 }
 0x135   :  { %1582 = vst [vmem:[%s2217_s3 + $0x18] sm:$0xff] %v1438_v25   ;;  %1598 = vst [vmem:[%s2217_s3 + $0x98] sm:$0xff] %v1518_v26   ;;  %v601_v29 = vadd.f32 %v2052_v17, %v600_v27  ;;  %v729_v30 = vadd.f32 %v2052_v17, %v728_v28  ;;  %v602_v31 = vpop.f32.mrb[17].mxu0  ;;  %v730_v32 = vpop.f32.mrb[17].mxu1 }
 0x136   :  { %v603_v33 = vpop.f32.mrb[18].mxu0  ;;  %v731_v34 = vpop.f32.mrb[18].mxu1 }
 0x137   :  { %v604_v35 = vadd.f32 %v2052_v17, %v603_v33  ;;  %v732_v36 = vadd.f32 %v2052_v17, %v731_v34  ;;  %v605_v37 = vpop.f32.mrb[19].mxu0  ;;  %v733_v38 = vpop.f32.mrb[19].mxu1  ;;  %v831_v39 = vmax.f32 %v601_v29, 0.0  ;;  %v863_v40 = vmax.f32 %v729_v30, 0.0 }
 0x139   :  { %v832_v41 = vmax.f32 %v604_v35, 0.0  ;;  %v864_v42 = vmax.f32 %v732_v36, 0.0 }
 0x13b   :  { %v1443_v43 = vpack.c.bf16 %v832_v41, %v831_v39  ;;  %v1523_v44 = vpack.c.bf16 %v864_v42, %v863_v40 }
 0x13c   :  { %v608_v45 = vpop.f32.mrb[20].mxu0  ;;  %v736_v46 = vpop.f32.mrb[20].mxu1 }
 0x13d   :  { %1583 = vst [vmem:[%s2217_s3 + $0x20] sm:$0xff] %v1443_v43   ;;  %1599 = vst [vmem:[%s2217_s3 + $0xa0] sm:$0xff] %v1523_v44   ;;  %v609_v47 = vadd.f32 %v2052_v17, %v608_v45  ;;  %v737_v48 = vadd.f32 %v2052_v17, %v736_v46  ;;  %v610_v49 = vpop.f32.mrb[21].mxu0  ;;  %v738_v50 = vpop.f32.mrb[21].mxu1 }
 0x13e   :  { %v611_v51 = vpop.f32.mrb[22].mxu0  ;;  %v739_v52 = vpop.f32.mrb[22].mxu1 }
 0x13f   :  { %v612_v53 = vadd.f32 %v2052_v17, %v611_v51  ;;  %v740_v54 = vadd.f32 %v2052_v17, %v739_v52  ;;  %v613_v55 = vpop.f32.mrb[23].mxu0  ;;  %v741_v56 = vpop.f32.mrb[23].mxu1  ;;  %v833_v57 = vmax.f32 %v609_v47, 0.0  ;;  %v865_v58 = vmax.f32 %v737_v48, 0.0 }
 0x141   :  { %v834_v59 = vmax.f32 %v612_v53, 0.0  ;;  %v866_v60 = vmax.f32 %v740_v54, 0.0 }
 0x143   :  { %v1448_v61 = vpack.c.bf16 %v834_v59, %v833_v57  ;;  %v1528_v62 = vpack.c.bf16 %v866_v60, %v865_v58 }
 0x144   :  { %v616_v63 = vpop.f32.mrb[24].mxu0  ;;  %v744_v0 = vpop.f32.mrb[24].mxu1 }
 0x145   :  { %1584 = vst [vmem:[%s2217_s3 + $0x28] sm:$0xff] %v1448_v61   ;;  %1600 = vst [vmem:[%s2217_s3 + $0xa8] sm:$0xff] %v1528_v62   ;;  %v617_v1 = vadd.f32 %v2052_v17, %v616_v63  ;;  %v745_v2 = vadd.f32 %v2052_v17, %v744_v0  ;;  %v618_v3 = vpop.f32.mrb[25].mxu0  ;;  %v746_v4 = vpop.f32.mrb[25].mxu1 }
 0x146   :  { %v619_v5 = vpop.f32.mrb[26].mxu0  ;;  %v747_v6 = vpop.f32.mrb[26].mxu1 }
 0x147   :  { %v620_v7 = vadd.f32 %v2052_v17, %v619_v5  ;;  %v748_v8 = vadd.f32 %v2052_v17, %v747_v6  ;;  %v621_v9 = vpop.f32.mrb[27].mxu0  ;;  %v749_v10 = vpop.f32.mrb[27].mxu1  ;;  %v835_v11 = vmax.f32 %v617_v1, 0.0  ;;  %v867_v12 = vmax.f32 %v745_v2, 0.0 }
 0x149   :  { %v836_v13 = vmax.f32 %v620_v7, 0.0  ;;  %v868_v14 = vmax.f32 %v748_v8, 0.0 }
 0x14b   :  { %v1453_v15 = vpack.c.bf16 %v836_v13, %v835_v11  ;;  %v1533_v16 = vpack.c.bf16 %v868_v14, %v867_v12 }
 0x14c   :  { %v624_v18 = vpop.f32.mrb[28].mxu0  ;;  %v752_v19 = vpop.f32.mrb[28].mxu1 }
 0x14d   :  { %1585 = vst [vmem:[%s2217_s3 + $0x30] sm:$0xff] %v1453_v15   ;;  %1601 = vst [vmem:[%s2217_s3 + $0xb0] sm:$0xff] %v1533_v16   ;;  %v625_v20 = vadd.f32 %v2052_v17, %v624_v18  ;;  %v753_v21 = vadd.f32 %v2052_v17, %v752_v19  ;;  %v626_v22 = vpop.f32.mrb[29].mxu0  ;;  %v754_v23 = vpop.f32.mrb[29].mxu1 }
 0x14e   :  { %v627_v24 = vpop.f32.mrb[30].mxu0  ;;  %v755_v25 = vpop.f32.mrb[30].mxu1 }
 0x14f   :  { %v628_v26 = vadd.f32 %v2052_v17, %v627_v24  ;;  %v756_v27 = vadd.f32 %v2052_v17, %v755_v25  ;;  %v629_v28 = vpop.f32.mrb[31].mxu0  ;;  %v757_v29 = vpop.f32.mrb[31].mxu1  ;;  %v837_v30 = vmax.f32 %v625_v20, 0.0  ;;  %v869_v31 = vmax.f32 %v753_v21, 0.0 }
 0x151   :  { %v838_v32 = vmax.f32 %v628_v26, 0.0  ;;  %v870_v33 = vmax.f32 %v756_v27, 0.0 }
 0x153   :  { %v1458_v34 = vpack.c.bf16 %v838_v32, %v837_v30  ;;  %v1538_v35 = vpack.c.bf16 %v870_v33, %v869_v31 }
 0x154   :  { %v632_v36 = vpop.f32.mrb[32].mxu0  ;;  %v760_v37 = vpop.f32.mrb[32].mxu1 }
 0x155   :  { %1586 = vst [vmem:[%s2217_s3 + $0x38] sm:$0xff] %v1458_v34   ;;  %1602 = vst [vmem:[%s2217_s3 + $0xb8] sm:$0xff] %v1538_v35   ;;  %v633_v38 = vadd.f32 %v2052_v17, %v632_v36  ;;  %v761_v39 = vadd.f32 %v2052_v17, %v760_v37  ;;  %v634_v40 = vpop.f32.mrb[33].mxu0  ;;  %v762_v41 = vpop.f32.mrb[33].mxu1 }
 0x156   :  { %v635_v42 = vpop.f32.mrb[34].mxu0  ;;  %v763_v43 = vpop.f32.mrb[34].mxu1 }
 0x157   :  { %v636_v44 = vadd.f32 %v2052_v17, %v635_v42  ;;  %v764_v45 = vadd.f32 %v2052_v17, %v763_v43  ;;  %v637_v46 = vpop.f32.mrb[35].mxu0  ;;  %v765_v47 = vpop.f32.mrb[35].mxu1  ;;  %v839_v48 = vmax.f32 %v633_v38, 0.0  ;;  %v871_v49 = vmax.f32 %v761_v39, 0.0 }
 0x159   :  { %v840_v50 = vmax.f32 %v636_v44, 0.0  ;;  %v872_v51 = vmax.f32 %v764_v45, 0.0 }
 0x15b   :  { %v1463_v52 = vpack.c.bf16 %v840_v50, %v839_v48  ;;  %v1543_v53 = vpack.c.bf16 %v872_v51, %v871_v49 }
 0x15c   :  { %v640_v54 = vpop.f32.mrb[36].mxu0  ;;  %v768_v55 = vpop.f32.mrb[36].mxu1 }
 0x15d   :  { %1587 = vst [vmem:[%s2217_s3 + $0x40] sm:$0xff] %v1463_v52   ;;  %1603 = vst [vmem:[%s2217_s3 + $0xc0] sm:$0xff] %v1543_v53   ;;  %v641_v56 = vadd.f32 %v2052_v17, %v640_v54  ;;  %v769_v57 = vadd.f32 %v2052_v17, %v768_v55  ;;  %v642_v58 = vpop.f32.mrb[37].mxu0  ;;  %v770_v59 = vpop.f32.mrb[37].mxu1 }
 0x15e   :  { %v643_v60 = vpop.f32.mrb[38].mxu0  ;;  %v771_v61 = vpop.f32.mrb[38].mxu1 }
 0x15f   :  { %v644_v62 = vadd.f32 %v2052_v17, %v643_v60  ;;  %v772_v63 = vadd.f32 %v2052_v17, %v771_v61  ;;  %v645_v0 = vpop.f32.mrb[39].mxu0  ;;  %v773_v1 = vpop.f32.mrb[39].mxu1  ;;  %v841_v2 = vmax.f32 %v641_v56, 0.0  ;;  %v873_v3 = vmax.f32 %v769_v57, 0.0 }
 0x161   :  { %v842_v4 = vmax.f32 %v644_v62, 0.0  ;;  %v874_v5 = vmax.f32 %v772_v63, 0.0 }
 0x163   :  { %v1468_v6 = vpack.c.bf16 %v842_v4, %v841_v2  ;;  %v1548_v7 = vpack.c.bf16 %v874_v5, %v873_v3 }
 0x164   :  { %v648_v8 = vpop.f32.mrb[40].mxu0  ;;  %v776_v9 = vpop.f32.mrb[40].mxu1 }
 0x165   :  { %1588 = vst [vmem:[%s2217_s3 + $0x48] sm:$0xff] %v1468_v6   ;;  %1604 = vst [vmem:[%s2217_s3 + $0xc8] sm:$0xff] %v1548_v7   ;;  %v649_v10 = vadd.f32 %v2052_v17, %v648_v8  ;;  %v777_v11 = vadd.f32 %v2052_v17, %v776_v9  ;;  %v650_v12 = vpop.f32.mrb[41].mxu0  ;;  %v778_v13 = vpop.f32.mrb[41].mxu1 }
 0x166   :  { %v651_v14 = vpop.f32.mrb[42].mxu0  ;;  %v779_v15 = vpop.f32.mrb[42].mxu1 }
 0x167   :  { %v652_v16 = vadd.f32 %v2052_v17, %v651_v14  ;;  %v780_v18 = vadd.f32 %v2052_v17, %v779_v15  ;;  %v653_v19 = vpop.f32.mrb[43].mxu0  ;;  %v781_v20 = vpop.f32.mrb[43].mxu1  ;;  %v843_v21 = vmax.f32 %v649_v10, 0.0  ;;  %v875_v22 = vmax.f32 %v777_v11, 0.0 }
 0x169   :  { %v844_v23 = vmax.f32 %v652_v16, 0.0  ;;  %v876_v24 = vmax.f32 %v780_v18, 0.0 }
 0x16b   :  { %v1473_v25 = vpack.c.bf16 %v844_v23, %v843_v21  ;;  %v1553_v26 = vpack.c.bf16 %v876_v24, %v875_v22 }
 0x16c   :  { %v656_v27 = vpop.f32.mrb[44].mxu0  ;;  %v784_v28 = vpop.f32.mrb[44].mxu1 }
 0x16d   :  { %1589 = vst [vmem:[%s2217_s3 + $0x50] sm:$0xff] %v1473_v25   ;;  %1605 = vst [vmem:[%s2217_s3 + $0xd0] sm:$0xff] %v1553_v26   ;;  %v657_v29 = vadd.f32 %v2052_v17, %v656_v27  ;;  %v785_v30 = vadd.f32 %v2052_v17, %v784_v28  ;;  %v658_v31 = vpop.f32.mrb[45].mxu0  ;;  %v786_v32 = vpop.f32.mrb[45].mxu1 }
 0x16e   :  { %v659_v33 = vpop.f32.mrb[46].mxu0  ;;  %v787_v34 = vpop.f32.mrb[46].mxu1 }
 0x16f   :  { %v660_v35 = vadd.f32 %v2052_v17, %v659_v33  ;;  %v788_v36 = vadd.f32 %v2052_v17, %v787_v34  ;;  %v661_v37 = vpop.f32.mrb[47].mxu0  ;;  %v789_v38 = vpop.f32.mrb[47].mxu1  ;;  %v845_v39 = vmax.f32 %v657_v29, 0.0  ;;  %v877_v40 = vmax.f32 %v785_v30, 0.0 }
 0x171   :  { %v846_v41 = vmax.f32 %v660_v35, 0.0  ;;  %v878_v42 = vmax.f32 %v788_v36, 0.0 }
 0x173   :  { %v1478_v43 = vpack.c.bf16 %v846_v41, %v845_v39  ;;  %v1558_v44 = vpack.c.bf16 %v878_v42, %v877_v40 }
 0x174   :  { %v664_v45 = vpop.f32.mrb[48].mxu0  ;;  %v792_v46 = vpop.f32.mrb[48].mxu1 }
 0x175   :  { %1590 = vst [vmem:[%s2217_s3 + $0x58] sm:$0xff] %v1478_v43   ;;  %1606 = vst [vmem:[%s2217_s3 + $0xd8] sm:$0xff] %v1558_v44   ;;  %v665_v47 = vadd.f32 %v2052_v17, %v664_v45  ;;  %v793_v48 = vadd.f32 %v2052_v17, %v792_v46  ;;  %v666_v49 = vpop.f32.mrb[49].mxu0  ;;  %v794_v50 = vpop.f32.mrb[49].mxu1 }
 0x176   :  { %v667_v51 = vpop.f32.mrb[50].mxu0  ;;  %v795_v52 = vpop.f32.mrb[50].mxu1 }
 0x177   :  { %v668_v53 = vadd.f32 %v2052_v17, %v667_v51  ;;  %v796_v54 = vadd.f32 %v2052_v17, %v795_v52  ;;  %v669_v55 = vpop.f32.mrb[51].mxu0  ;;  %v797_v56 = vpop.f32.mrb[51].mxu1  ;;  %v847_v57 = vmax.f32 %v665_v47, 0.0  ;;  %v879_v58 = vmax.f32 %v793_v48, 0.0 }
 0x179   :  { %v848_v59 = vmax.f32 %v668_v53, 0.0  ;;  %v880_v60 = vmax.f32 %v796_v54, 0.0 }
 0x17b   :  { %v1483_v61 = vpack.c.bf16 %v848_v59, %v847_v57  ;;  %v1563_v62 = vpack.c.bf16 %v880_v60, %v879_v58 }
 0x17c   :  { %v672_v63 = vpop.f32.mrb[52].mxu0  ;;  %v800_v0 = vpop.f32.mrb[52].mxu1 }
 0x17d   :  { %1591 = vst [vmem:[%s2217_s3 + $0x60] sm:$0xff] %v1483_v61   ;;  %1607 = vst [vmem:[%s2217_s3 + $0xe0] sm:$0xff] %v1563_v62   ;;  %v673_v1 = vadd.f32 %v2052_v17, %v672_v63  ;;  %v801_v2 = vadd.f32 %v2052_v17, %v800_v0  ;;  %v674_v3 = vpop.f32.mrb[53].mxu0  ;;  %v802_v4 = vpop.f32.mrb[53].mxu1 }
 0x17e   :  { %v675_v5 = vpop.f32.mrb[54].mxu0  ;;  %v803_v6 = vpop.f32.mrb[54].mxu1 }
 0x17f   :  { %v676_v7 = vadd.f32 %v2052_v17, %v675_v5  ;;  %v804_v8 = vadd.f32 %v2052_v17, %v803_v6  ;;  %v677_v9 = vpop.f32.mrb[55].mxu0  ;;  %v805_v10 = vpop.f32.mrb[55].mxu1  ;;  %v849_v11 = vmax.f32 %v673_v1, 0.0  ;;  %v881_v12 = vmax.f32 %v801_v2, 0.0 }
 0x181   :  { %v850_v13 = vmax.f32 %v676_v7, 0.0  ;;  %v882_v14 = vmax.f32 %v804_v8, 0.0 }
 0x183   :  { %v1488_v15 = vpack.c.bf16 %v850_v13, %v849_v11  ;;  %v1568_v16 = vpack.c.bf16 %v882_v14, %v881_v12 }
 0x184   :  { %v680_v18 = vpop.f32.mrb[56].mxu0  ;;  %v808_v19 = vpop.f32.mrb[56].mxu1 }
 0x185   :  { %1592 = vst [vmem:[%s2217_s3 + $0x68] sm:$0xff] %v1488_v15   ;;  %1608 = vst [vmem:[%s2217_s3 + $0xe8] sm:$0xff] %v1568_v16   ;;  %v681_v20 = vadd.f32 %v2052_v17, %v680_v18  ;;  %v809_v21 = vadd.f32 %v2052_v17, %v808_v19  ;;  %v682_v22 = vpop.f32.mrb[57].mxu0  ;;  %v810_v23 = vpop.f32.mrb[57].mxu1 }
 0x186   :  { %v683_v24 = vpop.f32.mrb[58].mxu0  ;;  %v811_v25 = vpop.f32.mrb[58].mxu1 }
 0x187   :  { %v684_v26 = vadd.f32 %v2052_v17, %v683_v24  ;;  %v812_v27 = vadd.f32 %v2052_v17, %v811_v25  ;;  %v685_v28 = vpop.f32.mrb[59].mxu0  ;;  %v813_v29 = vpop.f32.mrb[59].mxu1  ;;  %v851_v30 = vmax.f32 %v681_v20, 0.0  ;;  %v883_v31 = vmax.f32 %v809_v21, 0.0 }
 0x189   :  { %v852_v32 = vmax.f32 %v684_v26, 0.0  ;;  %v884_v33 = vmax.f32 %v812_v27, 0.0 }
 0x18b   :  { %v1493_v34 = vpack.c.bf16 %v852_v32, %v851_v30  ;;  %v1573_v35 = vpack.c.bf16 %v884_v33, %v883_v31 }
 0x18c   :  { %v688_v36 = vpop.f32.mrb[60].mxu0  ;;  %v816_v37 = vpop.f32.mrb[60].mxu1 }
 0x18d   :  { %1593 = vst [vmem:[%s2217_s3 + $0x70] sm:$0xff] %v1493_v34   ;;  %1609 = vst [vmem:[%s2217_s3 + $0xf0] sm:$0xff] %v1573_v35   ;;  %v689_v38 = vadd.f32 %v2052_v17, %v688_v36  ;;  %v817_v39 = vadd.f32 %v2052_v17, %v816_v37  ;;  %v690_v40 = vpop.f32.mrb[61].mxu0  ;;  %v818_v41 = vpop.f32.mrb[61].mxu1 }
 0x18e   :  { %v691_v42 = vpop.f32.mrb[62].mxu0  ;;  %v819_v43 = vpop.f32.mrb[62].mxu1 }
 0x18f   :  { %v692_v44 = vadd.f32 %v2052_v17, %v691_v42  ;;  %v820_v45 = vadd.f32 %v2052_v17, %v819_v43  ;;  %v693_v46 = vpop.f32.mrb[63].mxu0  ;;  %v821_v47 = vpop.f32.mrb[63].mxu1  ;;  %v853_v48 = vmax.f32 %v689_v38, 0.0  ;;  %v885_v49 = vmax.f32 %v817_v39, 0.0 }
 0x191   :  { %v854_v50 = vmax.f32 %v692_v44, 0.0  ;;  %v886_v51 = vmax.f32 %v820_v45, 0.0 }
 0x193   :  { %v1498_v52 = vpack.c.bf16 %v854_v50, %v853_v48  ;;  %v1578_v53 = vpack.c.bf16 %v886_v51, %v885_v49 }
 0x195   :  { %1594 = vst [vmem:[%s2217_s3 + $0x78] sm:$0xff] %v1498_v52   ;;  %1610 = vst [vmem:[%s2217_s3 + $0xf8] sm:$0xff] %v1578_v53  }

// kernel: resnet_forward.9
= control target key start
LH: loop header
LB: loop body
LE: loop exit
PB: predicated region body
PF: predicated region fallthrough
CT: control target
= control target key end

     0   :  { %v2110_v0 = vmov 0   ;;  %s2669_s1 = inlined_call_operand.vmem [shape: bf16[256,128], index: 1, kind: input, shape index: {}]   ;;  %s2670_s0 = inlined_call_operand.vmem [shape: bf16[512,256], index: 0, kind: input, shape index: {}]   ;;  %s2671_s3 = inlined_call_operand.vmem [shape: bf16[512,128], index: 3, kind: input, shape index: {}]   ;;  %s2672_s2 = inlined_call_operand.vmem [shape: f32[1,128], index: 2, kind: input, shape index: {}]   ;;  %s2673_s4 = inlined_call_operand.vmem [shape: bf16[512,128], index: 4, kind: output, shape index: {}]  }
   0x1   :  { %537 = vmatprep.subr.bf16.mxu0 %v2110_v0  ;;  %1965 = vmatprep.subr.bf16.mxu1 %v2110_v0  ;;  %v1998_v1 = vld [vmem:[%s2669_s1] sm:$0xff]   ;;  %v1999_v2 = vld [vmem:[%s2669_s1 + $0x8] sm:$0xff]   ;;  %v2000_v3 = vld [vmem:[%s2669_s1 + $0x10] sm:$0xff]  }
   0x2   :  { %538 = vmatpush1.bf16.msra.mxu0 %v1998_v1  ;;  %1981 = vmatpush1.bf16.msra.mxu1 %v1998_v1  ;;  %v2001_v4 = vld [vmem:[%s2669_s1 + $0x18] sm:$0xff]   ;;  %v2002_v5 = vld [vmem:[%s2669_s1 + $0x20] sm:$0xff]   ;;  %v2003_v7 = vld [vmem:[%s2669_s1 + $0x28] sm:$0xff]  }
   0x3   :  { %539 = vmatprep.subr.bf16.mxu0 %v2110_v0  ;;  %1966 = vmatprep.subr.bf16.mxu1 %v2110_v0  ;;  %v2016_v6 = vld [vmem:[%s2670_s0 + $0x4] ss:$8 sps:$4 sm:$0xff]   ;;  %v2004_v9 = vld [vmem:[%s2669_s1 + $0x30] sm:$0xff]   ;;  %v2005_v10 = vld [vmem:[%s2669_s1 + $0x38] sm:$0xff]  }
   0x4   :  { %v2019_v8 = vld [vmem:[%s2670_s0 + $0x104] ss:$8 sps:$4 sm:$0xff]   ;;  %569 = vmatprep.mubr.bf16.mxu0 %v2016_v6  ;;  %v2008_v13 = vld [vmem:[%s2669_s1 + $0x50] sm:$0xff]   ;;  %v2009_v14 = vld [vmem:[%s2669_s1 + $0x58] sm:$0xff]  }
   0x5   :  { %697 = vmatprep.mubr.bf16.mxu1 %v2019_v8  ;;  %v2006_v11 = vld [vmem:[%s2669_s1 + $0x40] sm:$0xff]   ;;  %v2007_v12 = vld [vmem:[%s2669_s1 + $0x48] sm:$0xff]   ;;  %v2012_v17 = vld [vmem:[%s2669_s1 + $0x70] sm:$0xff]  }
   0x6   :  { %540 = vmatpush1.bf16.msra.mxu0 %v1999_v2  ;;  %1982 = vmatpush1.bf16.msra.mxu1 %v1999_v2  ;;  %v2010_v15 = vld [vmem:[%s2669_s1 + $0x60] sm:$0xff]   ;;  %v2011_v16 = vld [vmem:[%s2669_s1 + $0x68] sm:$0xff]   ;;  %v2013_v18 = vld [vmem:[%s2669_s1 + $0x78] sm:$0xff]  }
   0x7   :  { %541 = vmatprep.subr.bf16.mxu0 %v2110_v0  ;;  %1967 = vmatprep.subr.bf16.mxu1 %v2110_v0  ;;  %v2014_v19 = vld [vmem:[%s2670_s0] ss:$8 sps:$4 sm:$0xff]   ;;  %v2020_v21 = vld [vmem:[%s2670_s0 + $0x14] ss:$8 sps:$4 sm:$0xff]   ;;  %v2024_v23 = vld [vmem:[%s2670_s0 + $0x10] ss:$8 sps:$4 sm:$0xff]  }
   0x8   :  { %v2017_v20 = vld [vmem:[%s2670_s0 + $0x100] ss:$8 sps:$4 sm:$0xff]   ;;  %v2022_v22 = vld [vmem:[%s2670_s0 + $0x114] ss:$8 sps:$4 sm:$0xff]   ;;  %v2025_v24 = vld [vmem:[%s2670_s0 + $0x110] ss:$8 sps:$4 sm:$0xff]  }
   0x9   :  { %v2026_v25 = vld [vmem:[%s2670_s0 + $0x24] ss:$8 sps:$4 sm:$0xff]   ;;  %v2030_v27 = vld [vmem:[%s2670_s0 + $0x20] ss:$8 sps:$4 sm:$0xff]   ;;  %v2032_v29 = vld [vmem:[%s2670_s0 + $0x34] ss:$8 sps:$4 sm:$0xff]  }
   0xa   :  { %542 = vmatpush1.bf16.msra.mxu0 %v2000_v3  ;;  %1983 = vmatpush1.bf16.msra.mxu1 %v2000_v3  ;;  %v2028_v26 = vld [vmem:[%s2670_s0 + $0x124] ss:$8 sps:$4 sm:$0xff]   ;;  %v2031_v28 = vld [vmem:[%s2670_s0 + $0x120] ss:$8 sps:$4 sm:$0xff]   ;;  %v2034_v30 = vld [vmem:[%s2670_s0 + $0x134] ss:$8 sps:$4 sm:$0xff]  }
   0xb   :  { %543 = vmatprep.subr.bf16.mxu0 %v2110_v0  ;;  %1968 = vmatprep.subr.bf16.mxu1 %v2110_v0  ;;  %v2036_v31 = vld [vmem:[%s2670_s0 + $0x30] ss:$8 sps:$4 sm:$0xff]   ;;  %v2038_v33 = vld [vmem:[%s2670_s0 + $0x44] ss:$8 sps:$4 sm:$0xff]   ;;  %v2042_v35 = vld [vmem:[%s2670_s0 + $0x40] ss:$8 sps:$4 sm:$0xff]  }
   0xc   :  { %v2037_v32 = vld [vmem:[%s2670_s0 + $0x130] ss:$8 sps:$4 sm:$0xff]   ;;  %v2040_v34 = vld [vmem:[%s2670_s0 + $0x144] ss:$8 sps:$4 sm:$0xff]   ;;  %v2043_v36 = vld [vmem:[%s2670_s0 + $0x140] ss:$8 sps:$4 sm:$0xff]  }
   0xd   :  { %v2044_v37 = vld [vmem:[%s2670_s0 + $0x54] ss:$8 sps:$4 sm:$0xff]   ;;  %v2048_v39 = vld [vmem:[%s2670_s0 + $0x50] ss:$8 sps:$4 sm:$0xff]   ;;  %v2050_v41 = vld [vmem:[%s2670_s0 + $0x64] ss:$8 sps:$4 sm:$0xff]  }
   0xe   :  { %544 = vmatpush1.bf16.msra.mxu0 %v2001_v4  ;;  %1984 = vmatpush1.bf16.msra.mxu1 %v2001_v4  ;;  %v2046_v38 = vld [vmem:[%s2670_s0 + $0x154] ss:$8 sps:$4 sm:$0xff]   ;;  %v2049_v40 = vld [vmem:[%s2670_s0 + $0x150] ss:$8 sps:$4 sm:$0xff]   ;;  %v2052_v42 = vld [vmem:[%s2670_s0 + $0x164] ss:$8 sps:$4 sm:$0xff]  }
   0xf   :  { %545 = vmatprep.subr.bf16.mxu0 %v2110_v0  ;;  %1969 = vmatprep.subr.bf16.mxu1 %v2110_v0  ;;  %v2054_v43 = vld [vmem:[%s2670_s0 + $0x60] ss:$8 sps:$4 sm:$0xff]   ;;  %v2056_v45 = vld [vmem:[%s2670_s0 + $0x74] ss:$8 sps:$4 sm:$0xff]   ;;  %v2060_v47 = vld [vmem:[%s2670_s0 + $0x70] ss:$8 sps:$4 sm:$0xff]  }
  0x10   :  { %v2055_v44 = vld [vmem:[%s2670_s0 + $0x160] ss:$8 sps:$4 sm:$0xff]   ;;  %v2058_v46 = vld [vmem:[%s2670_s0 + $0x174] ss:$8 sps:$4 sm:$0xff]   ;;  %v2061_v48 = vld [vmem:[%s2670_s0 + $0x170] ss:$8 sps:$4 sm:$0xff]  }
  0x11   :  { %v2062_v49 = vld [vmem:[%s2670_s0 + $0x84] ss:$8 sps:$4 sm:$0xff]   ;;  %v2066_v51 = vld [vmem:[%s2670_s0 + $0x80] ss:$8 sps:$4 sm:$0xff]   ;;  %v2068_v53 = vld [vmem:[%s2670_s0 + $0x94] ss:$8 sps:$4 sm:$0xff]  }
  0x12   :  { %546 = vmatpush1.bf16.msra.mxu0 %v2002_v5  ;;  %1985 = vmatpush1.bf16.msra.mxu1 %v2002_v5  ;;  %v2064_v50 = vld [vmem:[%s2670_s0 + $0x184] ss:$8 sps:$4 sm:$0xff]   ;;  %v2067_v52 = vld [vmem:[%s2670_s0 + $0x180] ss:$8 sps:$4 sm:$0xff]   ;;  %v2070_v54 = vld [vmem:[%s2670_s0 + $0x194] ss:$8 sps:$4 sm:$0xff]  }
  0x13   :  { %547 = vmatprep.subr.bf16.mxu0 %v2110_v0  ;;  %1970 = vmatprep.subr.bf16.mxu1 %v2110_v0  ;;  %v2072_v55 = vld [vmem:[%s2670_s0 + $0x90] ss:$8 sps:$4 sm:$0xff]   ;;  %v2074_v57 = vld [vmem:[%s2670_s0 + $0xa4] ss:$8 sps:$4 sm:$0xff]   ;;  %v2078_v59 = vld [vmem:[%s2670_s0 + $0xa0] ss:$8 sps:$4 sm:$0xff]  }
  0x14   :  { %v2073_v56 = vld [vmem:[%s2670_s0 + $0x190] ss:$8 sps:$4 sm:$0xff]   ;;  %v2076_v58 = vld [vmem:[%s2670_s0 + $0x1a4] ss:$8 sps:$4 sm:$0xff]   ;;  %v2079_v60 = vld [vmem:[%s2670_s0 + $0x1a0] ss:$8 sps:$4 sm:$0xff]  }
  0x15   :  { %v2080_v61 = vld [vmem:[%s2670_s0 + $0xb4] ss:$8 sps:$4 sm:$0xff]   ;;  %v2084_v63 = vld [vmem:[%s2670_s0 + $0xb0] ss:$8 sps:$4 sm:$0xff]   ;;  %v2086_v1 = vld [vmem:[%s2670_s0 + $0xc4] ss:$8 sps:$4 sm:$0xff]  }
  0x16   :  { %548 = vmatpush1.bf16.msra.mxu0 %v2003_v7  ;;  %1986 = vmatpush1.bf16.msra.mxu1 %v2003_v7  ;;  %v2082_v62 = vld [vmem:[%s2670_s0 + $0x1b4] ss:$8 sps:$4 sm:$0xff]   ;;  %v2088_v2 = vld [vmem:[%s2670_s0 + $0x1c4] ss:$8 sps:$4 sm:$0xff]   ;;  %v2090_v3 = vld [vmem:[%s2670_s0 + $0xc0] ss:$8 sps:$4 sm:$0xff]  }
  0x17   :  { %549 = vmatprep.subr.bf16.mxu0 %v2110_v0  ;;  %1971 = vmatprep.subr.bf16.mxu1 %v2110_v0  ;;  %v2091_v4 = vld [vmem:[%s2670_s0 + $0x1c0] ss:$8 sps:$4 sm:$0xff]   ;;  %v2092_v5 = vld [vmem:[%s2670_s0 + $0xd4] ss:$8 sps:$4 sm:$0xff]   ;;  %v2096_v7 = vld [vmem:[%s2670_s0 + $0xd0] ss:$8 sps:$4 sm:$0xff]  }
  0x18   :  { %v2094_v6 = vld [vmem:[%s2670_s0 + $0x1d4] ss:$8 sps:$4 sm:$0xff]   ;;  %v2097_v8 = vld [vmem:[%s2670_s0 + $0x1d0] ss:$8 sps:$4 sm:$0xff]  }
  0x1a   :  { %550 = vmatpush1.bf16.msra.mxu0 %v2004_v9  ;;  %1987 = vmatpush1.bf16.msra.mxu1 %v2004_v9  ;;  %v2098_v9 = vld [vmem:[%s2670_s0 + $0xe4] ss:$8 sps:$4 sm:$0xff]  }
  0x1b   :  { %551 = vmatprep.subr.bf16.mxu0 %v2110_v0  ;;  %1972 = vmatprep.subr.bf16.mxu1 %v2110_v0 }
  0x1e   :  { %552 = vmatpush1.bf16.msra.mxu0 %v2005_v10  ;;  %1988 = vmatpush1.bf16.msra.mxu1 %v2005_v10  ;;  %v2100_v10 = vld [vmem:[%s2670_s0 + $0x1e4] ss:$8 sps:$4 sm:$0xff]  }
  0x1f   :  { %553 = vmatprep.subr.bf16.mxu0 %v2110_v0  ;;  %1973 = vmatprep.subr.bf16.mxu1 %v2110_v0 }
  0x22   :  { %554 = vmatpush1.bf16.msra.mxu0 %v2006_v11  ;;  %1989 = vmatpush1.bf16.msra.mxu1 %v2006_v11  ;;  %v2102_v11 = vld [vmem:[%s2670_s0 + $0xe0] ss:$8 sps:$4 sm:$0xff]  }
  0x23   :  { %555 = vmatprep.subr.bf16.mxu0 %v2110_v0  ;;  %1974 = vmatprep.subr.bf16.mxu1 %v2110_v0 }
  0x26   :  { %556 = vmatpush1.bf16.msra.mxu0 %v2007_v12  ;;  %1990 = vmatpush1.bf16.msra.mxu1 %v2007_v12  ;;  %v2103_v12 = vld [vmem:[%s2670_s0 + $0x1e0] ss:$8 sps:$4 sm:$0xff]  }
  0x27   :  { %557 = vmatprep.subr.bf16.mxu0 %v2110_v0  ;;  %1975 = vmatprep.subr.bf16.mxu1 %v2110_v0 }
  0x2a   :  { %558 = vmatpush1.bf16.msra.mxu0 %v2008_v13  ;;  %1991 = vmatpush1.bf16.msra.mxu1 %v2008_v13  ;;  %v2104_v13 = vld [vmem:[%s2670_s0 + $0xf4] ss:$8 sps:$4 sm:$0xff]  }
  0x2b   :  { %559 = vmatprep.subr.bf16.mxu0 %v2110_v0  ;;  %1976 = vmatprep.subr.bf16.mxu1 %v2110_v0 }
  0x2e   :  { %560 = vmatpush1.bf16.msra.mxu0 %v2009_v14  ;;  %1992 = vmatpush1.bf16.msra.mxu1 %v2009_v14  ;;  %v2106_v14 = vld [vmem:[%s2670_s0 + $0x1f4] ss:$8 sps:$4 sm:$0xff]  }
  0x2f   :  { %561 = vmatprep.subr.bf16.mxu0 %v2110_v0  ;;  %1977 = vmatprep.subr.bf16.mxu1 %v2110_v0 }
  0x32   :  { %562 = vmatpush1.bf16.msra.mxu0 %v2010_v15  ;;  %1993 = vmatpush1.bf16.msra.mxu1 %v2010_v15  ;;  %v2108_v15 = vld [vmem:[%s2670_s0 + $0xf0] ss:$8 sps:$4 sm:$0xff]  }
  0x33   :  { %563 = vmatprep.subr.bf16.mxu0 %v2110_v0  ;;  %1978 = vmatprep.subr.bf16.mxu1 %v2110_v0 }
  0x36   :  { %564 = vmatpush1.bf16.msra.mxu0 %v2011_v16  ;;  %1994 = vmatpush1.bf16.msra.mxu1 %v2011_v16  ;;  %v2109_v16 = vld [vmem:[%s2670_s0 + $0x1f0] ss:$8 sps:$4 sm:$0xff]  }
  0x37   :  { %565 = vmatprep.subr.bf16.mxu0 %v2110_v0  ;;  %1979 = vmatprep.subr.bf16.mxu1 %v2110_v0 }
  0x3a   :  { %566 = vmatpush1.bf16.msra.mxu0 %v2012_v17  ;;  %1995 = vmatpush1.bf16.msra.mxu1 %v2012_v17  ;;  %v1616_v17 = vld [vmem:[%s2671_s3] sm:$0xff]  }
  0x3b   :  { %567 = vmatprep.subr.bf16.mxu0 %v2110_v0  ;;  %1980 = vmatprep.subr.bf16.mxu1 %v2110_v0  ;;  %v2085_v0 = vld [vmem:[%s2670_s0 + $0x1b0] ss:$8 sps:$4 sm:$0xff]  }
  0x3e   :  { %568 = vmatpush1.bf16.msra.mxu0 %v2013_v18  ;;  %1996 = vmatpush1.bf16.msra.mxu1 %v2013_v18  ;;  %v1918_v18 = vld [vmem:[%s2671_s3 + $0x80] sm:$0xff]  }
  0x41   :  { %570 = vmatmul.mubr.bf16.vlgmr.msra.gmra.mrb[0].mxu0 %v2014_v19  ;;  %698 = vmatmul.mubr.bf16.vlgmr.msra.gmra.mrb[0].mxu1 %v2017_v20  ;;  %v2417_v19 = vld [vmem:[%s2672_s2] ss:$0 sm:$0xff]  ;;  %v1617_v20 = vunpack.c.l.bf16 %v1616_v17 }
  0x42   :  { %577 = vmatprep.mubr.bf16.mxu0 %v2020_v21  ;;  %705 = vmatprep.mubr.bf16.mxu1 %v2022_v22  ;;  %v1681_v21 = vunpack.c.l.bf16 %v1918_v18 }
  0x49   :  { %578 = vmatmul.mubr.bf16.gmra.mrb[4].mxu0 %v2024_v23  ;;  %706 = vmatmul.mubr.bf16.gmra.mrb[4].mxu1 %v2025_v24 }
  0x4a   :  { %585 = vmatprep.mubr.bf16.mxu0 %v2026_v25  ;;  %713 = vmatprep.mubr.bf16.mxu1 %v2028_v26 }
  0x51   :  { %586 = vmatmul.mubr.bf16.gmra.mrb[8].mxu0 %v2030_v27  ;;  %714 = vmatmul.mubr.bf16.gmra.mrb[8].mxu1 %v2031_v28  ;;  %v1618_v28 = vunpack.c.h.bf16 %v1616_v17 }
  0x52   :  { %593 = vmatprep.mubr.bf16.mxu0 %v2032_v29  ;;  %721 = vmatprep.mubr.bf16.mxu1 %v2034_v30  ;;  %v1682_v29 = vunpack.c.h.bf16 %v1918_v18 }
  0x59   :  { %594 = vmatmul.mubr.bf16.gmra.mrb[12].mxu0 %v2036_v31  ;;  %722 = vmatmul.mubr.bf16.gmra.mrb[12].mxu1 %v2037_v32 }
  0x5a   :  { %601 = vmatprep.mubr.bf16.mxu0 %v2038_v33  ;;  %729 = vmatprep.mubr.bf16.mxu1 %v2040_v34 }
  0x61   :  { %602 = vmatmul.mubr.bf16.gmra.mrb[16].mxu0 %v2042_v35  ;;  %730 = vmatmul.mubr.bf16.gmra.mrb[16].mxu1 %v2043_v36 }
  0x62   :  { %609 = vmatprep.mubr.bf16.mxu0 %v2044_v37  ;;  %737 = vmatprep.mubr.bf16.mxu1 %v2046_v38  ;;  %v1903_v38 = vld [vmem:[%s2671_s3 + $0x8] sm:$0xff]  }
  0x69   :  { %610 = vmatmul.mubr.bf16.gmra.mrb[20].mxu0 %v2048_v39  ;;  %738 = vmatmul.mubr.bf16.gmra.mrb[20].mxu1 %v2049_v40  ;;  %v1919_v39 = vld [vmem:[%s2671_s3 + $0x88] sm:$0xff]  }
  0x6a   :  { %617 = vmatprep.mubr.bf16.mxu0 %v2050_v41  ;;  %745 = vmatprep.mubr.bf16.mxu1 %v2052_v42  ;;  %v1621_v42 = vunpack.c.l.bf16 %v1903_v38 }
  0x71   :  { %618 = vmatmul.mubr.bf16.gmra.mrb[24].mxu0 %v2054_v43  ;;  %746 = vmatmul.mubr.bf16.gmra.mrb[24].mxu1 %v2055_v44  ;;  %v1685_v43 = vunpack.c.l.bf16 %v1919_v39 }
  0x72   :  { %625 = vmatprep.mubr.bf16.mxu0 %v2056_v45  ;;  %753 = vmatprep.mubr.bf16.mxu1 %v2058_v46 }
  0x79   :  { %626 = vmatmul.mubr.bf16.gmra.mrb[28].mxu0 %v2060_v47  ;;  %754 = vmatmul.mubr.bf16.gmra.mrb[28].mxu1 %v2061_v48 }
  0x7a   :  { %633 = vmatprep.mubr.bf16.mxu0 %v2062_v49  ;;  %761 = vmatprep.mubr.bf16.mxu1 %v2064_v50  ;;  %v1622_v50 = vunpack.c.h.bf16 %v1903_v38 }
  0x81   :  { %634 = vmatmul.mubr.bf16.gmra.mrb[32].mxu0 %v2066_v51  ;;  %762 = vmatmul.mubr.bf16.gmra.mrb[32].mxu1 %v2067_v52  ;;  %v1686_v51 = vunpack.c.h.bf16 %v1919_v39 }
  0x82   :  { %641 = vmatprep.mubr.bf16.mxu0 %v2068_v53  ;;  %769 = vmatprep.mubr.bf16.mxu1 %v2070_v54 }
  0x89   :  { %642 = vmatmul.mubr.bf16.gmra.mrb[36].mxu0 %v2072_v55  ;;  %770 = vmatmul.mubr.bf16.gmra.mrb[36].mxu1 %v2073_v56 }
  0x8a   :  { %649 = vmatprep.mubr.bf16.mxu0 %v2074_v57  ;;  %777 = vmatprep.mubr.bf16.mxu1 %v2076_v58 }
  0x91   :  { %650 = vmatmul.mubr.bf16.gmra.mrb[40].mxu0 %v2078_v59  ;;  %778 = vmatmul.mubr.bf16.gmra.mrb[40].mxu1 %v2079_v60 }
  0x92   :  { %657 = vmatprep.mubr.bf16.mxu0 %v2080_v61  ;;  %785 = vmatprep.mubr.bf16.mxu1 %v2082_v62 }
  0x99   :  { %658 = vmatmul.mubr.bf16.gmra.mrb[44].mxu0 %v2084_v63  ;;  %786 = vmatmul.mubr.bf16.gmra.mrb[44].mxu1 %v2085_v0 }
  0x9a   :  { %665 = vmatprep.mubr.bf16.mxu0 %v2086_v1  ;;  %793 = vmatprep.mubr.bf16.mxu1 %v2088_v2  ;;  %v1904_v2 = vld [vmem:[%s2671_s3 + $0x10] sm:$0xff]  }
  0xa1   :  { %666 = vmatmul.mubr.bf16.gmra.mrb[48].mxu0 %v2090_v3  ;;  %794 = vmatmul.mubr.bf16.gmra.mrb[48].mxu1 %v2091_v4  ;;  %v1920_v3 = vld [vmem:[%s2671_s3 + $0x90] sm:$0xff]  }
  0xa2   :  { %673 = vmatprep.mubr.bf16.mxu0 %v2092_v5  ;;  %801 = vmatprep.mubr.bf16.mxu1 %v2094_v6  ;;  %v1625_v6 = vunpack.c.l.bf16 %v1904_v2 }
  0xa9   :  { %674 = vmatmul.mubr.bf16.gmra.mrb[52].mxu0 %v2096_v7  ;;  %802 = vmatmul.mubr.bf16.gmra.mrb[52].mxu1 %v2097_v8  ;;  %v1689_v7 = vunpack.c.l.bf16 %v1920_v3 }
  0xaa   :  { %681 = vmatprep.mubr.bf16.mxu0 %v2098_v9  ;;  %809 = vmatprep.mubr.bf16.mxu1 %v2100_v10 }
  0xb1   :  { %682 = vmatmul.mubr.bf16.gmra.mrb[56].mxu0 %v2102_v11  ;;  %810 = vmatmul.mubr.bf16.gmra.mrb[56].mxu1 %v2103_v12 }
  0xb2   :  { %689 = vmatprep.mubr.bf16.mxu0 %v2104_v13  ;;  %817 = vmatprep.mubr.bf16.mxu1 %v2106_v14  ;;  %v1626_v14 = vunpack.c.h.bf16 %v1904_v2 }
  0xb9   :  { %690 = vmatmul.mubr.bf16.gmra.mrb[60].mxu0 %v2108_v15  ;;  %818 = vmatmul.mubr.bf16.gmra.mrb[60].mxu1 %v2109_v16  ;;  %v1690_v15 = vunpack.c.h.bf16 %v1920_v3 }
 0x114   :  { %v571_v22 = vpop.f32.mrb[0].mxu0  ;;  %v699_v23 = vpop.f32.mrb[0].mxu1 }
 0x115   :  { %v572_v24 = vadd.f32 %v2417_v19, %v571_v22  ;;  %v700_v25 = vadd.f32 %v2417_v19, %v699_v23  ;;  %v573_v26 = vpop.f32.mrb[1].mxu0  ;;  %v701_v27 = vpop.f32.mrb[1].mxu1 }
 0x116   :  { %v574_v30 = vpop.f32.mrb[2].mxu0  ;;  %v702_v31 = vpop.f32.mrb[2].mxu1 }
 0x117   :  { %v954_v32 = vadd.f32 %v1617_v20, %v572_v24  ;;  %v986_v33 = vadd.f32 %v1681_v21, %v700_v25  ;;  %v575_v34 = vadd.f32 %v2417_v19, %v574_v30  ;;  %v703_v35 = vadd.f32 %v2417_v19, %v702_v31  ;;  %v576_v36 = vpop.f32.mrb[3].mxu0  ;;  %v704_v37 = vpop.f32.mrb[3].mxu1  ;;  %v1905_v31 = vld [vmem:[%s2671_s3 + $0x18] sm:$0xff]  }
 0x119   :  { %v955_v40 = vadd.f32 %v1618_v28, %v575_v34  ;;  %v987_v41 = vadd.f32 %v1682_v29, %v703_v35  ;;  %v1018_v44 = vmax.f32 %v954_v32, 0.0  ;;  %v1050_v45 = vmax.f32 %v986_v33, 0.0  ;;  %v1921_v32 = vld [vmem:[%s2671_s3 + $0x98] sm:$0xff]  }
 0x11a   :  { %v1629_v35 = vunpack.c.l.bf16 %v1905_v31  ;;  %v1693_v36 = vunpack.c.l.bf16 %v1921_v32 }
 0x11b   :  { %v1019_v46 = vmax.f32 %v955_v40, 0.0  ;;  %v1051_v47 = vmax.f32 %v987_v41, 0.0 }
 0x11c   :  { %v579_v48 = vpop.f32.mrb[4].mxu0  ;;  %v707_v49 = vpop.f32.mrb[4].mxu1 }
 0x11d   :  { %v1746_v52 = vpack.c.bf16 %v1019_v46, %v1018_v44  ;;  %v1826_v53 = vpack.c.bf16 %v1051_v47, %v1050_v45  ;;  %v580_v54 = vadd.f32 %v2417_v19, %v579_v48  ;;  %v708_v55 = vadd.f32 %v2417_v19, %v707_v49  ;;  %v581_v56 = vpop.f32.mrb[5].mxu0  ;;  %v709_v57 = vpop.f32.mrb[5].mxu1 }
 0x11e   :  { %v582_v58 = vpop.f32.mrb[6].mxu0  ;;  %v710_v59 = vpop.f32.mrb[6].mxu1  ;;  %v1694_v44 = vunpack.c.h.bf16 %v1921_v32 }
 0x11f   :  { %1747 = vst [vmem:[%s2673_s4] sm:$0xff] %v1746_v52   ;;  %1949 = vst [vmem:[%s2673_s4 + $0x80] sm:$0xff] %v1826_v53   ;;  %v956_v60 = vadd.f32 %v1621_v42, %v580_v54  ;;  %v988_v61 = vadd.f32 %v1685_v43, %v708_v55  ;;  %v583_v62 = vadd.f32 %v2417_v19, %v582_v58  ;;  %v584_v0 = vpop.f32.mrb[7].mxu0  ;;  %v712_v1 = vpop.f32.mrb[7].mxu1  ;;  %v1630_v43 = vunpack.c.h.bf16 %v1905_v31 }
 0x120   :  { %v711_v63 = vadd.f32 %v2417_v19, %v710_v59  ;;  %v1906_v59 = vld [vmem:[%s2671_s3 + $0x20] sm:$0xff]  }
 0x121   :  { %v957_v4 = vadd.f32 %v1622_v50, %v583_v62  ;;  %v1020_v8 = vmax.f32 %v956_v60, 0.0  ;;  %v1052_v9 = vmax.f32 %v988_v61, 0.0  ;;  %v1922_v60 = vld [vmem:[%s2671_s3 + $0xa0] sm:$0xff]  }
 0x122   :  { %v989_v5 = vadd.f32 %v1686_v51, %v711_v63  ;;  %v1633_v63 = vunpack.c.l.bf16 %v1906_v59  ;;  %v1697_v0 = vunpack.c.l.bf16 %v1922_v60 }
 0x123   :  { %v1021_v10 = vmax.f32 %v957_v4, 0.0 }
 0x124   :  { %v1053_v11 = vmax.f32 %v989_v5, 0.0  ;;  %v587_v12 = vpop.f32.mrb[8].mxu0  ;;  %v715_v13 = vpop.f32.mrb[8].mxu1 }
 0x125   :  { %v1751_v16 = vpack.c.bf16 %v1021_v10, %v1020_v8  ;;  %v588_v18 = vadd.f32 %v2417_v19, %v587_v12  ;;  %v716_v20 = vadd.f32 %v2417_v19, %v715_v13  ;;  %v589_v21 = vpop.f32.mrb[9].mxu0  ;;  %v717_v22 = vpop.f32.mrb[9].mxu1  ;;  %v1698_v8 = vunpack.c.h.bf16 %v1922_v60 }
 0x126   :  { %v1831_v17 = vpack.c.bf16 %v1053_v11, %v1052_v9  ;;  %v590_v23 = vpop.f32.mrb[10].mxu0  ;;  %v718_v24 = vpop.f32.mrb[10].mxu1 }
 0x127   :  { %1934 = vst [vmem:[%s2673_s4 + $0x8] sm:$0xff] %v1751_v16   ;;  %v958_v25 = vadd.f32 %v1625_v6, %v588_v18  ;;  %v990_v26 = vadd.f32 %v1689_v7, %v716_v20  ;;  %v591_v27 = vadd.f32 %v2417_v19, %v590_v23  ;;  %v719_v28 = vadd.f32 %v2417_v19, %v718_v24  ;;  %v592_v29 = vpop.f32.mrb[11].mxu0  ;;  %v720_v30 = vpop.f32.mrb[11].mxu1  ;;  %v1907_v24 = vld [vmem:[%s2671_s3 + $0x28] sm:$0xff]  }
 0x128   :  { %1950 = vst [vmem:[%s2673_s4 + $0x88] sm:$0xff] %v1831_v17   ;;  %v1634_v7 = vunpack.c.h.bf16 %v1906_v59 }
 0x129   :  { %v959_v33 = vadd.f32 %v1626_v14, %v591_v27  ;;  %v991_v34 = vadd.f32 %v1690_v15, %v719_v28  ;;  %v1022_v37 = vmax.f32 %v958_v25, 0.0  ;;  %v1054_v38 = vmax.f32 %v990_v26, 0.0  ;;  %v1923_v25 = vld [vmem:[%s2671_s3 + $0xa8] sm:$0xff]  }
 0x12a   :  { %v1637_v28 = vunpack.c.l.bf16 %v1907_v24  ;;  %v1701_v29 = vunpack.c.l.bf16 %v1923_v25 }
 0x12b   :  { %v1023_v39 = vmax.f32 %v959_v33, 0.0  ;;  %v1055_v40 = vmax.f32 %v991_v34, 0.0 }
 0x12c   :  { %v595_v41 = vpop.f32.mrb[12].mxu0  ;;  %v723_v42 = vpop.f32.mrb[12].mxu1 }
 0x12d   :  { %v1756_v45 = vpack.c.bf16 %v1023_v39, %v1022_v37  ;;  %v1836_v46 = vpack.c.bf16 %v1055_v40, %v1054_v38  ;;  %v596_v47 = vadd.f32 %v2417_v19, %v595_v41  ;;  %v724_v48 = vadd.f32 %v2417_v19, %v723_v42  ;;  %v597_v49 = vpop.f32.mrb[13].mxu0  ;;  %v725_v50 = vpop.f32.mrb[13].mxu1 }
 0x12e   :  { %v598_v51 = vpop.f32.mrb[14].mxu0  ;;  %v726_v52 = vpop.f32.mrb[14].mxu1  ;;  %v1702_v37 = vunpack.c.h.bf16 %v1923_v25 }
 0x12f   :  { %1935 = vst [vmem:[%s2673_s4 + $0x10] sm:$0xff] %v1756_v45   ;;  %1951 = vst [vmem:[%s2673_s4 + $0x90] sm:$0xff] %v1836_v46   ;;  %v960_v53 = vadd.f32 %v1629_v35, %v596_v47  ;;  %v992_v54 = vadd.f32 %v1693_v36, %v724_v48  ;;  %v599_v55 = vadd.f32 %v2417_v19, %v598_v51  ;;  %v600_v57 = vpop.f32.mrb[15].mxu0  ;;  %v728_v58 = vpop.f32.mrb[15].mxu1  ;;  %v1638_v36 = vunpack.c.h.bf16 %v1907_v24 }
 0x130   :  { %v727_v56 = vadd.f32 %v2417_v19, %v726_v52  ;;  %v1908_v52 = vld [vmem:[%s2671_s3 + $0x30] sm:$0xff]  }
 0x131   :  { %v961_v61 = vadd.f32 %v1630_v43, %v599_v55  ;;  %v1024_v1 = vmax.f32 %v960_v53, 0.0  ;;  %v1056_v2 = vmax.f32 %v992_v54, 0.0  ;;  %v1924_v53 = vld [vmem:[%s2671_s3 + $0xb0] sm:$0xff]  }
 0x132   :  { %v993_v62 = vadd.f32 %v1694_v44, %v727_v56  ;;  %v1641_v56 = vunpack.c.l.bf16 %v1908_v52  ;;  %v1705_v57 = vunpack.c.l.bf16 %v1924_v53 }
 0x133   :  { %v1025_v3 = vmax.f32 %v961_v61, 0.0 }
 0x134   :  { %v1057_v4 = vmax.f32 %v993_v62, 0.0  ;;  %v603_v5 = vpop.f32.mrb[16].mxu0  ;;  %v731_v6 = vpop.f32.mrb[16].mxu1 }
 0x135   :  { %v1761_v9 = vpack.c.bf16 %v1025_v3, %v1024_v1  ;;  %v604_v11 = vadd.f32 %v2417_v19, %v603_v5  ;;  %v732_v12 = vadd.f32 %v2417_v19, %v731_v6  ;;  %v605_v13 = vpop.f32.mrb[17].mxu0  ;;  %v733_v14 = vpop.f32.mrb[17].mxu1  ;;  %v1706_v1 = vunpack.c.h.bf16 %v1924_v53 }
 0x136   :  { %v1841_v10 = vpack.c.bf16 %v1057_v4, %v1056_v2  ;;  %v606_v15 = vpop.f32.mrb[18].mxu0  ;;  %v734_v16 = vpop.f32.mrb[18].mxu1 }
 0x137   :  { %1936 = vst [vmem:[%s2673_s4 + $0x18] sm:$0xff] %v1761_v9   ;;  %v962_v17 = vadd.f32 %v1633_v63, %v604_v11  ;;  %v994_v18 = vadd.f32 %v1697_v0, %v732_v12  ;;  %v607_v20 = vadd.f32 %v2417_v19, %v606_v15  ;;  %v735_v21 = vadd.f32 %v2417_v19, %v734_v16  ;;  %v608_v22 = vpop.f32.mrb[19].mxu0  ;;  %v736_v23 = vpop.f32.mrb[19].mxu1  ;;  %v1909_v16 = vld [vmem:[%s2671_s3 + $0x38] sm:$0xff]  }
 0x138   :  { %1952 = vst [vmem:[%s2673_s4 + $0x98] sm:$0xff] %v1841_v10   ;;  %v1642_v0 = vunpack.c.h.bf16 %v1908_v52 }
 0x139   :  { %v963_v26 = vadd.f32 %v1634_v7, %v607_v20  ;;  %v995_v27 = vadd.f32 %v1698_v8, %v735_v21  ;;  %v1026_v30 = vmax.f32 %v962_v17, 0.0  ;;  %v1058_v31 = vmax.f32 %v994_v18, 0.0  ;;  %v1925_v17 = vld [vmem:[%s2671_s3 + $0xb8] sm:$0xff]  }
 0x13a   :  { %v1645_v21 = vunpack.c.l.bf16 %v1909_v16  ;;  %v1709_v22 = vunpack.c.l.bf16 %v1925_v17 }
 0x13b   :  { %v1027_v32 = vmax.f32 %v963_v26, 0.0  ;;  %v1059_v33 = vmax.f32 %v995_v27, 0.0 }
 0x13c   :  { %v611_v34 = vpop.f32.mrb[20].mxu0  ;;  %v739_v35 = vpop.f32.mrb[20].mxu1 }
 0x13d   :  { %v1766_v38 = vpack.c.bf16 %v1027_v32, %v1026_v30  ;;  %v1846_v39 = vpack.c.bf16 %v1059_v33, %v1058_v31  ;;  %v612_v40 = vadd.f32 %v2417_v19, %v611_v34  ;;  %v740_v41 = vadd.f32 %v2417_v19, %v739_v35  ;;  %v613_v42 = vpop.f32.mrb[21].mxu0  ;;  %v741_v43 = vpop.f32.mrb[21].mxu1 }
 0x13e   :  { %v614_v44 = vpop.f32.mrb[22].mxu0  ;;  %v742_v45 = vpop.f32.mrb[22].mxu1  ;;  %v1710_v30 = vunpack.c.h.bf16 %v1925_v17 }
 0x13f   :  { %1937 = vst [vmem:[%s2673_s4 + $0x20] sm:$0xff] %v1766_v38   ;;  %1953 = vst [vmem:[%s2673_s4 + $0xa0] sm:$0xff] %v1846_v39   ;;  %v964_v46 = vadd.f32 %v1637_v28, %v612_v40  ;;  %v996_v47 = vadd.f32 %v1701_v29, %v740_v41  ;;  %v615_v48 = vadd.f32 %v2417_v19, %v614_v44  ;;  %v616_v50 = vpop.f32.mrb[23].mxu0  ;;  %v744_v51 = vpop.f32.mrb[23].mxu1  ;;  %v1646_v29 = vunpack.c.h.bf16 %v1909_v16 }
 0x140   :  { %v743_v49 = vadd.f32 %v2417_v19, %v742_v45  ;;  %v1910_v45 = vld [vmem:[%s2671_s3 + $0x40] sm:$0xff]  }
 0x141   :  { %v965_v54 = vadd.f32 %v1638_v36, %v615_v48  ;;  %v1028_v58 = vmax.f32 %v964_v46, 0.0  ;;  %v1060_v59 = vmax.f32 %v996_v47, 0.0  ;;  %v1926_v46 = vld [vmem:[%s2671_s3 + $0xc0] sm:$0xff]  }
 0x142   :  { %v997_v55 = vadd.f32 %v1702_v37, %v743_v49  ;;  %v1649_v49 = vunpack.c.l.bf16 %v1910_v45  ;;  %v1713_v50 = vunpack.c.l.bf16 %v1926_v46 }
 0x143   :  { %v1029_v60 = vmax.f32 %v965_v54, 0.0 }
 0x144   :  { %v1061_v61 = vmax.f32 %v997_v55, 0.0  ;;  %v619_v62 = vpop.f32.mrb[24].mxu0  ;;  %v747_v63 = vpop.f32.mrb[24].mxu1 }
 0x145   :  { %v1771_v2 = vpack.c.bf16 %v1029_v60, %v1028_v58  ;;  %v620_v4 = vadd.f32 %v2417_v19, %v619_v62  ;;  %v748_v5 = vadd.f32 %v2417_v19, %v747_v63  ;;  %v621_v6 = vpop.f32.mrb[25].mxu0  ;;  %v749_v7 = vpop.f32.mrb[25].mxu1  ;;  %v1714_v58 = vunpack.c.h.bf16 %v1926_v46 }
 0x146   :  { %v1851_v3 = vpack.c.bf16 %v1061_v61, %v1060_v59  ;;  %v622_v8 = vpop.f32.mrb[26].mxu0  ;;  %v750_v9 = vpop.f32.mrb[26].mxu1 }
 0x147   :  { %1938 = vst [vmem:[%s2673_s4 + $0x28] sm:$0xff] %v1771_v2   ;;  %v966_v10 = vadd.f32 %v1641_v56, %v620_v4  ;;  %v998_v11 = vadd.f32 %v1705_v57, %v748_v5  ;;  %v623_v12 = vadd.f32 %v2417_v19, %v622_v8  ;;  %v751_v13 = vadd.f32 %v2417_v19, %v750_v9  ;;  %v624_v14 = vpop.f32.mrb[27].mxu0  ;;  %v752_v15 = vpop.f32.mrb[27].mxu1  ;;  %v1911_v9 = vld [vmem:[%s2671_s3 + $0x48] sm:$0xff]  }
 0x148   :  { %1954 = vst [vmem:[%s2673_s4 + $0xa8] sm:$0xff] %v1851_v3   ;;  %v1650_v57 = vunpack.c.h.bf16 %v1910_v45 }
 0x149   :  { %v967_v18 = vadd.f32 %v1642_v0, %v623_v12  ;;  %v999_v20 = vadd.f32 %v1706_v1, %v751_v13  ;;  %v1030_v23 = vmax.f32 %v966_v10, 0.0  ;;  %v1062_v24 = vmax.f32 %v998_v11, 0.0  ;;  %v1927_v10 = vld [vmem:[%s2671_s3 + $0xc8] sm:$0xff]  }
 0x14a   :  { %v1653_v13 = vunpack.c.l.bf16 %v1911_v9  ;;  %v1717_v14 = vunpack.c.l.bf16 %v1927_v10 }
 0x14b   :  { %v1031_v25 = vmax.f32 %v967_v18, 0.0  ;;  %v1063_v26 = vmax.f32 %v999_v20, 0.0 }
 0x14c   :  { %v627_v27 = vpop.f32.mrb[28].mxu0  ;;  %v755_v28 = vpop.f32.mrb[28].mxu1 }
 0x14d   :  { %v1776_v31 = vpack.c.bf16 %v1031_v25, %v1030_v23  ;;  %v1856_v32 = vpack.c.bf16 %v1063_v26, %v1062_v24  ;;  %v628_v33 = vadd.f32 %v2417_v19, %v627_v27  ;;  %v756_v34 = vadd.f32 %v2417_v19, %v755_v28  ;;  %v629_v35 = vpop.f32.mrb[29].mxu0  ;;  %v757_v36 = vpop.f32.mrb[29].mxu1 }
 0x14e   :  { %v630_v37 = vpop.f32.mrb[30].mxu0  ;;  %v758_v38 = vpop.f32.mrb[30].mxu1  ;;  %v1718_v23 = vunpack.c.h.bf16 %v1927_v10 }
 0x14f   :  { %1939 = vst [vmem:[%s2673_s4 + $0x30] sm:$0xff] %v1776_v31   ;;  %1955 = vst [vmem:[%s2673_s4 + $0xb0] sm:$0xff] %v1856_v32   ;;  %v968_v39 = vadd.f32 %v1645_v21, %v628_v33  ;;  %v1000_v40 = vadd.f32 %v1709_v22, %v756_v34  ;;  %v631_v41 = vadd.f32 %v2417_v19, %v630_v37  ;;  %v632_v43 = vpop.f32.mrb[31].mxu0  ;;  %v760_v44 = vpop.f32.mrb[31].mxu1  ;;  %v1654_v22 = vunpack.c.h.bf16 %v1911_v9 }
 0x150   :  { %v759_v42 = vadd.f32 %v2417_v19, %v758_v38  ;;  %v1912_v38 = vld [vmem:[%s2671_s3 + $0x50] sm:$0xff]  }
 0x151   :  { %v969_v47 = vadd.f32 %v1646_v29, %v631_v41  ;;  %v1032_v51 = vmax.f32 %v968_v39, 0.0  ;;  %v1064_v52 = vmax.f32 %v1000_v40, 0.0  ;;  %v1928_v39 = vld [vmem:[%s2671_s3 + $0xd0] sm:$0xff]  }
 0x152   :  { %v1001_v48 = vadd.f32 %v1710_v30, %v759_v42  ;;  %v1657_v42 = vunpack.c.l.bf16 %v1912_v38  ;;  %v1721_v43 = vunpack.c.l.bf16 %v1928_v39 }
 0x153   :  { %v1033_v53 = vmax.f32 %v969_v47, 0.0 }
 0x154   :  { %v1065_v54 = vmax.f32 %v1001_v48, 0.0  ;;  %v635_v55 = vpop.f32.mrb[32].mxu0  ;;  %v763_v56 = vpop.f32.mrb[32].mxu1 }
 0x155   :  { %v1781_v59 = vpack.c.bf16 %v1033_v53, %v1032_v51  ;;  %v636_v61 = vadd.f32 %v2417_v19, %v635_v55  ;;  %v764_v62 = vadd.f32 %v2417_v19, %v763_v56  ;;  %v637_v63 = vpop.f32.mrb[33].mxu0  ;;  %v765_v0 = vpop.f32.mrb[33].mxu1  ;;  %v1722_v51 = vunpack.c.h.bf16 %v1928_v39 }
 0x156   :  { %v1861_v60 = vpack.c.bf16 %v1065_v54, %v1064_v52  ;;  %v638_v1 = vpop.f32.mrb[34].mxu0  ;;  %v766_v2 = vpop.f32.mrb[34].mxu1 }
 0x157   :  { %1940 = vst [vmem:[%s2673_s4 + $0x38] sm:$0xff] %v1781_v59   ;;  %v970_v3 = vadd.f32 %v1649_v49, %v636_v61  ;;  %v1002_v4 = vadd.f32 %v1713_v50, %v764_v62  ;;  %v639_v5 = vadd.f32 %v2417_v19, %v638_v1  ;;  %v767_v6 = vadd.f32 %v2417_v19, %v766_v2  ;;  %v640_v7 = vpop.f32.mrb[35].mxu0  ;;  %v768_v8 = vpop.f32.mrb[35].mxu1  ;;  %v1913_v2 = vld [vmem:[%s2671_s3 + $0x58] sm:$0xff]  }
 0x158   :  { %1956 = vst [vmem:[%s2673_s4 + $0xb8] sm:$0xff] %v1861_v60   ;;  %v1658_v50 = vunpack.c.h.bf16 %v1912_v38 }
 0x159   :  { %v971_v11 = vadd.f32 %v1650_v57, %v639_v5  ;;  %v1003_v12 = vadd.f32 %v1714_v58, %v767_v6  ;;  %v1034_v15 = vmax.f32 %v970_v3, 0.0  ;;  %v1066_v16 = vmax.f32 %v1002_v4, 0.0  ;;  %v1929_v3 = vld [vmem:[%s2671_s3 + $0xd8] sm:$0xff]  }
 0x15a   :  { %v1661_v6 = vunpack.c.l.bf16 %v1913_v2  ;;  %v1725_v7 = vunpack.c.l.bf16 %v1929_v3 }
 0x15b   :  { %v1035_v17 = vmax.f32 %v971_v11, 0.0  ;;  %v1067_v18 = vmax.f32 %v1003_v12, 0.0 }
 0x15c   :  { %v643_v20 = vpop.f32.mrb[36].mxu0  ;;  %v771_v21 = vpop.f32.mrb[36].mxu1 }
 0x15d   :  { %v1786_v24 = vpack.c.bf16 %v1035_v17, %v1034_v15  ;;  %v1866_v25 = vpack.c.bf16 %v1067_v18, %v1066_v16  ;;  %v644_v26 = vadd.f32 %v2417_v19, %v643_v20  ;;  %v772_v27 = vadd.f32 %v2417_v19, %v771_v21  ;;  %v645_v28 = vpop.f32.mrb[37].mxu0  ;;  %v773_v29 = vpop.f32.mrb[37].mxu1 }
 0x15e   :  { %v646_v30 = vpop.f32.mrb[38].mxu0  ;;  %v774_v31 = vpop.f32.mrb[38].mxu1  ;;  %v1726_v15 = vunpack.c.h.bf16 %v1929_v3 }
 0x15f   :  { %1941 = vst [vmem:[%s2673_s4 + $0x40] sm:$0xff] %v1786_v24   ;;  %1957 = vst [vmem:[%s2673_s4 + $0xc0] sm:$0xff] %v1866_v25   ;;  %v972_v32 = vadd.f32 %v1653_v13, %v644_v26  ;;  %v1004_v33 = vadd.f32 %v1717_v14, %v772_v27  ;;  %v647_v34 = vadd.f32 %v2417_v19, %v646_v30  ;;  %v648_v36 = vpop.f32.mrb[39].mxu0  ;;  %v776_v37 = vpop.f32.mrb[39].mxu1  ;;  %v1662_v14 = vunpack.c.h.bf16 %v1913_v2 }
 0x160   :  { %v775_v35 = vadd.f32 %v2417_v19, %v774_v31  ;;  %v1914_v31 = vld [vmem:[%s2671_s3 + $0x60] sm:$0xff]  }
 0x161   :  { %v973_v40 = vadd.f32 %v1654_v22, %v647_v34  ;;  %v1036_v44 = vmax.f32 %v972_v32, 0.0  ;;  %v1068_v45 = vmax.f32 %v1004_v33, 0.0  ;;  %v1930_v32 = vld [vmem:[%s2671_s3 + $0xe0] sm:$0xff]  }
 0x162   :  { %v1005_v41 = vadd.f32 %v1718_v23, %v775_v35  ;;  %v1665_v35 = vunpack.c.l.bf16 %v1914_v31  ;;  %v1729_v36 = vunpack.c.l.bf16 %v1930_v32 }
 0x163   :  { %v1037_v46 = vmax.f32 %v973_v40, 0.0 }
 0x164   :  { %v1069_v47 = vmax.f32 %v1005_v41, 0.0  ;;  %v651_v48 = vpop.f32.mrb[40].mxu0  ;;  %v779_v49 = vpop.f32.mrb[40].mxu1 }
 0x165   :  { %v1791_v52 = vpack.c.bf16 %v1037_v46, %v1036_v44  ;;  %v652_v54 = vadd.f32 %v2417_v19, %v651_v48  ;;  %v780_v55 = vadd.f32 %v2417_v19, %v779_v49  ;;  %v653_v56 = vpop.f32.mrb[41].mxu0  ;;  %v781_v57 = vpop.f32.mrb[41].mxu1  ;;  %v1730_v44 = vunpack.c.h.bf16 %v1930_v32 }
 0x166   :  { %v1871_v53 = vpack.c.bf16 %v1069_v47, %v1068_v45  ;;  %v654_v58 = vpop.f32.mrb[42].mxu0  ;;  %v782_v59 = vpop.f32.mrb[42].mxu1 }
 0x167   :  { %1942 = vst [vmem:[%s2673_s4 + $0x48] sm:$0xff] %v1791_v52   ;;  %v974_v60 = vadd.f32 %v1657_v42, %v652_v54  ;;  %v1006_v61 = vadd.f32 %v1721_v43, %v780_v55  ;;  %v655_v62 = vadd.f32 %v2417_v19, %v654_v58  ;;  %v783_v63 = vadd.f32 %v2417_v19, %v782_v59  ;;  %v656_v0 = vpop.f32.mrb[43].mxu0  ;;  %v784_v1 = vpop.f32.mrb[43].mxu1  ;;  %v1915_v59 = vld [vmem:[%s2671_s3 + $0x68] sm:$0xff]  }
 0x168   :  { %1958 = vst [vmem:[%s2673_s4 + $0xc8] sm:$0xff] %v1871_v53   ;;  %v1666_v43 = vunpack.c.h.bf16 %v1914_v31 }
 0x169   :  { %v975_v4 = vadd.f32 %v1658_v50, %v655_v62  ;;  %v1007_v5 = vadd.f32 %v1722_v51, %v783_v63  ;;  %v1038_v8 = vmax.f32 %v974_v60, 0.0  ;;  %v1070_v9 = vmax.f32 %v1006_v61, 0.0  ;;  %v1931_v60 = vld [vmem:[%s2671_s3 + $0xe8] sm:$0xff]  }
 0x16a   :  { %v1669_v63 = vunpack.c.l.bf16 %v1915_v59  ;;  %v1733_v0 = vunpack.c.l.bf16 %v1931_v60 }
 0x16b   :  { %v1039_v10 = vmax.f32 %v975_v4, 0.0  ;;  %v1071_v11 = vmax.f32 %v1007_v5, 0.0 }
 0x16c   :  { %v659_v12 = vpop.f32.mrb[44].mxu0  ;;  %v787_v13 = vpop.f32.mrb[44].mxu1 }
 0x16d   :  { %v1796_v16 = vpack.c.bf16 %v1039_v10, %v1038_v8  ;;  %v1876_v17 = vpack.c.bf16 %v1071_v11, %v1070_v9  ;;  %v660_v18 = vadd.f32 %v2417_v19, %v659_v12  ;;  %v788_v20 = vadd.f32 %v2417_v19, %v787_v13  ;;  %v661_v21 = vpop.f32.mrb[45].mxu0  ;;  %v789_v22 = vpop.f32.mrb[45].mxu1 }
 0x16e   :  { %v662_v23 = vpop.f32.mrb[46].mxu0  ;;  %v790_v24 = vpop.f32.mrb[46].mxu1  ;;  %v1734_v8 = vunpack.c.h.bf16 %v1931_v60 }
 0x16f   :  { %1943 = vst [vmem:[%s2673_s4 + $0x50] sm:$0xff] %v1796_v16   ;;  %1959 = vst [vmem:[%s2673_s4 + $0xd0] sm:$0xff] %v1876_v17   ;;  %v976_v25 = vadd.f32 %v1661_v6, %v660_v18  ;;  %v1008_v26 = vadd.f32 %v1725_v7, %v788_v20  ;;  %v663_v27 = vadd.f32 %v2417_v19, %v662_v23  ;;  %v664_v29 = vpop.f32.mrb[47].mxu0  ;;  %v792_v30 = vpop.f32.mrb[47].mxu1  ;;  %v1670_v7 = vunpack.c.h.bf16 %v1915_v59 }
 0x170   :  { %v791_v28 = vadd.f32 %v2417_v19, %v790_v24  ;;  %v1916_v24 = vld [vmem:[%s2671_s3 + $0x70] sm:$0xff]  }
 0x171   :  { %v977_v33 = vadd.f32 %v1662_v14, %v663_v27  ;;  %v1040_v37 = vmax.f32 %v976_v25, 0.0  ;;  %v1072_v38 = vmax.f32 %v1008_v26, 0.0  ;;  %v1932_v25 = vld [vmem:[%s2671_s3 + $0xf0] sm:$0xff]  }
 0x172   :  { %v1009_v34 = vadd.f32 %v1726_v15, %v791_v28  ;;  %v1673_v28 = vunpack.c.l.bf16 %v1916_v24  ;;  %v1737_v29 = vunpack.c.l.bf16 %v1932_v25 }
 0x173   :  { %v1041_v39 = vmax.f32 %v977_v33, 0.0 }
 0x174   :  { %v1073_v40 = vmax.f32 %v1009_v34, 0.0  ;;  %v667_v41 = vpop.f32.mrb[48].mxu0  ;;  %v795_v42 = vpop.f32.mrb[48].mxu1 }
 0x175   :  { %v1801_v45 = vpack.c.bf16 %v1041_v39, %v1040_v37  ;;  %v668_v47 = vadd.f32 %v2417_v19, %v667_v41  ;;  %v796_v48 = vadd.f32 %v2417_v19, %v795_v42  ;;  %v669_v49 = vpop.f32.mrb[49].mxu0  ;;  %v797_v50 = vpop.f32.mrb[49].mxu1  ;;  %v1738_v37 = vunpack.c.h.bf16 %v1932_v25 }
 0x176   :  { %v1881_v46 = vpack.c.bf16 %v1073_v40, %v1072_v38  ;;  %v670_v51 = vpop.f32.mrb[50].mxu0  ;;  %v798_v52 = vpop.f32.mrb[50].mxu1 }
 0x177   :  { %1944 = vst [vmem:[%s2673_s4 + $0x58] sm:$0xff] %v1801_v45   ;;  %v978_v53 = vadd.f32 %v1665_v35, %v668_v47  ;;  %v1010_v54 = vadd.f32 %v1729_v36, %v796_v48  ;;  %v671_v55 = vadd.f32 %v2417_v19, %v670_v51  ;;  %v799_v56 = vadd.f32 %v2417_v19, %v798_v52  ;;  %v672_v57 = vpop.f32.mrb[51].mxu0  ;;  %v800_v58 = vpop.f32.mrb[51].mxu1  ;;  %v1917_v52 = vld [vmem:[%s2671_s3 + $0x78] sm:$0xff]  }
 0x178   :  { %1960 = vst [vmem:[%s2673_s4 + $0xd8] sm:$0xff] %v1881_v46   ;;  %v1674_v36 = vunpack.c.h.bf16 %v1916_v24 }
 0x179   :  { %v979_v61 = vadd.f32 %v1666_v43, %v671_v55  ;;  %v1011_v62 = vadd.f32 %v1730_v44, %v799_v56  ;;  %v1042_v1 = vmax.f32 %v978_v53, 0.0  ;;  %v1074_v2 = vmax.f32 %v1010_v54, 0.0  ;;  %v1933_v53 = vld [vmem:[%s2671_s3 + $0xf8] sm:$0xff]  }
 0x17a   :  { %v1677_v56 = vunpack.c.l.bf16 %v1917_v52  ;;  %v1741_v57 = vunpack.c.l.bf16 %v1933_v53 }
 0x17b   :  { %v1043_v3 = vmax.f32 %v979_v61, 0.0  ;;  %v1075_v4 = vmax.f32 %v1011_v62, 0.0 }
 0x17c   :  { %v675_v5 = vpop.f32.mrb[52].mxu0  ;;  %v803_v6 = vpop.f32.mrb[52].mxu1 }
 0x17d   :  { %v1806_v9 = vpack.c.bf16 %v1043_v3, %v1042_v1  ;;  %v1886_v10 = vpack.c.bf16 %v1075_v4, %v1074_v2  ;;  %v676_v11 = vadd.f32 %v2417_v19, %v675_v5  ;;  %v804_v12 = vadd.f32 %v2417_v19, %v803_v6  ;;  %v677_v13 = vpop.f32.mrb[53].mxu0  ;;  %v805_v14 = vpop.f32.mrb[53].mxu1 }
 0x17e   :  { %v678_v15 = vpop.f32.mrb[54].mxu0  ;;  %v806_v16 = vpop.f32.mrb[54].mxu1  ;;  %v1742_v1 = vunpack.c.h.bf16 %v1933_v53 }
 0x17f   :  { %1945 = vst [vmem:[%s2673_s4 + $0x60] sm:$0xff] %v1806_v9   ;;  %1961 = vst [vmem:[%s2673_s4 + $0xe0] sm:$0xff] %v1886_v10   ;;  %v980_v17 = vadd.f32 %v1669_v63, %v676_v11  ;;  %v1012_v18 = vadd.f32 %v1733_v0, %v804_v12  ;;  %v679_v20 = vadd.f32 %v2417_v19, %v678_v15  ;;  %v680_v22 = vpop.f32.mrb[55].mxu0  ;;  %v808_v23 = vpop.f32.mrb[55].mxu1  ;;  %v1678_v0 = vunpack.c.h.bf16 %v1917_v52 }
 0x180   :  { %v807_v21 = vadd.f32 %v2417_v19, %v806_v16 }
 0x181   :  { %v981_v26 = vadd.f32 %v1670_v7, %v679_v20  ;;  %v1044_v30 = vmax.f32 %v980_v17, 0.0  ;;  %v1076_v31 = vmax.f32 %v1012_v18, 0.0 }
 0x182   :  { %v1013_v27 = vadd.f32 %v1734_v8, %v807_v21 }
 0x183   :  { %v1045_v32 = vmax.f32 %v981_v26, 0.0 }
 0x184   :  { %v1077_v33 = vmax.f32 %v1013_v27, 0.0  ;;  %v683_v34 = vpop.f32.mrb[56].mxu0  ;;  %v811_v35 = vpop.f32.mrb[56].mxu1 }
 0x185   :  { %v1811_v38 = vpack.c.bf16 %v1045_v32, %v1044_v30  ;;  %v684_v40 = vadd.f32 %v2417_v19, %v683_v34  ;;  %v812_v41 = vadd.f32 %v2417_v19, %v811_v35  ;;  %v685_v42 = vpop.f32.mrb[57].mxu0  ;;  %v813_v43 = vpop.f32.mrb[57].mxu1 }
 0x186   :  { %v1891_v39 = vpack.c.bf16 %v1077_v33, %v1076_v31  ;;  %v686_v44 = vpop.f32.mrb[58].mxu0  ;;  %v814_v45 = vpop.f32.mrb[58].mxu1 }
 0x187   :  { %1946 = vst [vmem:[%s2673_s4 + $0x68] sm:$0xff] %v1811_v38   ;;  %v982_v46 = vadd.f32 %v1673_v28, %v684_v40  ;;  %v1014_v47 = vadd.f32 %v1737_v29, %v812_v41  ;;  %v687_v48 = vadd.f32 %v2417_v19, %v686_v44  ;;  %v815_v49 = vadd.f32 %v2417_v19, %v814_v45  ;;  %v688_v50 = vpop.f32.mrb[59].mxu0  ;;  %v816_v51 = vpop.f32.mrb[59].mxu1 }
 0x188   :  { %1962 = vst [vmem:[%s2673_s4 + $0xe8] sm:$0xff] %v1891_v39  }
 0x189   :  { %v983_v54 = vadd.f32 %v1674_v36, %v687_v48  ;;  %v1015_v55 = vadd.f32 %v1738_v37, %v815_v49  ;;  %v1046_v58 = vmax.f32 %v982_v46, 0.0  ;;  %v1078_v59 = vmax.f32 %v1014_v47, 0.0 }
 0x18b   :  { %v1047_v60 = vmax.f32 %v983_v54, 0.0  ;;  %v1079_v61 = vmax.f32 %v1015_v55, 0.0 }
 0x18c   :  { %v691_v62 = vpop.f32.mrb[60].mxu0  ;;  %v819_v63 = vpop.f32.mrb[60].mxu1 }
 0x18d   :  { %v1816_v2 = vpack.c.bf16 %v1047_v60, %v1046_v58  ;;  %v1896_v3 = vpack.c.bf16 %v1079_v61, %v1078_v59  ;;  %v692_v4 = vadd.f32 %v2417_v19, %v691_v62  ;;  %v820_v5 = vadd.f32 %v2417_v19, %v819_v63  ;;  %v693_v6 = vpop.f32.mrb[61].mxu0  ;;  %v821_v7 = vpop.f32.mrb[61].mxu1 }
 0x18e   :  { %v694_v8 = vpop.f32.mrb[62].mxu0  ;;  %v822_v9 = vpop.f32.mrb[62].mxu1 }
 0x18f   :  { %1947 = vst [vmem:[%s2673_s4 + $0x70] sm:$0xff] %v1816_v2   ;;  %1963 = vst [vmem:[%s2673_s4 + $0xf0] sm:$0xff] %v1896_v3   ;;  %v984_v10 = vadd.f32 %v1677_v56, %v692_v4  ;;  %v1016_v11 = vadd.f32 %v1741_v57, %v820_v5  ;;  %v695_v12 = vadd.f32 %v2417_v19, %v694_v8  ;;  %v696_v14 = vpop.f32.mrb[63].mxu0  ;;  %v824_v15 = vpop.f32.mrb[63].mxu1 }
 0x190   :  { %v823_v13 = vadd.f32 %v2417_v19, %v822_v9 }
 0x191   :  { %v985_v16 = vadd.f32 %v1678_v0, %v695_v12  ;;  %v1048_v18 = vmax.f32 %v984_v10, 0.0  ;;  %v1080_v20 = vmax.f32 %v1016_v11, 0.0 }
 0x192   :  { %v1017_v17 = vadd.f32 %v1742_v1, %v823_v13 }
 0x193   :  { %v1049_v21 = vmax.f32 %v985_v16, 0.0 }
 0x194   :  { %v1081_v22 = vmax.f32 %v1017_v17, 0.0 }
 0x195   :  { %v1821_v23 = vpack.c.bf16 %v1049_v21, %v1048_v18 }
 0x196   :  { %v1901_v24 = vpack.c.bf16 %v1081_v22, %v1080_v20 }
 0x197   :  { %1948 = vst [vmem:[%s2673_s4 + $0x78] sm:$0xff] %v1821_v23  }
 0x198   :  { %1964 = vst [vmem:[%s2673_s4 + $0xf8] sm:$0xff] %v1901_v24  }

// kernel: resnet_forward.10
= control target key start
LH: loop header
LB: loop body
LE: loop exit
PB: predicated region body
PF: predicated region fallthrough
CT: control target
= control target key end

     0   :  { %s836_s1 = inlined_call_operand.vmem [shape: bf16[256,128], index: 1, kind: input, shape index: {}]   ;;  %s837_s0 = inlined_call_operand.vmem [shape: bf16[128,256], index: 0, kind: input, shape index: {}]   ;;  %s838_s2 = inlined_call_operand.vmem [shape: f32[1,128], index: 2, kind: input, shape index: {}]   ;;  %s839_s3 = inlined_call_operand.vmem [shape: bf16[128,128], index: 3, kind: output, shape index: {}]  }
   0x1   :  { %v635_v0 = vld [vmem:[%s836_s1 + $0x40] sm:$0xff]   ;;  %v637_v2 = vld [vmem:[%s836_s1 + $0x48] sm:$0xff]   ;;  %v639_v4 = vld [vmem:[%s836_s1 + $0x50] sm:$0xff]  }
   0x2   :  { %v636_v1 = vld [vmem:[%s836_s1] sm:$0xff]   ;;  %555 = vmatprep.subr.bf16.mxu0 %v635_v0  ;;  %619 = vmatprep.subr.bf16.mxu1 %v635_v0  ;;  %v638_v3 = vld [vmem:[%s836_s1 + $0x8] sm:$0xff]   ;;  %v640_v5 = vld [vmem:[%s836_s1 + $0x10] sm:$0xff]  }
   0x3   :  { %556 = vmatpush3.bf16.msra.mxu0 %v636_v1  ;;  %627 = vmatpush3.bf16.msra.mxu1 %v636_v1  ;;  %v641_v6 = vld [vmem:[%s836_s1 + $0x58] sm:$0xff]   ;;  %v643_v8 = vld [vmem:[%s836_s1 + $0x60] sm:$0xff]   ;;  %v645_v10 = vld [vmem:[%s836_s1 + $0x68] sm:$0xff]  }
   0x4   :  { %557 = vmatprep.subr.bf16.mxu0 %v637_v2  ;;  %620 = vmatprep.subr.bf16.mxu1 %v637_v2  ;;  %v642_v7 = vld [vmem:[%s836_s1 + $0x18] sm:$0xff]   ;;  %v644_v9 = vld [vmem:[%s836_s1 + $0x20] sm:$0xff]   ;;  %v646_v13 = vld [vmem:[%s836_s1 + $0x28] sm:$0xff]  }
   0x5   :  { %v653_v11 = vld [vmem:[%s837_s0 + $0x4] ss:$8 sps:$4 sm:$0xff]   ;;  %v647_v14 = vld [vmem:[%s836_s1 + $0x70] sm:$0xff]   ;;  %v649_v16 = vld [vmem:[%s836_s1 + $0x78] sm:$0xff]  }
   0x6   :  { %v656_v12 = vld [vmem:[%s837_s0 + $0x44] ss:$8 sps:$4 sm:$0xff]   ;;  %278 = vmatprep.mubr.bf16.mxu0 %v653_v11  ;;  %v648_v15 = vld [vmem:[%s836_s1 + $0x30] sm:$0xff]   ;;  %v650_v17 = vld [vmem:[%s836_s1 + $0x38] sm:$0xff]  }
   0x7   :  { %558 = vmatpush3.bf16.msra.mxu0 %v638_v3  ;;  %628 = vmatpush3.bf16.msra.mxu1 %v638_v3  ;;  %v651_v18 = vld [vmem:[%s837_s0] ss:$8 sps:$4 sm:$0xff]   ;;  %v657_v20 = vld [vmem:[%s837_s0 + $0x14] ss:$8 sps:$4 sm:$0xff]   ;;  %v661_v22 = vld [vmem:[%s837_s0 + $0x10] ss:$8 sps:$4 sm:$0xff]  }
   0x8   :  { %559 = vmatprep.subr.bf16.mxu0 %v639_v4  ;;  %621 = vmatprep.subr.bf16.mxu1 %v639_v4  ;;  %v654_v19 = vld [vmem:[%s837_s0 + $0x40] ss:$8 sps:$4 sm:$0xff]   ;;  %v659_v21 = vld [vmem:[%s837_s0 + $0x54] ss:$8 sps:$4 sm:$0xff]   ;;  %v662_v23 = vld [vmem:[%s837_s0 + $0x50] ss:$8 sps:$4 sm:$0xff]  }
   0x9   :  { %310 = vmatprep.mubr.bf16.mxu1 %v656_v12  ;;  %v663_v24 = vld [vmem:[%s837_s0 + $0x24] ss:$8 sps:$4 sm:$0xff]   ;;  %v667_v26 = vld [vmem:[%s837_s0 + $0x20] ss:$8 sps:$4 sm:$0xff]   ;;  %v669_v28 = vld [vmem:[%s837_s0 + $0x34] ss:$8 sps:$4 sm:$0xff]  }
   0xa   :  { %v665_v25 = vld [vmem:[%s837_s0 + $0x64] ss:$8 sps:$4 sm:$0xff]   ;;  %v668_v27 = vld [vmem:[%s837_s0 + $0x60] ss:$8 sps:$4 sm:$0xff]   ;;  %v671_v29 = vld [vmem:[%s837_s0 + $0x74] ss:$8 sps:$4 sm:$0xff]  }
   0xb   :  { %560 = vmatpush3.bf16.msra.mxu0 %v640_v5  ;;  %629 = vmatpush3.bf16.msra.mxu1 %v640_v5  ;;  %v673_v30 = vld [vmem:[%s837_s0 + $0x30] ss:$8 sps:$4 sm:$0xff]   ;;  %v794_v34 = vld [vmem:[%s838_s2] ss:$0 sm:$0xff] }
   0xc   :  { %561 = vmatprep.subr.bf16.mxu0 %v641_v6  ;;  %622 = vmatprep.subr.bf16.mxu1 %v641_v6  ;;  %v674_v31 = vld [vmem:[%s837_s0 + $0x70] ss:$8 sps:$4 sm:$0xff]  }
   0xf   :  { %562 = vmatpush3.bf16.msra.mxu0 %v642_v7  ;;  %630 = vmatpush3.bf16.msra.mxu1 %v642_v7 }
  0x10   :  { %563 = vmatprep.subr.bf16.mxu0 %v643_v8  ;;  %623 = vmatprep.subr.bf16.mxu1 %v643_v8 }
  0x13   :  { %564 = vmatpush3.bf16.msra.mxu0 %v644_v9  ;;  %631 = vmatpush3.bf16.msra.mxu1 %v644_v9 }
  0x14   :  { %565 = vmatprep.subr.bf16.mxu0 %v645_v10  ;;  %624 = vmatprep.subr.bf16.mxu1 %v645_v10 }
  0x17   :  { %566 = vmatpush3.bf16.msra.mxu0 %v646_v13  ;;  %632 = vmatpush3.bf16.msra.mxu1 %v646_v13 }
  0x18   :  { %567 = vmatprep.subr.bf16.mxu0 %v647_v14  ;;  %625 = vmatprep.subr.bf16.mxu1 %v647_v14 }
  0x1b   :  { %568 = vmatpush3.bf16.msra.mxu0 %v648_v15  ;;  %633 = vmatpush3.bf16.msra.mxu1 %v648_v15 }
  0x1c   :  { %569 = vmatprep.subr.bf16.mxu0 %v649_v16  ;;  %626 = vmatprep.subr.bf16.mxu1 %v649_v16 }
  0x1f   :  { %570 = vmatpush3.bf16.msra.mxu0 %v650_v17  ;;  %634 = vmatpush3.bf16.msra.mxu1 %v650_v17 }
  0x22   :  { %279 = vmatmul.mubr.bf16.vlgmr.msra.gmra.mrb[0].mxu0 %v651_v18  ;;  %311 = vmatmul.mubr.bf16.vlgmr.msra.gmra.mrb[0].mxu1 %v654_v19 }
  0x23   :  { %286 = vmatprep.mubr.bf16.mxu0 %v657_v20  ;;  %318 = vmatprep.mubr.bf16.mxu1 %v659_v21 }
  0x2a   :  { %287 = vmatmul.mubr.bf16.gmra.mrb[4].mxu0 %v661_v22  ;;  %319 = vmatmul.mubr.bf16.gmra.mrb[4].mxu1 %v662_v23 }
  0x2b   :  { %294 = vmatprep.mubr.bf16.mxu0 %v663_v24  ;;  %326 = vmatprep.mubr.bf16.mxu1 %v665_v25 }
  0x32   :  { %295 = vmatmul.mubr.bf16.gmra.mrb[8].mxu0 %v667_v26  ;;  %327 = vmatmul.mubr.bf16.gmra.mrb[8].mxu1 %v668_v27 }
  0x33   :  { %302 = vmatprep.mubr.bf16.mxu0 %v669_v28  ;;  %334 = vmatprep.mubr.bf16.mxu1 %v671_v29 }
  0x3a   :  { %303 = vmatmul.mubr.bf16.gmra.mrb[12].mxu0 %v673_v30  ;;  %335 = vmatmul.mubr.bf16.gmra.mrb[12].mxu1 %v674_v31 }
  0xf5   :  { %v571_v32 = vpop.f32.mrb[0].mxu0  ;;  %v595_v33 = vpop.f32.mrb[0].mxu1 }
  0xf6   :  { %v572_v35 = vpop.f32.mrb[1].mxu0  ;;  %v596_v36 = vpop.f32.mrb[1].mxu1 }
  0xf7   :  { %v573_v37 = vadd.f32 %v572_v35, %v571_v32  ;;  %v597_v38 = vadd.f32 %v596_v36, %v595_v33  ;;  %v574_v39 = vpop.f32.mrb[2].mxu0  ;;  %v598_v40 = vpop.f32.mrb[2].mxu1 }
  0xf8   :  { %v575_v41 = vpop.f32.mrb[3].mxu0  ;;  %v599_v42 = vpop.f32.mrb[3].mxu1 }
  0xf9   :  { %v281_v43 = vadd.f32 %v573_v37, %v794_v34  ;;  %v313_v44 = vadd.f32 %v597_v38, %v794_v34  ;;  %v576_v45 = vadd.f32 %v575_v41, %v574_v39  ;;  %v600_v46 = vadd.f32 %v599_v42, %v598_v40 }
  0xfb   :  { %v284_v47 = vadd.f32 %v576_v45, %v794_v34  ;;  %v316_v48 = vadd.f32 %v600_v46, %v794_v34  ;;  %v343_v49 = vmax.f32 %v281_v43, 0.0  ;;  %v351_v50 = vmax.f32 %v313_v44, 0.0 }
  0xfd   :  { %v344_v51 = vmax.f32 %v284_v47, 0.0  ;;  %v352_v52 = vmax.f32 %v316_v48, 0.0  ;;  %v577_v53 = vpop.f32.mrb[4].mxu0  ;;  %v601_v54 = vpop.f32.mrb[4].mxu1 }
  0xfe   :  { %v578_v55 = vpop.f32.mrb[5].mxu0  ;;  %v602_v56 = vpop.f32.mrb[5].mxu1 }
  0xff   :  { %v511_v57 = vpack.c.bf16 %v344_v51, %v343_v49  ;;  %v531_v58 = vpack.c.bf16 %v352_v52, %v351_v50  ;;  %v579_v59 = vadd.f32 %v578_v55, %v577_v53  ;;  %v603_v60 = vadd.f32 %v602_v56, %v601_v54  ;;  %v580_v61 = vpop.f32.mrb[6].mxu0  ;;  %v604_v62 = vpop.f32.mrb[6].mxu1 }
 0x100   :  { %v581_v63 = vpop.f32.mrb[7].mxu0  ;;  %v605_v0 = vpop.f32.mrb[7].mxu1 }
 0x101   :  { %512 = vst [vmem:[%s839_s3] sm:$0xff] %v511_v57   ;;  %551 = vst [vmem:[%s839_s3 + $0x20] sm:$0xff] %v531_v58   ;;  %v289_v1 = vadd.f32 %v579_v59, %v794_v34  ;;  %v321_v2 = vadd.f32 %v603_v60, %v794_v34  ;;  %v582_v3 = vadd.f32 %v581_v63, %v580_v61 }
 0x102   :  { %v606_v4 = vadd.f32 %v605_v0, %v604_v62 }
 0x103   :  { %v292_v5 = vadd.f32 %v582_v3, %v794_v34  ;;  %v345_v7 = vmax.f32 %v289_v1, 0.0  ;;  %v353_v8 = vmax.f32 %v321_v2, 0.0 }
 0x104   :  { %v324_v6 = vadd.f32 %v606_v4, %v794_v34 }
 0x105   :  { %v346_v9 = vmax.f32 %v292_v5, 0.0  ;;  %v583_v11 = vpop.f32.mrb[8].mxu0  ;;  %v607_v12 = vpop.f32.mrb[8].mxu1 }
 0x106   :  { %v354_v10 = vmax.f32 %v324_v6, 0.0  ;;  %v584_v13 = vpop.f32.mrb[9].mxu0  ;;  %v608_v14 = vpop.f32.mrb[9].mxu1 }
 0x107   :  { %v516_v15 = vpack.c.bf16 %v346_v9, %v345_v7  ;;  %v585_v17 = vadd.f32 %v584_v13, %v583_v11  ;;  %v609_v18 = vadd.f32 %v608_v14, %v607_v12  ;;  %v586_v19 = vpop.f32.mrb[10].mxu0  ;;  %v610_v20 = vpop.f32.mrb[10].mxu1 }
 0x108   :  { %v536_v16 = vpack.c.bf16 %v354_v10, %v353_v8  ;;  %v587_v21 = vpop.f32.mrb[11].mxu0  ;;  %v611_v22 = vpop.f32.mrb[11].mxu1 }
 0x109   :  { %548 = vst [vmem:[%s839_s3 + $0x8] sm:$0xff] %v516_v15   ;;  %v297_v23 = vadd.f32 %v585_v17, %v794_v34  ;;  %v329_v24 = vadd.f32 %v609_v18, %v794_v34  ;;  %v588_v25 = vadd.f32 %v587_v21, %v586_v19  ;;  %v612_v26 = vadd.f32 %v611_v22, %v610_v20 }
 0x10a   :  { %552 = vst [vmem:[%s839_s3 + $0x28] sm:$0xff] %v536_v16  }
 0x10b   :  { %v300_v27 = vadd.f32 %v588_v25, %v794_v34  ;;  %v332_v28 = vadd.f32 %v612_v26, %v794_v34  ;;  %v347_v29 = vmax.f32 %v297_v23, 0.0  ;;  %v355_v30 = vmax.f32 %v329_v24, 0.0 }
 0x10d   :  { %v348_v31 = vmax.f32 %v300_v27, 0.0  ;;  %v356_v32 = vmax.f32 %v332_v28, 0.0  ;;  %v589_v33 = vpop.f32.mrb[12].mxu0  ;;  %v613_v35 = vpop.f32.mrb[12].mxu1 }
 0x10e   :  { %v590_v36 = vpop.f32.mrb[13].mxu0  ;;  %v614_v37 = vpop.f32.mrb[13].mxu1 }
 0x10f   :  { %v521_v38 = vpack.c.bf16 %v348_v31, %v347_v29  ;;  %v541_v39 = vpack.c.bf16 %v356_v32, %v355_v30  ;;  %v591_v40 = vadd.f32 %v590_v36, %v589_v33  ;;  %v615_v41 = vadd.f32 %v614_v37, %v613_v35  ;;  %v592_v42 = vpop.f32.mrb[14].mxu0  ;;  %v616_v43 = vpop.f32.mrb[14].mxu1 }
 0x110   :  { %v593_v44 = vpop.f32.mrb[15].mxu0  ;;  %v617_v45 = vpop.f32.mrb[15].mxu1 }
 0x111   :  { %549 = vst [vmem:[%s839_s3 + $0x10] sm:$0xff] %v521_v38   ;;  %553 = vst [vmem:[%s839_s3 + $0x30] sm:$0xff] %v541_v39   ;;  %v305_v46 = vadd.f32 %v591_v40, %v794_v34  ;;  %v337_v47 = vadd.f32 %v615_v41, %v794_v34  ;;  %v594_v48 = vadd.f32 %v593_v44, %v592_v42 }
 0x112   :  { %v618_v49 = vadd.f32 %v617_v45, %v616_v43 }
 0x113   :  { %v308_v50 = vadd.f32 %v594_v48, %v794_v34  ;;  %v349_v52 = vmax.f32 %v305_v46, 0.0  ;;  %v357_v53 = vmax.f32 %v337_v47, 0.0 }
 0x114   :  { %v340_v51 = vadd.f32 %v618_v49, %v794_v34 }
 0x115   :  { %v350_v54 = vmax.f32 %v308_v50, 0.0 }
 0x116   :  { %v358_v55 = vmax.f32 %v340_v51, 0.0 }
 0x117   :  { %v526_v56 = vpack.c.bf16 %v350_v54, %v349_v52 }
 0x118   :  { %v546_v57 = vpack.c.bf16 %v358_v55, %v357_v53 }
 0x119   :  { %550 = vst [vmem:[%s839_s3 + $0x18] sm:$0xff] %v526_v56  }
 0x11a   :  { %554 = vst [vmem:[%s839_s3 + $0x38] sm:$0xff] %v546_v57  }

// kernel: resnet_forward.11
= control target key start
LH: loop header
LB: loop body
LE: loop exit
PB: predicated region body
PF: predicated region fallthrough
CT: control target
= control target key end

     0   :  { %s1643_s1 = inlined_call_operand.vmem [shape: bf16[384,128], index: 1, kind: input, shape index: {}]   ;;  %s1644_s0 = inlined_call_operand.vmem [shape: bf16[128,384], index: 0, kind: input, shape index: {}]   ;;  %s1645_s4 = inlined_call_operand.vmem [shape: bf16[128,128], index: 4, kind: input, shape index: {}]   ;;  %s1646_s3 = inlined_call_operand.vmem [shape: bf16[128,128], index: 3, kind: input, shape index: {}]   ;;  %s1647_s2 = inlined_call_operand.vmem [shape: f32[1,128], index: 2, kind: input, shape index: {}]   ;;  %s1648_s5 = inlined_call_operand.vmem [shape: f32[1,128], index: 5, kind: input, shape index: {}]   ;;  %s1649_s6 = inlined_call_operand.vmem [shape: bf16[128,128], index: 6, kind: output, shape index: {}]  }
   0x1   :  { %v1278_v0 = vld [vmem:[%s1643_s1 + $0x40] sm:$0xff]   ;;  %v1281_v3 = vld [vmem:[%s1643_s1 + $0x48] sm:$0xff]   ;;  %v1284_v6 = vld [vmem:[%s1643_s1 + $0x50] sm:$0xff]  }
   0x2   :  { %v1279_v1 = vld [vmem:[%s1643_s1 + $0x80] sm:$0xff]   ;;  %1086 = vmatprep.subr.bf16.mxu0 %v1278_v0  ;;  %v1282_v4 = vld [vmem:[%s1643_s1 + $0x88] sm:$0xff]   ;;  %v1285_v7 = vld [vmem:[%s1643_s1 + $0x90] sm:$0xff]  }
   0x3   :  { %v1280_v2 = vld [vmem:[%s1643_s1] sm:$0xff]   ;;  %1182 = vmatprep.subr.bf16.mxu1 %v1279_v1  ;;  %v1283_v5 = vld [vmem:[%s1643_s1 + $0x8] sm:$0xff]   ;;  %v1286_v8 = vld [vmem:[%s1643_s1 + $0x10] sm:$0xff]  }
   0x4   :  { %1087 = vmatpush3.bf16.msra.mxu0 %v1280_v2  ;;  %1183 = vmatpush3.bf16.msra.mxu1 %v1279_v1  ;;  %v1287_v9 = vld [vmem:[%s1643_s1 + $0x58] sm:$0xff]   ;;  %v1290_v12 = vld [vmem:[%s1643_s1 + $0x60] sm:$0xff]   ;;  %v1293_v15 = vld [vmem:[%s1643_s1 + $0x68] sm:$0xff]  }
   0x5   :  { %1088 = vmatprep.subr.bf16.mxu0 %v1281_v3  ;;  %1184 = vmatprep.subr.bf16.mxu1 %v1282_v4  ;;  %v1288_v10 = vld [vmem:[%s1643_s1 + $0x98] sm:$0xff]   ;;  %v1291_v13 = vld [vmem:[%s1643_s1 + $0xa0] sm:$0xff]   ;;  %v1294_v16 = vld [vmem:[%s1643_s1 + $0xa8] sm:$0xff]  }
   0x6   :  { %v1289_v11 = vld [vmem:[%s1643_s1 + $0x18] sm:$0xff]   ;;  %v1292_v14 = vld [vmem:[%s1643_s1 + $0x20] sm:$0xff]   ;;  %v1295_v17 = vld [vmem:[%s1643_s1 + $0x28] sm:$0xff]  }
   0x7   :  { %v1296_v18 = vld [vmem:[%s1643_s1 + $0x70] sm:$0xff]   ;;  %v1299_v21 = vld [vmem:[%s1643_s1 + $0x78] sm:$0xff]   ;;  %v1307_v26 = vld [vmem:[%s1645_s4] sm:$0xff]  }
   0x8   :  { %1089 = vmatpush3.bf16.msra.mxu0 %v1283_v5  ;;  %1185 = vmatpush3.bf16.msra.mxu1 %v1282_v4  ;;  %v1297_v19 = vld [vmem:[%s1643_s1 + $0xb0] sm:$0xff]   ;;  %v1300_v22 = vld [vmem:[%s1643_s1 + $0xb8] sm:$0xff]   ;;  %v1302_v27 = vld [vmem:[%s1644_s0] ss:$12 sps:$4 sm:$0xff]  }
   0x9   :  { %1090 = vmatprep.subr.bf16.mxu0 %v1284_v6  ;;  %1186 = vmatprep.subr.bf16.mxu1 %v1285_v7  ;;  %v1298_v20 = vld [vmem:[%s1643_s1 + $0x30] sm:$0xff]   ;;  %v1301_v25 = vld [vmem:[%s1643_s1 + $0x38] sm:$0xff]   ;;  %v1306_v28 = vld [vmem:[%s1644_s0 + $0x20] ss:$12 sps:$4 sm:$0xff]  }
   0xa   :  { %v1304_v23 = vld [vmem:[%s1644_s0 + $0x4] ss:$12 sps:$4 sm:$0xff]   ;;  %v1305_v24 = vld [vmem:[%s1644_s0 + $0x8] ss:$12 sps:$4 sm:$0xff]   ;;  %v1315_v35 = vld [vmem:[%s1645_s4 + $0x18] sm:$0xff]  }
   0xb   :  { %415 = vmatprep.mubr.bf16.mxu0 %v1304_v23  ;;  %1198 = vmatprep.mubr.bf16.mxu1 %v1305_v24  ;;  %v1308_v29 = vld [vmem:[%s1645_s4 + $0x8] sm:$0xff]   ;;  %v1311_v31 = vld [vmem:[%s1644_s0 + $0x38] ss:$12 sps:$4 sm:$0xff]   ;;  %v1314_v33 = vld [vmem:[%s1645_s4 + $0x10] sm:$0xff]  }
   0xc   :  { %1091 = vmatpush3.bf16.msra.mxu0 %v1286_v8  ;;  %1187 = vmatpush3.bf16.msra.mxu1 %v1285_v7  ;;  %v1309_v30 = vld [vmem:[%s1644_s0 + $0x1c] ss:$12 sps:$4 sm:$0xff]   ;;  %v1312_v32 = vld [vmem:[%s1644_s0 + $0x18] ss:$12 sps:$4 sm:$0xff]   ;;  %v1316_v36 = vld [vmem:[%s1644_s0 + $0x34] ss:$12 sps:$4 sm:$0xff]  }
   0xd   :  { %1092 = vmatprep.subr.bf16.mxu0 %v1287_v9  ;;  %1188 = vmatprep.subr.bf16.mxu1 %v1288_v10  ;;  %v1313_v34 = vld [vmem:[%s1644_s0 + $0x50] ss:$12 sps:$4 sm:$0xff]   ;;  %v1318_v37 = vld [vmem:[%s1644_s0 + $0x68] ss:$12 sps:$4 sm:$0xff]   ;;  %v1321_v38 = vld [vmem:[%s1645_s4 + $0x20] sm:$0xff]  }
   0xe   :  { %v1319_v39 = vld [vmem:[%s1644_s0 + $0x30] ss:$12 sps:$4 sm:$0xff]   ;;  %v1320_v40 = vld [vmem:[%s1644_s0 + $0x80] ss:$12 sps:$4 sm:$0xff]   ;;  %v1325_v43 = vld [vmem:[%s1644_s0 + $0x98] ss:$12 sps:$4 sm:$0xff]  }
   0xf   :  { %v1322_v41 = vld [vmem:[%s1645_s4 + $0x28] sm:$0xff]   ;;  %v1328_v44 = vld [vmem:[%s1645_s4 + $0x30] sm:$0xff]   ;;  %v1329_v48 = vld [vmem:[%s1645_s4 + $0x38] sm:$0xff]  }
  0x10   :  { %1093 = vmatpush3.bf16.msra.mxu0 %v1289_v11  ;;  %1189 = vmatpush3.bf16.msra.mxu1 %v1288_v10  ;;  %v1323_v42 = vld [vmem:[%s1644_s0 + $0x4c] ss:$12 sps:$4 sm:$0xff]   ;;  %v1326_v45 = vld [vmem:[%s1644_s0 + $0x48] ss:$12 sps:$4 sm:$0xff]   ;;  %v1327_v46 = vld [vmem:[%s1644_s0 + $0xb0] ss:$12 sps:$4 sm:$0xff]  }
  0x11   :  { %1094 = vmatprep.subr.bf16.mxu0 %v1290_v12  ;;  %1190 = vmatprep.subr.bf16.mxu1 %v1291_v13  ;;  %v1330_v47 = vld [vmem:[%s1644_s0 + $0x64] ss:$12 sps:$4 sm:$0xff]   ;;  %v1333_v50 = vld [vmem:[%s1644_s0 + $0x60] ss:$12 sps:$4 sm:$0xff]   ;;  %v1335_v52 = vld [vmem:[%s1644_s0 + $0x7c] ss:$12 sps:$4 sm:$0xff]  }
  0x12   :  { %v1332_v49 = vld [vmem:[%s1646_s3] sm:$0xff]   ;;  %v1334_v51 = vld [vmem:[%s1646_s3 + $0x8] sm:$0xff]   ;;  %v1337_v53 = vld [vmem:[%s1646_s3 + $0x10] sm:$0xff]  }
  0x13   :  { %v1338_v54 = vld [vmem:[%s1644_s0 + $0x78] ss:$12 sps:$4 sm:$0xff]   ;;  %v1340_v56 = vld [vmem:[%s1644_s0 + $0x94] ss:$12 sps:$4 sm:$0xff]   ;;  %v1343_v58 = vld [vmem:[%s1644_s0 + $0x90] ss:$12 sps:$4 sm:$0xff]  }
  0x14   :  { %1095 = vmatpush3.bf16.msra.mxu0 %v1292_v14  ;;  %1191 = vmatpush3.bf16.msra.mxu1 %v1291_v13  ;;  %v1339_v55 = vld [vmem:[%s1646_s3 + $0x18] sm:$0xff]   ;;  %v1342_v57 = vld [vmem:[%s1646_s3 + $0x20] sm:$0xff]   ;;  %v1344_v59 = vld [vmem:[%s1646_s3 + $0x28] sm:$0xff]  }
  0x15   :  { %1096 = vmatprep.subr.bf16.mxu0 %v1293_v15  ;;  %1192 = vmatprep.subr.bf16.mxu1 %v1294_v16  ;;  %v1345_v60 = vld [vmem:[%s1644_s0 + $0xac] ss:$12 sps:$4 sm:$0xff]   ;;  %v1347_v61 = vld [vmem:[%s1646_s3 + $0x30] sm:$0xff]   ;;  %v1580_v24 = vld [vmem:[%s1647_s2] ss:$0 sm:$0xff] }
  0x16   :  { %v1348_v62 = vld [vmem:[%s1644_s0 + $0xa8] ss:$12 sps:$4 sm:$0xff]   ;;  %v1349_v63 = vld [vmem:[%s1646_s3 + $0x38] sm:$0xff]  }
  0x18   :  { %1097 = vmatpush3.bf16.msra.mxu0 %v1295_v17  ;;  %1193 = vmatpush3.bf16.msra.mxu1 %v1294_v16 }
  0x19   :  { %1098 = vmatprep.subr.bf16.mxu0 %v1296_v18  ;;  %1194 = vmatprep.subr.bf16.mxu1 %v1297_v19 }
  0x1c   :  { %1099 = vmatpush3.bf16.msra.mxu0 %v1298_v20  ;;  %1195 = vmatpush3.bf16.msra.mxu1 %v1297_v19 }
  0x1d   :  { %1100 = vmatprep.subr.bf16.mxu0 %v1299_v21  ;;  %1196 = vmatprep.subr.bf16.mxu1 %v1300_v22 }
  0x20   :  { %1101 = vmatpush3.bf16.msra.mxu0 %v1301_v25  ;;  %1197 = vmatpush3.bf16.msra.mxu1 %v1300_v22 }
  0x21   :  { %1214 = vmatprep.subr.bf16.mxu1 %v1307_v26 }
  0x23   :  { %416 = vmatmul.mubr.bf16.vlgmr.msra.gmra.mrb[0].mxu0 %v1302_v27  ;;  %1199 = vmatmul.mubr.bf16.vlgmr.msra.gmra.mrb[0].mxu1 %v1306_v28  ;;  %v1586_v28 = vld [vmem:[%s1648_s5] ss:$0 sm:$0xff] }
  0x24   :  { %1215 = vmatpush3.bf16.msra.mxu1 %v1307_v26  ;;  %423 = vmatprep.mubr.bf16.mxu0 %v1309_v30 }
  0x25   :  { %1216 = vmatprep.subr.bf16.mxu1 %v1308_v29  ;;  %1202 = vmatprep.mubr.bf16.mxu1 %v1311_v31 }
  0x28   :  { %1217 = vmatpush3.bf16.msra.mxu1 %v1308_v29 }
  0x29   :  { %1218 = vmatprep.subr.bf16.mxu1 %v1314_v33 }
  0x2b   :  { %424 = vmatmul.mubr.bf16.gmra.mrb[4].mxu0 %v1312_v32  ;;  %1203 = vmatmul.mubr.bf16.gmra.mrb[4].mxu1 %v1313_v34 }
  0x2c   :  { %1219 = vmatpush3.bf16.msra.mxu1 %v1314_v33  ;;  %431 = vmatprep.mubr.bf16.mxu0 %v1316_v36 }
  0x2d   :  { %1220 = vmatprep.subr.bf16.mxu1 %v1315_v35  ;;  %1206 = vmatprep.mubr.bf16.mxu1 %v1318_v37 }
  0x30   :  { %1221 = vmatpush3.bf16.msra.mxu1 %v1315_v35 }
  0x31   :  { %1222 = vmatprep.subr.bf16.mxu1 %v1321_v38 }
  0x33   :  { %432 = vmatmul.mubr.bf16.gmra.mrb[8].mxu0 %v1319_v39  ;;  %1207 = vmatmul.mubr.bf16.gmra.mrb[8].mxu1 %v1320_v40 }
  0x34   :  { %1223 = vmatpush3.bf16.msra.mxu1 %v1321_v38  ;;  %439 = vmatprep.mubr.bf16.mxu0 %v1323_v42 }
  0x35   :  { %1224 = vmatprep.subr.bf16.mxu1 %v1322_v41  ;;  %1210 = vmatprep.mubr.bf16.mxu1 %v1325_v43 }
  0x38   :  { %1225 = vmatpush3.bf16.msra.mxu1 %v1322_v41 }
  0x39   :  { %1226 = vmatprep.subr.bf16.mxu1 %v1328_v44 }
  0x3b   :  { %440 = vmatmul.mubr.bf16.gmra.mrb[12].mxu0 %v1326_v45  ;;  %1211 = vmatmul.mubr.bf16.gmra.mrb[12].mxu1 %v1327_v46 }
  0x3c   :  { %1227 = vmatpush3.bf16.msra.mxu1 %v1328_v44  ;;  %447 = vmatprep.mubr.bf16.mxu0 %v1330_v47 }
  0x3d   :  { %1228 = vmatprep.subr.bf16.mxu1 %v1329_v48  ;;  %1230 = vmatprep.mubr.bf16.mxu1 %v1332_v49 }
  0x40   :  { %1229 = vmatpush3.bf16.msra.mxu1 %v1329_v48 }
  0x43   :  { %448 = vmatmul.mubr.bf16.gmra.mrb[16].mxu0 %v1333_v50  ;;  %1231 = vmatmul.mubr.bf16.vlgmr.msra.gmra.mrb[0].mxu1 %v1334_v51 }
  0x44   :  { %455 = vmatprep.mubr.bf16.mxu0 %v1335_v52  ;;  %1234 = vmatprep.mubr.bf16.mxu1 %v1337_v53 }
  0x4b   :  { %456 = vmatmul.mubr.bf16.gmra.mrb[20].mxu0 %v1338_v54  ;;  %1235 = vmatmul.mubr.bf16.gmra.mrb[4].mxu1 %v1339_v55 }
  0x4c   :  { %463 = vmatprep.mubr.bf16.mxu0 %v1340_v56  ;;  %1238 = vmatprep.mubr.bf16.mxu1 %v1342_v57 }
  0x53   :  { %464 = vmatmul.mubr.bf16.gmra.mrb[24].mxu0 %v1343_v58  ;;  %1239 = vmatmul.mubr.bf16.gmra.mrb[8].mxu1 %v1344_v59 }
  0x54   :  { %471 = vmatprep.mubr.bf16.mxu0 %v1345_v60  ;;  %1242 = vmatprep.mubr.bf16.mxu1 %v1347_v61 }
  0x5b   :  { %472 = vmatmul.mubr.bf16.gmra.mrb[28].mxu0 %v1348_v62  ;;  %1243 = vmatmul.mubr.bf16.gmra.mrb[12].mxu1 %v1349_v63 }
  0xf6   :  { %v1102_v0 = vpop.f32.mrb[0].mxu0 }
  0xf7   :  { %v1103_v1 = vpop.f32.mrb[1].mxu0 }
  0xf8   :  { %v1104_v2 = vadd.f32 %v1103_v1, %v1102_v0  ;;  %v1105_v3 = vpop.f32.mrb[2].mxu0 }
  0xf9   :  { %v1106_v4 = vpop.f32.mrb[3].mxu0 }
  0xfa   :  { %v1107_v5 = vadd.f32 %v1106_v4, %v1105_v3  ;;  %v418_v29 = vadd.f32 %v1104_v2, %v1580_v24 }
  0xfc   :  { %v421_v38 = vadd.f32 %v1107_v5, %v1580_v24 }
  0xfe   :  { %v1108_v6 = vpop.f32.mrb[4].mxu0 }
  0xff   :  { %v1109_v7 = vpop.f32.mrb[5].mxu0 }
 0x100   :  { %v1110_v8 = vadd.f32 %v1109_v7, %v1108_v6  ;;  %v1111_v9 = vpop.f32.mrb[6].mxu0 }
 0x101   :  { %v1112_v10 = vpop.f32.mrb[7].mxu0 }
 0x102   :  { %v1113_v11 = vadd.f32 %v1112_v10, %v1111_v9  ;;  %v426_v25 = vadd.f32 %v1110_v8, %v1580_v24 }
 0x104   :  { %v429_v33 = vadd.f32 %v1113_v11, %v1580_v24 }
 0x106   :  { %v1114_v12 = vpop.f32.mrb[8].mxu0 }
 0x107   :  { %v1115_v13 = vpop.f32.mrb[9].mxu0 }
 0x108   :  { %v1116_v14 = vadd.f32 %v1115_v13, %v1114_v12  ;;  %v1117_v15 = vpop.f32.mrb[10].mxu0 }
 0x109   :  { %v1118_v16 = vpop.f32.mrb[11].mxu0 }
 0x10a   :  { %v1119_v17 = vadd.f32 %v1118_v16, %v1117_v15  ;;  %v434_v55 = vadd.f32 %v1116_v14, %v1580_v24 }
 0x10c   :  { %v437_v2 = vadd.f32 %v1119_v17, %v1580_v24 }
 0x10e   :  { %v1120_v18 = vpop.f32.mrb[12].mxu0 }
 0x10f   :  { %v1121_v19 = vpop.f32.mrb[13].mxu0 }
 0x110   :  { %v1122_v20 = vadd.f32 %v1121_v19, %v1120_v18  ;;  %v1123_v21 = vpop.f32.mrb[14].mxu0 }
 0x111   :  { %v1124_v22 = vpop.f32.mrb[15].mxu0 }
 0x112   :  { %v1125_v23 = vadd.f32 %v1124_v22, %v1123_v21  ;;  %v442_v50 = vadd.f32 %v1122_v20, %v1580_v24 }
 0x114   :  { %v445_v60 = vadd.f32 %v1125_v23, %v1580_v24 }
 0x116   :  { %v1126_v26 = vpop.f32.mrb[16].mxu0  ;;  %v1232_v27 = vpop.f32.mrb[0].mxu1 }
 0x117   :  { %v1246_v30 = vadd.f32 %v1232_v27, %v426_v25  ;;  %v1127_v31 = vpop.f32.mrb[17].mxu0  ;;  %v739_v32 = vpop.f32.mrb[1].mxu1 }
 0x118   :  { %v1128_v34 = vadd.f32 %v1127_v31, %v1126_v26  ;;  %v1247_v35 = vadd.f32 %v739_v32, %v418_v29  ;;  %v1129_v36 = vpop.f32.mrb[18].mxu0  ;;  %v1233_v37 = vpop.f32.mrb[2].mxu1 }
 0x119   :  { %v827_v39 = vadd.f32 %v1246_v30, %v1586_v28  ;;  %v1248_v40 = vadd.f32 %v1233_v37, %v429_v33  ;;  %v1130_v41 = vpop.f32.mrb[19].mxu0  ;;  %v742_v42 = vpop.f32.mrb[3].mxu1 }
 0x11a   :  { %v825_v43 = vadd.f32 %v1247_v35, %v1586_v28  ;;  %v1131_v44 = vadd.f32 %v1130_v41, %v1129_v36  ;;  %v1249_v45 = vadd.f32 %v742_v42, %v421_v38  ;;  %v450_v19 = vadd.f32 %v1128_v34, %v1580_v24 }
 0x11b   :  { %v828_v46 = vadd.f32 %v1248_v40, %v1586_v28  ;;  %v843_v48 = vmax.f32 %v827_v39, 0.0 }
 0x11c   :  { %v826_v47 = vadd.f32 %v1249_v45, %v1586_v28  ;;  %v841_v51 = vmax.f32 %v825_v43, 0.0  ;;  %v453_v32 = vadd.f32 %v1131_v44, %v1580_v24 }
 0x11d   :  { %v844_v49 = vmax.f32 %v828_v46, 0.0 }
 0x11e   :  { %v842_v52 = vmax.f32 %v826_v47, 0.0  ;;  %v1132_v53 = vpop.f32.mrb[20].mxu0  ;;  %v1236_v54 = vpop.f32.mrb[4].mxu1 }
 0x11f   :  { %v1047_v56 = vpack.c.bf16 %v844_v49, %v843_v48  ;;  %v1250_v57 = vadd.f32 %v1236_v54, %v442_v50  ;;  %v1133_v58 = vpop.f32.mrb[21].mxu0  ;;  %v755_v59 = vpop.f32.mrb[5].mxu1 }
 0x120   :  { %v1042_v61 = vpack.c.bf16 %v842_v52, %v841_v51  ;;  %v1134_v62 = vadd.f32 %v1133_v58, %v1132_v53  ;;  %v1251_v63 = vadd.f32 %v755_v59, %v434_v55  ;;  %v1135_v0 = vpop.f32.mrb[22].mxu0  ;;  %v1237_v1 = vpop.f32.mrb[6].mxu1 }
 0x121   :  { %1079 = vst [vmem:[%s1649_s6 + $0x8] sm:$0xff] %v1047_v56   ;;  %v831_v3 = vadd.f32 %v1250_v57, %v1586_v28  ;;  %v1252_v4 = vadd.f32 %v1237_v1, %v445_v60  ;;  %v1136_v5 = vpop.f32.mrb[23].mxu0  ;;  %v758_v6 = vpop.f32.mrb[7].mxu1 }
 0x122   :  { %1043 = vst [vmem:[%s1649_s6] sm:$0xff] %v1042_v61   ;;  %v829_v7 = vadd.f32 %v1251_v63, %v1586_v28  ;;  %v1137_v8 = vadd.f32 %v1136_v5, %v1135_v0  ;;  %v1253_v9 = vadd.f32 %v758_v6, %v437_v2  ;;  %v458_v14 = vadd.f32 %v1134_v62, %v1580_v24 }
 0x123   :  { %v832_v10 = vadd.f32 %v1252_v4, %v1586_v28  ;;  %v847_v12 = vmax.f32 %v831_v3, 0.0 }
 0x124   :  { %v830_v11 = vadd.f32 %v1253_v9, %v1586_v28  ;;  %v845_v15 = vmax.f32 %v829_v7, 0.0  ;;  %v461_v25 = vadd.f32 %v1137_v8, %v1580_v24 }
 0x125   :  { %v848_v13 = vmax.f32 %v832_v10, 0.0 }
 0x126   :  { %v846_v16 = vmax.f32 %v830_v11, 0.0  ;;  %v1138_v17 = vpop.f32.mrb[24].mxu0  ;;  %v1240_v18 = vpop.f32.mrb[8].mxu1 }
 0x127   :  { %v1057_v20 = vpack.c.bf16 %v848_v13, %v847_v12  ;;  %v1254_v21 = vadd.f32 %v1240_v18, %v458_v14  ;;  %v1139_v22 = vpop.f32.mrb[25].mxu0  ;;  %v771_v23 = vpop.f32.mrb[9].mxu1 }
 0x128   :  { %v1052_v26 = vpack.c.bf16 %v846_v16, %v845_v15  ;;  %v1140_v27 = vadd.f32 %v1139_v22, %v1138_v17  ;;  %v1255_v29 = vadd.f32 %v771_v23, %v450_v19  ;;  %v1141_v30 = vpop.f32.mrb[26].mxu0  ;;  %v1241_v31 = vpop.f32.mrb[10].mxu1 }
 0x129   :  { %1081 = vst [vmem:[%s1649_s6 + $0x18] sm:$0xff] %v1057_v20   ;;  %v835_v33 = vadd.f32 %v1254_v21, %v1586_v28  ;;  %v1256_v34 = vadd.f32 %v1241_v31, %v461_v25  ;;  %v1142_v35 = vpop.f32.mrb[27].mxu0  ;;  %v774_v36 = vpop.f32.mrb[11].mxu1 }
 0x12a   :  { %1080 = vst [vmem:[%s1649_s6 + $0x10] sm:$0xff] %v1052_v26   ;;  %v833_v37 = vadd.f32 %v1255_v29, %v1586_v28  ;;  %v1143_v38 = vadd.f32 %v1142_v35, %v1141_v30  ;;  %v1257_v39 = vadd.f32 %v774_v36, %v453_v32  ;;  %v466_v48 = vadd.f32 %v1140_v27, %v1580_v24 }
 0x12b   :  { %v836_v40 = vadd.f32 %v1256_v34, %v1586_v28  ;;  %v851_v42 = vmax.f32 %v835_v33, 0.0 }
 0x12c   :  { %v834_v41 = vadd.f32 %v1257_v39, %v1586_v28  ;;  %v849_v44 = vmax.f32 %v833_v37, 0.0  ;;  %v469_v57 = vadd.f32 %v1143_v38, %v1580_v24 }
 0x12d   :  { %v852_v43 = vmax.f32 %v836_v40, 0.0 }
 0x12e   :  { %v850_v45 = vmax.f32 %v834_v41, 0.0  ;;  %v1144_v46 = vpop.f32.mrb[28].mxu0  ;;  %v1244_v47 = vpop.f32.mrb[12].mxu1 }
 0x12f   :  { %v1067_v49 = vpack.c.bf16 %v852_v43, %v851_v42  ;;  %v1145_v50 = vpop.f32.mrb[29].mxu0  ;;  %v787_v51 = vpop.f32.mrb[13].mxu1 }
 0x130   :  { %v1062_v52 = vpack.c.bf16 %v850_v45, %v849_v44  ;;  %v1146_v53 = vadd.f32 %v1145_v50, %v1144_v46  ;;  %v1259_v54 = vadd.f32 %v787_v51, %v466_v48  ;;  %v1147_v55 = vpop.f32.mrb[30].mxu0  ;;  %v1245_v56 = vpop.f32.mrb[14].mxu1 }
 0x131   :  { %1083 = vst [vmem:[%s1649_s6 + $0x28] sm:$0xff] %v1067_v49   ;;  %v1148_v58 = vpop.f32.mrb[31].mxu0  ;;  %v790_v59 = vpop.f32.mrb[15].mxu1 }
 0x132   :  { %1082 = vst [vmem:[%s1649_s6 + $0x20] sm:$0xff] %v1062_v52   ;;  %v474_v60 = vadd.f32 %v1146_v53, %v1580_v24  ;;  %v837_v61 = vadd.f32 %v1259_v54, %v1586_v28  ;;  %v1149_v62 = vadd.f32 %v1148_v58, %v1147_v55  ;;  %v1261_v63 = vadd.f32 %v790_v59, %v469_v57 }
 0x134   :  { %v1258_v0 = vadd.f32 %v1244_v47, %v474_v60  ;;  %v477_v1 = vadd.f32 %v1149_v62, %v1580_v24  ;;  %v838_v2 = vadd.f32 %v1261_v63, %v1586_v28  ;;  %v853_v4 = vmax.f32 %v837_v61, 0.0 }
 0x136   :  { %v839_v3 = vadd.f32 %v1258_v0, %v1586_v28  ;;  %v1260_v5 = vadd.f32 %v1245_v56, %v477_v1  ;;  %v854_v6 = vmax.f32 %v838_v2, 0.0 }
 0x138   :  { %v840_v7 = vadd.f32 %v1260_v5, %v1586_v28  ;;  %v1072_v8 = vpack.c.bf16 %v854_v6, %v853_v4  ;;  %v855_v9 = vmax.f32 %v839_v3, 0.0 }
 0x13a   :  { %v856_v10 = vmax.f32 %v840_v7, 0.0  ;;  %1084 = vst [vmem:[%s1649_s6 + $0x30] sm:$0xff] %v1072_v8  }
 0x13c   :  { %v1077_v11 = vpack.c.bf16 %v856_v10, %v855_v9 }
 0x13e   :  { %1085 = vst [vmem:[%s1649_s6 + $0x38] sm:$0xff] %v1077_v11  }

// kernel: resnet_forward.12
= control target key start
LH: loop header
LB: loop body
LE: loop exit
PB: predicated region body
PF: predicated region fallthrough
CT: control target
= control target key end

     0   :  { %s639_s1 = inlined_call_operand.vmem [shape: bf16[384,128], index: 1, kind: input, shape index: {}]   ;;  %s640_s0 = inlined_call_operand.vmem [shape: bf16[32,384], index: 0, kind: input, shape index: {}]   ;;  %s641_s2 = inlined_call_operand.vmem [shape: f32[1,128], index: 2, kind: input, shape index: {}]   ;;  %s642_s3 = inlined_call_operand.vmem [shape: bf16[32,128], index: 3, kind: output, shape index: {}]  }
   0x1   :  { %v488_v0 = vld [vmem:[%s639_s1 + $0x40] sm:$0xff]   ;;  %v490_v2 = vld [vmem:[%s639_s1 + $0x48] sm:$0xff]   ;;  %v493_v5 = vld [vmem:[%s639_s1 + $0x50] sm:$0xff]  }
   0x2   :  { %v489_v1 = vld [vmem:[%s639_s1] sm:$0xff]   ;;  %430 = vmatprep.subr.bf16.mxu0 %v488_v0  ;;  %v492_v4 = vld [vmem:[%s639_s1 + $0x8] sm:$0xff]   ;;  %v495_v7 = vld [vmem:[%s639_s1 + $0x10] sm:$0xff]  }
   0x3   :  { %431 = vmatpush3.bf16.msra.mxu0 %v489_v1  ;;  %v491_v3 = vld [vmem:[%s639_s1 + $0x80] sm:$0xff]   ;;  %v494_v6 = vld [vmem:[%s639_s1 + $0x88] sm:$0xff]   ;;  %v496_v8 = vld [vmem:[%s639_s1 + $0x58] sm:$0xff]  }
   0x4   :  { %432 = vmatprep.subr.bf16.mxu0 %v490_v2  ;;  %468 = vmatprep.subr.bf16.mxu1 %v491_v3  ;;  %v497_v9 = vld [vmem:[%s639_s1 + $0x90] sm:$0xff]   ;;  %v498_v10 = vld [vmem:[%s639_s1 + $0x18] sm:$0xff]   ;;  %v499_v11 = vld [vmem:[%s639_s1 + $0x60] sm:$0xff]  }
   0x5   :  { %469 = vmatpush3.bf16.msra.mxu1 %v491_v3  ;;  %v500_v12 = vld [vmem:[%s639_s1 + $0x98] sm:$0xff]   ;;  %v501_v13 = vld [vmem:[%s639_s1 + $0x20] sm:$0xff]   ;;  %v502_v15 = vld [vmem:[%s639_s1 + $0x68] sm:$0xff]  }
   0x6   :  { %470 = vmatprep.subr.bf16.mxu1 %v494_v6  ;;  %v503_v14 = vld [vmem:[%s639_s1 + $0xa0] sm:$0xff]   ;;  %v504_v16 = vld [vmem:[%s639_s1 + $0x28] sm:$0xff]   ;;  %v505_v18 = vld [vmem:[%s639_s1 + $0x70] sm:$0xff]  }
   0x7   :  { %433 = vmatpush3.bf16.msra.mxu0 %v492_v4  ;;  %v506_v17 = vld [vmem:[%s639_s1 + $0xa8] sm:$0xff]   ;;  %v507_v19 = vld [vmem:[%s639_s1 + $0x30] sm:$0xff]   ;;  %v508_v20 = vld [vmem:[%s639_s1 + $0x78] sm:$0xff]  }
   0x8   :  { %434 = vmatprep.subr.bf16.mxu0 %v493_v5  ;;  %v509_v21 = vld [vmem:[%s639_s1 + $0xb0] sm:$0xff]   ;;  %v510_v23 = vld [vmem:[%s639_s1 + $0x38] sm:$0xff]   ;;  %v511_v26 = vld [vmem:[%s640_s0] ss:$12 sps:$4 sm:$0xff]  }
   0x9   :  { %471 = vmatpush3.bf16.msra.mxu1 %v494_v6  ;;  %v513_v22 = vld [vmem:[%s640_s0 + $0x4] ss:$12 sps:$4 sm:$0xff]   ;;  %v515_v24 = vld [vmem:[%s640_s0 + $0x8] ss:$12 sps:$4 sm:$0xff]   ;;  %v514_v25 = vld [vmem:[%s639_s1 + $0xb8] sm:$0xff]  }
   0xa   :  { %472 = vmatprep.subr.bf16.mxu1 %v497_v9  ;;  %286 = vmatprep.mubr.bf16.mxu0 %v513_v22  ;;  %v517_v27 = vld [vmem:[%s640_s0 + $0x1c] ss:$12 sps:$4 sm:$0xff]   ;;  %v516_v28 = vld [vmem:[%s640_s0 + $0x20] ss:$12 sps:$4 sm:$0xff]   ;;  %v519_v29 = vld [vmem:[%s640_s0 + $0x18] ss:$12 sps:$4 sm:$0xff]  }
   0xb   :  { %435 = vmatpush3.bf16.msra.mxu0 %v495_v7  ;;  %484 = vmatprep.mubr.bf16.mxu1 %v515_v24  ;;  %v380_v32 = vld [vmem:[%s641_s2] ss:$0 sm:$0xff] }
   0xc   :  { %436 = vmatprep.subr.bf16.mxu0 %v496_v8 }
   0xd   :  { %473 = vmatpush3.bf16.msra.mxu1 %v497_v9 }
   0xe   :  { %474 = vmatprep.subr.bf16.mxu1 %v500_v12 }
   0xf   :  { %437 = vmatpush3.bf16.msra.mxu0 %v498_v10 }
  0x10   :  { %438 = vmatprep.subr.bf16.mxu0 %v499_v11 }
  0x11   :  { %475 = vmatpush3.bf16.msra.mxu1 %v500_v12 }
  0x12   :  { %476 = vmatprep.subr.bf16.mxu1 %v503_v14 }
  0x13   :  { %439 = vmatpush3.bf16.msra.mxu0 %v501_v13 }
  0x14   :  { %440 = vmatprep.subr.bf16.mxu0 %v502_v15 }
  0x15   :  { %477 = vmatpush3.bf16.msra.mxu1 %v503_v14 }
  0x16   :  { %478 = vmatprep.subr.bf16.mxu1 %v506_v17 }
  0x17   :  { %441 = vmatpush3.bf16.msra.mxu0 %v504_v16 }
  0x18   :  { %442 = vmatprep.subr.bf16.mxu0 %v505_v18 }
  0x19   :  { %479 = vmatpush3.bf16.msra.mxu1 %v506_v17 }
  0x1a   :  { %480 = vmatprep.subr.bf16.mxu1 %v509_v21 }
  0x1b   :  { %443 = vmatpush3.bf16.msra.mxu0 %v507_v19 }
  0x1c   :  { %444 = vmatprep.subr.bf16.mxu0 %v508_v20 }
  0x1d   :  { %481 = vmatpush3.bf16.msra.mxu1 %v509_v21 }
  0x1e   :  { %482 = vmatprep.subr.bf16.mxu1 %v514_v25 }
  0x1f   :  { %445 = vmatpush3.bf16.msra.mxu0 %v510_v23 }
  0x21   :  { %483 = vmatpush3.bf16.msra.mxu1 %v514_v25 }
  0x22   :  { %287 = vmatmul.mubr.bf16.vlgmr.msra.gmra.mrb[0].mxu0 %v511_v26 }
  0x23   :  { %294 = vmatprep.mubr.bf16.mxu0 %v517_v27 }
  0x24   :  { %485 = vmatmul.mubr.bf16.vlgmr.msra.gmra.mrb[0].mxu1 %v516_v28 }
  0x2a   :  { %295 = vmatmul.mubr.bf16.gmra.mrb[4].mxu0 %v519_v29 }
  0xf5   :  { %v446_v30 = vpop.f32.mrb[0].mxu0 }
  0xf6   :  { %v447_v31 = vpop.f32.mrb[1].mxu0 }
  0xf7   :  { %v448_v33 = vadd.f32 %v447_v31, %v446_v30  ;;  %v449_v34 = vpop.f32.mrb[2].mxu0  ;;  %v486_v36 = vpop.f32.mrb[0].mxu1 }
  0xf8   :  { %v450_v35 = vpop.f32.mrb[3].mxu0  ;;  %v337_v39 = vpop.f32.mrb[1].mxu1 }
  0xf9   :  { %v451_v37 = vadd.f32 %v450_v35, %v449_v34  ;;  %v289_v38 = vadd.f32 %v448_v33, %v380_v32  ;;  %v487_v40 = vpop.f32.mrb[2].mxu1 }
  0xfa   :  { %v340_v43 = vpop.f32.mrb[3].mxu1 }
  0xfb   :  { %v338_v41 = vadd.f32 %v337_v39, %v289_v38  ;;  %v292_v42 = vadd.f32 %v451_v37, %v380_v32 }
  0xfd   :  { %v341_v44 = vadd.f32 %v340_v43, %v292_v42  ;;  %v452_v45 = vpop.f32.mrb[4].mxu0  ;;  %v352_v47 = vmax.f32 %v338_v41, 0.0 }
  0xfe   :  { %v453_v46 = vpop.f32.mrb[5].mxu0 }
  0xff   :  { %v353_v48 = vmax.f32 %v341_v44, 0.0  ;;  %v454_v49 = vadd.f32 %v453_v46, %v452_v45  ;;  %v455_v50 = vpop.f32.mrb[6].mxu0 }
 0x100   :  { %v456_v51 = vpop.f32.mrb[7].mxu0 }
 0x101   :  { %v422_v52 = vpack.c.bf16 %v353_v48, %v352_v47  ;;  %v297_v53 = vadd.f32 %v454_v49, %v380_v32  ;;  %v457_v54 = vadd.f32 %v456_v51, %v455_v50 }
 0x103   :  { %423 = vst [vmem:[%s642_s3] sm:$0xff] %v422_v52   ;;  %v346_v55 = vadd.f32 %v486_v36, %v297_v53  ;;  %v300_v56 = vadd.f32 %v457_v54, %v380_v32 }
 0x105   :  { %v349_v57 = vadd.f32 %v487_v40, %v300_v56  ;;  %v354_v58 = vmax.f32 %v346_v55, 0.0 }
 0x107   :  { %v355_v59 = vmax.f32 %v349_v57, 0.0 }
 0x109   :  { %v427_v60 = vpack.c.bf16 %v355_v59, %v354_v58 }
 0x10b   :  { %429 = vst [vmem:[%s642_s3 + $0x8] sm:$0xff] %v427_v60  }

// kernel: resnet_forward.13
= control target key start
LH: loop header
LB: loop body
LE: loop exit
PB: predicated region body
PF: predicated region fallthrough
CT: control target
= control target key end

     0   :  { %s1619_s0 = inlined_call_operand.vmem [shape: bf16[32,640], index: 0, kind: input, shape index: {}]   ;;  %s1620_s1 = inlined_call_operand.vmem [shape: bf16[640,128], index: 1, kind: input, shape index: {}]   ;;  %s1621_s2 = inlined_call_operand.vmem [shape: f32[1,128], index: 2, kind: input, shape index: {}]   ;;  %s1622_s3 = inlined_call_operand.vmem [shape: bf16[32,128], index: 3, kind: input, shape index: {}]   ;;  %s1623_s4 = inlined_call_operand.vmem [shape: bf16[128,128], index: 4, kind: input, shape index: {}]   ;;  %s1624_s5 = inlined_call_operand.vmem [shape: f32[1,128], index: 5, kind: input, shape index: {}]   ;;  %s1625_s6 = inlined_call_operand.vmem [shape: f32[128,128], index: 6, kind: input, shape index: {}]   ;;  %s1626_s7 = inlined_call_operand.vmem [shape: f32[1,128], index: 7, kind: input, shape index: {}]   ;;  %s1627_s8 = inlined_call_operand.hbm [shape: f32[2,128], index: 8, kind: output, shape index: {}]  }
   0x1   :  { %v1217_v0 = vld [vmem:[%s1620_s1 + $0x40] sm:$0xff]   ;;  %v1221_v4 = vld [vmem:[%s1620_s1 + $0x48] sm:$0xff]   ;;  %v1225_v8 = vld [vmem:[%s1620_s1 + $0x50] sm:$0xff]  }
   0x2   :  { %v1218_v1 = vld [vmem:[%s1620_s1] sm:$0xff]   ;;  %991 = vmatprep.subr.bf16.mxu0 %v1217_v0  ;;  %v1222_v5 = vld [vmem:[%s1620_s1 + $0x8] sm:$0xff]   ;;  %v1226_v9 = vld [vmem:[%s1620_s1 + $0x10] sm:$0xff]  }
   0x3   :  { %v1219_v2 = vld [vmem:[%s1620_s1 + $0xc0] sm:$0xff]   ;;  %992 = vmatpush3.bf16.msra.mxu0 %v1218_v1  ;;  %v1223_v6 = vld [vmem:[%s1620_s1 + $0xc8] sm:$0xff]   ;;  %v1227_v10 = vld [vmem:[%s1620_s1 + $0xd0] sm:$0xff]  }
   0x4   :  { %v1220_v3 = vld [vmem:[%s1620_s1 + $0x80] sm:$0xff]   ;;  %1019 = vmatprep.subr.bf16.mxu1 %v1219_v2  ;;  %993 = vmatprep.subr.bf16.mxu0 %v1221_v4  ;;  %v1224_v7 = vld [vmem:[%s1620_s1 + $0x88] sm:$0xff]   ;;  %v1228_v11 = vld [vmem:[%s1620_s1 + $0x90] sm:$0xff]  }
   0x5   :  { %1020 = vmatpush3.bf16.msra.mxu1 %v1220_v3  ;;  %v1229_v12 = vld [vmem:[%s1620_s1 + $0x58] sm:$0xff]   ;;  %v1233_v16 = vld [vmem:[%s1620_s1 + $0x60] sm:$0xff]   ;;  %v1237_v20 = vld [vmem:[%s1620_s1 + $0x68] sm:$0xff]  }
   0x6   :  { %1021 = vmatprep.subr.bf16.mxu1 %v1223_v6  ;;  %v1230_v13 = vld [vmem:[%s1620_s1 + $0x18] sm:$0xff]   ;;  %v1234_v17 = vld [vmem:[%s1620_s1 + $0x20] sm:$0xff]   ;;  %v1238_v21 = vld [vmem:[%s1620_s1 + $0x28] sm:$0xff]  }
   0x7   :  { %994 = vmatpush3.bf16.msra.mxu0 %v1222_v5  ;;  %v1231_v14 = vld [vmem:[%s1620_s1 + $0xd8] sm:$0xff]   ;;  %v1235_v18 = vld [vmem:[%s1620_s1 + $0xe0] sm:$0xff]   ;;  %v1239_v22 = vld [vmem:[%s1620_s1 + $0xe8] sm:$0xff]  }
   0x8   :  { %995 = vmatprep.subr.bf16.mxu0 %v1225_v8  ;;  %v1232_v15 = vld [vmem:[%s1620_s1 + $0x98] sm:$0xff]   ;;  %v1236_v19 = vld [vmem:[%s1620_s1 + $0xa0] sm:$0xff]   ;;  %v1240_v23 = vld [vmem:[%s1620_s1 + $0xa8] sm:$0xff]  }
   0x9   :  { %1022 = vmatpush3.bf16.msra.mxu1 %v1224_v7  ;;  %v1241_v24 = vld [vmem:[%s1620_s1 + $0x70] sm:$0xff]   ;;  %v1245_v28 = vld [vmem:[%s1620_s1 + $0x78] sm:$0xff]   ;;  %v1252_v34 = vld [vmem:[%s1620_s1 + $0x100] sm:$0xff]  }
   0xa   :  { %1023 = vmatprep.subr.bf16.mxu1 %v1227_v10  ;;  %v1242_v25 = vld [vmem:[%s1620_s1 + $0x30] sm:$0xff]   ;;  %v1246_v29 = vld [vmem:[%s1620_s1 + $0x38] sm:$0xff]   ;;  %v1255_v36 = vld [vmem:[%s1619_s0 + $0xc] ss:$20 sps:$4 sm:$0xff]  }
   0xb   :  { %996 = vmatpush3.bf16.msra.mxu0 %v1226_v9  ;;  %v1243_v26 = vld [vmem:[%s1620_s1 + $0xf0] sm:$0xff]   ;;  %v1247_v30 = vld [vmem:[%s1620_s1 + $0xf8] sm:$0xff]   ;;  %v1256_v37 = vld [vmem:[%s1620_s1 + $0x108] sm:$0xff]   ;;  %503 = vmatprep.mubr.bf16.mxu1 %v1255_v36 }
   0xc   :  { %997 = vmatprep.subr.bf16.mxu0 %v1229_v12  ;;  %v1244_v27 = vld [vmem:[%s1620_s1 + $0xb0] sm:$0xff]   ;;  %v1250_v32 = vld [vmem:[%s1619_s0 + $0x4] ss:$20 sps:$4 sm:$0xff]   ;;  %v1253_v35 = vld [vmem:[%s1619_s0 + $0x8] ss:$20 sps:$4 sm:$0xff]  }
   0xd   :  { %1024 = vmatpush3.bf16.msra.mxu1 %v1228_v11  ;;  %v1248_v31 = vld [vmem:[%s1619_s0] ss:$20 sps:$4 sm:$0xff]   ;;  %v1251_v33 = vld [vmem:[%s1620_s1 + $0xb8] sm:$0xff]   ;;  %454 = vmatprep.mubr.bf16.mxu0 %v1250_v32  ;;  %v1266_v43 = vld [vmem:[%s1619_s0 + $0x30] ss:$20 sps:$4 sm:$0xff]  }
   0xe   :  { %1025 = vmatprep.subr.bf16.mxu1 %v1231_v14  ;;  %v1257_v38 = vld [vmem:[%s1620_s1 + $0x110] sm:$0xff]   ;;  %v1258_v39 = vld [vmem:[%s1620_s1 + $0x118] sm:$0xff]   ;;  %v1261_v40 = vld [vmem:[%s1619_s0 + $0x2c] ss:$20 sps:$4 sm:$0xff]  }
   0xf   :  { %998 = vmatpush3.bf16.msra.mxu0 %v1230_v13  ;;  %v1263_v41 = vld [vmem:[%s1619_s0 + $0x28] ss:$20 sps:$4 sm:$0xff]   ;;  %v1259_v44 = vld [vmem:[%s1620_s1 + $0x120] sm:$0xff]   ;;  %v1267_v47 = vld [vmem:[%s1620_s1 + $0x130] sm:$0xff]  }
  0x10   :  { %999 = vmatprep.subr.bf16.mxu0 %v1233_v16  ;;  %v1264_v42 = vld [vmem:[%s1619_s0 + $0x34] ss:$20 sps:$4 sm:$0xff]   ;;  %v1269_v45 = vld [vmem:[%s1619_s0 + $0x10] ss:$20 sps:$4 sm:$0xff]  }
  0x11   :  { %1026 = vmatpush3.bf16.msra.mxu1 %v1232_v15  ;;  %v1260_v46 = vld [vmem:[%s1620_s1 + $0x128] sm:$0xff]  }
  0x12   :  { %1027 = vmatprep.subr.bf16.mxu1 %v1235_v18 }
  0x13   :  { %1000 = vmatpush3.bf16.msra.mxu0 %v1234_v17 }
  0x14   :  { %1001 = vmatprep.subr.bf16.mxu0 %v1237_v20 }
  0x15   :  { %1028 = vmatpush3.bf16.msra.mxu1 %v1236_v19 }
  0x16   :  { %1029 = vmatprep.subr.bf16.mxu1 %v1239_v22 }
  0x17   :  { %1002 = vmatpush3.bf16.msra.mxu0 %v1238_v21 }
  0x18   :  { %1003 = vmatprep.subr.bf16.mxu0 %v1241_v24 }
  0x19   :  { %1030 = vmatpush3.bf16.msra.mxu1 %v1240_v23 }
  0x1a   :  { %1031 = vmatprep.subr.bf16.mxu1 %v1243_v26 }
  0x1b   :  { %1004 = vmatpush3.bf16.msra.mxu0 %v1242_v25 }
  0x1c   :  { %1005 = vmatprep.subr.bf16.mxu0 %v1245_v28 }
  0x1d   :  { %1032 = vmatpush3.bf16.msra.mxu1 %v1244_v27 }
  0x1e   :  { %1033 = vmatprep.subr.bf16.mxu1 %v1247_v30 }
  0x1f   :  { %1006 = vmatpush3.bf16.msra.mxu0 %v1246_v29 }
  0x20   :  { %1089 = vmatprep.subr.bf16.mxu0 %v1252_v34 }
  0x21   :  { %1034 = vmatpush3.bf16.msra.mxu1 %v1251_v33 }
  0x22   :  { %455 = vmatmul.mubr.bf16.vlgmr.msra.gmra.mrb[0].mxu0 %v1248_v31 }
  0x23   :  { %1090 = vmatpush3.bf16.msra.mxu0 %v1252_v34  ;;  %462 = vmatprep.mubr.bf16.mxu0 %v1261_v40 }
  0x24   :  { %504 = vmatmul.mubr.bf16.vlgmr.msra.gmra.mrb[0].mxu1 %v1253_v35  ;;  %1091 = vmatprep.subr.bf16.mxu0 %v1256_v37 }
  0x25   :  { %511 = vmatprep.mubr.bf16.mxu1 %v1264_v42 }
  0x27   :  { %1092 = vmatpush3.bf16.msra.mxu0 %v1256_v37 }
  0x28   :  { %1093 = vmatprep.subr.bf16.mxu0 %v1257_v38 }
  0x2a   :  { %463 = vmatmul.mubr.bf16.gmra.mrb[4].mxu0 %v1263_v41 }
  0x2b   :  { %1094 = vmatpush3.bf16.msra.mxu0 %v1257_v38  ;;  %1105 = vmatprep.mubr.bf16.mxu0 %v1269_v45 }
  0x2c   :  { %1095 = vmatprep.subr.bf16.mxu0 %v1258_v39  ;;  %512 = vmatmul.mubr.bf16.gmra.mrb[4].mxu1 %v1266_v43 }
  0x2f   :  { %1096 = vmatpush3.bf16.msra.mxu0 %v1258_v39 }
  0x30   :  { %1097 = vmatprep.subr.bf16.mxu0 %v1259_v44 }
  0x33   :  { %1098 = vmatpush3.bf16.msra.mxu0 %v1259_v44 }
  0x34   :  { %1099 = vmatprep.subr.bf16.mxu0 %v1260_v46 }
  0x37   :  { %1100 = vmatpush3.bf16.msra.mxu0 %v1260_v46 }
  0x38   :  { %13 = vsyncpa [#allocation3], 0  ;;  %1101 = vmatprep.subr.bf16.mxu0 %v1267_v47  ;;  %v1268_v48 = vld [vmem:[%s1620_s1 + $0x138] sm:$0xff]   ;;  %v1270_v49 = vld [vmem:[%s1623_s4] sm:$0xff]   ;;  %v1305_v60 = vmov 0.0|0.0   ;;  %vm1306_vm0 = vmmov 0   ;;  %v723_v31 = vlaneseq }
  0x39   :  { %v1271_v50 = vld [vmem:[%s1619_s0 + $0x38] ss:$20 sps:$4 sm:$0xff]   ;;  %v1279_v51 = vld [vmem:[%s1622_s3] sm:$0xff]   ;;  %v1273_v53 = vld [vmem:[%s1623_s4 + $0x10] sm:$0xff]   ;;  %1175 = vmatprep.subr.bf16.mxu1 %v1305_v60  ;;  %v1307_v61 = vmov 0.0   ;;  %vm737_vm4 = vcmask 261120  }
  0x3a   :  { %v1272_v52 = vld [vmem:[%s1623_s4 + $0x8] sm:$0xff]   ;;  %v1274_v54 = vld [vmem:[%s1623_s4 + $0x18] sm:$0xff]   ;;  %v1275_v55 = vld [vmem:[%s1623_s4 + $0x20] sm:$0xff]   ;;  %1137 = vmatprep.mubr.msk.f32.mxu1 %vm1306_vm0, %v1307_v61  ;;  %721 = vst [vmem:[#allocation2] sm:$0x3] %v1307_v61  ;;  %v728_v32 = vshrl.u32 %v723_v31, 7 }
  0x3b   :  { %1102 = vmatpush3.bf16.msra.mxu0 %v1267_v47  ;;  %v1276_v56 = vld [vmem:[%s1623_s4 + $0x28] sm:$0xff]   ;;  %v1277_v57 = vld [vmem:[%s1623_s4 + $0x30] sm:$0xff]   ;;  %v1278_v58 = vld [vmem:[%s1623_s4 + $0x38] sm:$0xff]   ;;  %v724_v47 = vand.u32 127, %v723_v31  ;;  %s1308_s19 = smov [#allocation2]  }
  0x3c   :  { %1103 = vmatprep.subr.bf16.mxu0 %v1268_v48  ;;  %v1280_v59 = vld [vmem:[%s1622_s3 + $0x8] sm:$0xff]   ;;  %v926_v63 = vld [vmem:[%s1621_s2] ss:$0 sm:$0xff]  ;;  %v729_v39 = vmul.u32 16, %v728_v32  ;;  %s918_s20 = sshll.u32 %s1308_s19, 4  ;;  %s919_s20 = int_to_ptr.vmem [resolvable:$true] %s918_s20 }
  0x3d   :  { %v987_v34 = vld [vmem:[%s1624_s5] ss:$0 sm:$0xff]  ;;  %p1286_p1 = scmp.lt.s32.totalorder %s919_s20, %s919_s20 }
  0x3e   :  { %vm730_vm1 = vcmp.ge.s32.totalorder %v724_v47, %v729_v39 }
  0x3f   :  { %1104 = vmatpush3.bf16.msra.mxu0 %v1268_v48  ;;  %v731_v48 = vadd.s32 16, %v729_v39 }
  0x40   :  { %1109 = vmatprep.subr.bf16.mxu0 %v1270_v49 }
  0x41   :  { %vm732_vm2 = vcmp.lt.s32.totalorder %v724_v47, %v731_v48 }
  0x42   :  { %1106 = vmatmul.mubr.bf16.vlgmr.msra.gmra.mrb[8].mxu0 %v1271_v50  ;;  %vm733_vm3 = vmand %vm730_vm1, %vm732_vm2 }
  0x43   :  { %1110 = vmatpush3.bf16.msra.mxu0 %v1270_v49  ;;  %1125 = vmatprep.mubr.bf16.mxu0 %v1279_v51 }
  0x44   :  { %1111 = vmatprep.subr.bf16.mxu0 %v1272_v52 }
  0x47   :  { %1112 = vmatpush3.bf16.msra.mxu0 %v1272_v52 }
  0x48   :  { %1113 = vmatprep.subr.bf16.mxu0 %v1273_v53 }
  0x4b   :  { %1114 = vmatpush3.bf16.msra.mxu0 %v1273_v53 }
  0x4c   :  { %1115 = vmatprep.subr.bf16.mxu0 %v1274_v54 }
  0x4f   :  { %1116 = vmatpush3.bf16.msra.mxu0 %v1274_v54 }
  0x50   :  { %1117 = vmatprep.subr.bf16.mxu0 %v1275_v55 }
  0x53   :  { %1118 = vmatpush3.bf16.msra.mxu0 %v1275_v55  ;;  %v818_v55 = vld [vmem:[%s1625_s6] sm:$0xff] }
  0x54   :  { %1119 = vmatprep.subr.bf16.mxu0 %v1276_v56 }
  0x57   :  { %1120 = vmatpush3.bf16.msra.mxu0 %v1276_v56  ;;  %v819_v56 = vld [vmem:[%s1625_s6 + $0x8] sm:$0xff] }
  0x58   :  { %1121 = vmatprep.subr.bf16.mxu0 %v1277_v57 }
  0x5b   :  { %1122 = vmatpush3.bf16.msra.mxu0 %v1277_v57  ;;  %v988_v57 = vsel %vm733_vm3, 1.0, %v1307_v61 }
  0x5c   :  { %1123 = vmatprep.subr.bf16.mxu0 %v1278_v58 }
  0x5f   :  { %1124 = vmatpush3.bf16.msra.mxu0 %v1278_v58  ;;  %v1182_v58 = vpack.c.bf16 %v819_v56, %v818_v55 }
  0x62   :  { %1126 = vmatmul.mubr.bf16.vlgmr.msra.gmra.mrb[8].mxu0 %v1280_v59  ;;  %v820_v59 = vld [vmem:[%s1625_s6 + $0x10] sm:$0xff] }
  0xf5   :  { %v1007_v62 = vpop.f32.mrb[0].mxu0 }
  0xf6   :  { %v1008_v0 = vpop.f32.mrb[1].mxu0 }
  0xf7   :  { %v1009_v1 = vadd.f32 %v1008_v0, %v1007_v62  ;;  %v1010_v2 = vpop.f32.mrb[2].mxu0  ;;  %v1035_v3 = vpop.f32.mrb[0].mxu1  ;;  %v821_v62 = vld [vmem:[%s1625_s6 + $0x18] sm:$0xff]  ;;  %v822_v0 = vld [vmem:[%s1625_s6 + $0x20] sm:$0xff] }
  0xf8   :  { %v1011_v4 = vpop.f32.mrb[3].mxu0  ;;  %v1036_v7 = vpop.f32.mrb[1].mxu1 }
  0xf9   :  { %v457_v5 = vadd.f32 %v1009_v1, %v926_v63  ;;  %v1012_v6 = vadd.f32 %v1011_v4, %v1010_v2  ;;  %v1037_v8 = vadd.f32 %v1036_v7, %v1035_v3  ;;  %v1038_v9 = vpop.f32.mrb[2].mxu1  ;;  %v823_v1 = vld [vmem:[%s1625_s6 + $0x28] sm:$0xff]  ;;  %v824_v3 = vld [vmem:[%s1625_s6 + $0x30] sm:$0xff] }
  0xfa   :  { %v1039_v11 = vpop.f32.mrb[3].mxu1  ;;  %v1188_v2 = vpack.c.bf16 %v823_v1, %v822_v0 }
  0xfb   :  { %v460_v10 = vadd.f32 %v1012_v6, %v926_v63  ;;  %v1040_v12 = vadd.f32 %v1039_v11, %v1038_v9  ;;  %v506_v13 = vadd.f32 %v1037_v8, %v457_v5  ;;  %v826_v5 = vld [vmem:[%s1625_s6 + $0x40] sm:$0xff]  ;;  %v827_v6 = vld [vmem:[%s1625_s6 + $0x48] sm:$0xff]  ;;  %v828_v8 = vld [vmem:[%s1625_s6 + $0x50] sm:$0xff] }
  0xfc   :  { %v1194_v7 = vpack.c.bf16 %v827_v6, %v826_v5  ;;  %v829_v9 = vld [vmem:[%s1625_s6 + $0x58] sm:$0xff]  ;;  %v830_v11 = vld [vmem:[%s1625_s6 + $0x60] sm:$0xff] }
  0xfd   :  { %v1013_v14 = vpop.f32.mrb[4].mxu0  ;;  %v509_v15 = vadd.f32 %v1040_v12, %v460_v10  ;;  %v1197_v10 = vpack.c.bf16 %v829_v9, %v828_v8  ;;  %v831_v12 = vld [vmem:[%s1625_s6 + $0x68] sm:$0xff] }
  0xfe   :  { %v1014_v16 = vpop.f32.mrb[5].mxu0 }
  0xff   :  { %v1015_v17 = vadd.f32 %v1014_v16, %v1013_v14  ;;  %v1016_v18 = vpop.f32.mrb[6].mxu0  ;;  %v1041_v19 = vpop.f32.mrb[4].mxu1  ;;  %v1200_v14 = vpack.c.bf16 %v831_v12, %v830_v11 }
 0x100   :  { %v1017_v20 = vpop.f32.mrb[7].mxu0  ;;  %v1042_v21 = vpop.f32.mrb[5].mxu1 }
 0x101   :  { %v465_v22 = vadd.f32 %v1015_v17, %v926_v63  ;;  %v1018_v23 = vadd.f32 %v1017_v20, %v1016_v18  ;;  %v1043_v24 = vadd.f32 %v1042_v21, %v1041_v19  ;;  %v1044_v25 = vpop.f32.mrb[6].mxu1  ;;  %v736_v17 = vld [vmem:[#allocation2] sm:$0x3] }
 0x102   :  { %v1045_v26 = vpop.f32.mrb[7].mxu1 }
 0x103   :  { %v468_v27 = vadd.f32 %v1018_v23, %v926_v63  ;;  %v1046_v28 = vadd.f32 %v1045_v26, %v1044_v25  ;;  %v514_v29 = vadd.f32 %v1043_v24, %v465_v22  ;;  %v1185_v63 = vpack.c.bf16 %v821_v62, %v820_v59  ;;  %v990_v23 = vld [vmem:[%s1626_s7] ss:$0 sm:$0xff] }
 0x105   :  { %v517_v30 = vadd.f32 %v1046_v28, %v468_v27 }
 0x135   :  { %v1127_v33 = vpop.f32.mrb[8].mxu0 }
 0x136   :  { %v1205_v35 = vadd.f32 %v1127_v33, %v514_v29  ;;  %v683_v36 = vpop.f32.mrb[9].mxu0 }
 0x137   :  { %v1206_v37 = vadd.f32 %v683_v36, %v506_v13  ;;  %v1128_v38 = vpop.f32.mrb[10].mxu0  ;;  %v832_v13 = vld [vmem:[%s1625_s6 + $0x70] sm:$0xff] }
 0x138   :  { %v711_v40 = vadd.f32 %v1205_v35, %v987_v34  ;;  %v1207_v41 = vadd.f32 %v1128_v38, %v517_v30  ;;  %v686_v42 = vpop.f32.mrb[11].mxu0 }
 0x139   :  { %v709_v43 = vadd.f32 %v1206_v37, %v987_v34  ;;  %v1208_v44 = vadd.f32 %v686_v42, %v509_v15  ;;  %v833_v15 = vld [vmem:[%s1625_s6 + $0x78] sm:$0xff] }
 0x13a   :  { %v712_v45 = vadd.f32 %v1207_v41, %v987_v34  ;;  %v715_v49 = vmax.f32 %v711_v40, 0.0  ;;  %v1203_v16 = vpack.c.bf16 %v833_v15, %v832_v13 }
 0x13b   :  { %v710_v46 = vadd.f32 %v1208_v44, %v987_v34  ;;  %v713_v51 = vmax.f32 %v709_v43, 0.0 }
 0x13c   :  { %v716_v50 = vmax.f32 %v712_v45, 0.0 }
 0x13d   :  { %v714_v52 = vmax.f32 %v710_v46, 0.0 }
 0x13e   :  { %v1179_v53 = vpack.c.bf16 %v716_v50, %v715_v49 }
 0x13f   :  { %v1176_v54 = vpack.c.bf16 %v714_v52, %v713_v51 }
 0x141   :  { %1177 = vmatpush3.bf16.msra.mxu1 %v1176_v54 }
 0x142   :  { %1178 = vmatprep.subr.bf16.mxu1 %v1305_v60 }
 0x145   :  { %1180 = vmatpush3.bf16.msra.mxu1 %v1179_v53 }
 0x146   :  { %1181 = vmatprep.subr.bf16.mxu1 %v1305_v60 }
 0x148   :  { %1138 = vmatmul.mubr.msk.f32.vlgmr.msra.gmra.mrb[8].mxu1 %vm737_vm4, %v988_v57 }
 0x149   :  { %1183 = vmatpush3.bf16.msra.mxu1 %v1182_v58  ;;  %1172 = vmatprep.mubr.msk.f32.mxu1 %vm1306_vm0, %v1307_v61  ;;  %v825_v61 = vld [vmem:[%s1625_s6 + $0x38] sm:$0xff]  ;;  %s1281_s6 = scalar_lea.vmem %s919_s20, 32 }
 0x14a   :  { %1184 = vmatprep.subr.bf16.mxu1 %v1305_v60  ;;  %v1191_v4 = vpack.c.bf16 %v825_v61, %v824_v3  ;;  %p1282_p0 = scmp.ne.s32.totalorder %s919_s20, %s1281_s6  ;;  %p1287_p2 = scmp.lt.s32.totalorder %s1281_s6, %s1281_s6 }
 0x14c   :  { %p1288_p3 = por %p1287_p2, %p1286_p1 }
 0x14d   :  { %1186 = vmatpush3.bf16.msra.mxu1 %v1185_v63 }
 0x14e   :  { %1187 = vmatprep.subr.bf16.mxu1 %v1305_v60  ;;  %p1289_p4 = pnand %p1288_p3, %p1282_p0 }
 0x151   :  { %1189 = vmatpush3.bf16.msra.mxu1 %v1188_v2 }
 0x152   :  { %1190 = vmatprep.subr.bf16.mxu1 %v1305_v60 }
 0x155   :  { %1192 = vmatpush3.bf16.msra.mxu1 %v1191_v4 }
 0x156   :  { %1193 = vmatprep.subr.bf16.mxu1 %v1305_v60 }
 0x159   :  { %1195 = vmatpush3.bf16.msra.mxu1 %v1194_v7 }
 0x15a   :  { %1196 = vmatprep.subr.bf16.mxu1 %v1305_v60 }
 0x15d   :  { %1198 = vmatpush3.bf16.msra.mxu1 %v1197_v10 }
 0x15e   :  { %1199 = vmatprep.subr.bf16.mxu1 %v1305_v60 }
 0x161   :  { %1201 = vmatpush3.bf16.msra.mxu1 %v1200_v14 }
 0x162   :  { %1202 = vmatprep.subr.bf16.mxu1 %v1305_v60 }
 0x165   :  { %1204 = vmatpush3.bf16.msra.mxu1 %v1203_v16 }
 0x21b   :  { %v807_v18 = vpop.f32.mrb[8].mxu1 }
 0x21c   :  { %v811_v19 = vadd.f32 %v807_v18, %v736_v17  ;;  %v1139_v20 = vpop.f32.mrb[9].mxu1 }
 0x21e   :  { %812 = vst [vmem:[#allocation2] sm:$0x3] %v811_v19 }
 0x225   :  { %v816_v21 = vld [vmem:[#allocation2] sm:$0x3] }
 0x226   :  { %v817_v22 = vmul.f32 0.0625, %v816_v21 }
 0x228   :  { %1173 = vmatmul.mubr.f32.vlgmr.msra.gmra.mrb[10].mxu1 %v817_v22 }
 0x2fb   :  { %v907_v24 = vpop.f32.mrb[10].mxu1 }
 0x2fc   :  { %v908_v25 = vadd.f32 %v990_v23, %v907_v24  ;;  %v1174_v26 = vpop.f32.mrb[11].mxu1 }
 0x2fe   :  { %911 = vst [vmem:[#allocation2] sm:$0x3] %v908_v25 }
 0x2ff   :  { %1292 = shalt.err (!%p1289_p4)
}
 0x300   :  { %s1293_s1 = scalar_lea.hbm %s1627_s8, 32 }
 0x301   :  { %p1294_p5 = scmp.ne.s32.totalorder %s1627_s8, %s1293_s1  ;;  %p1297_p6 = scmp.lt.u32.totalorder %s1293_s1, %s1627_s8 }
 0x303   :  { %p1299_p7 = pnand %p1297_p6, %p1294_p5 }
 0x305   :  { %1302 = shalt.err (!%p1299_p7)
}
 0x306   :  { %921 = dma.vmem_to_hbm [thread:$0]  %s919_s20, 32, %s1627_s8, [#allocation3]  }
 0x307   :  { %1303 = dma.done.wait [#allocation3], 32  }
 0x308   :  { %1304 = vsyncadd [#allocation3], 4294967264 }
 0x309   :  { %925 = vsyncpa [#allocation3], 1 }

</bundles_post_ra>
